<compile_context>
chip_gen: v7x
topology: tpu7x:2x2x1
jax: 0.10.0
libtpu: 0.0.40
codegen_flags: <defaults>
</compile_context>

<pallas_src>
import math
from functools import partial

import jax
import jax.numpy as jnp
from jax.experimental import pallas as pl
from jax.experimental.pallas import tpu as pltpu


# ----------------------------------------------------------------------------
# Kernels
# ----------------------------------------------------------------------------
def _layernorm(x, w, b, eps=1e-5):
    mu = jnp.mean(x, axis=-1, keepdims=True)
    var = jnp.mean(jnp.square(x - mu), axis=-1, keepdims=True)
    return (x - mu) * jax.lax.rsqrt(var + eps) * w + b


def trunk_kernel(
    x_ref, pe_ref, ln1_w_ref, ln1_b_ref, wqkv_ref, wo_ref,
    ln2_w_ref, ln2_b_ref, fc1_w_ref, fc1_b_ref, fc2_w_ref, fc2_b_ref,
    out_ref, *, nb_heads, dim_qk, dim_v, causal,
):
    """One transformer block for NB sequences.  Grid = (batch_tiles, blocks).

    The residual lives in the VMEM-resident output block (its block index is
    constant across the block axis), so activations never touch HBM between
    blocks; weights are streamed per block (double-buffered by BlockSpec).
    """
    NB, T, C = x_ref.shape
    NBT = NB * T
    blk = pl.program_id(1)

    # Prologue (first block only): residual <- embeddings + positional enc.
    @pl.when(blk == 0)
    def _init():
        out_ref[...] = x_ref[...] + pe_ref[...][None, :, :]

    r = out_ref[...].reshape(NBT, C)                     # (NB*T, C) f32

    # --- attention sub-block --------------------------------------------
    xn = _layernorm(r, ln1_w_ref[0], ln1_b_ref[0])
    # fused QKV projection: one MXU matmul over all NB*T rows, bf16 operands,
    # f32 accumulation.  1/sqrt(dim_qk) is pre-folded into the Wq columns.
    qkv = jnp.dot(xn.astype(jnp.bfloat16), wqkv_ref[0],
                  preferred_element_type=jnp.float32)    # (NBT, H*(2Dk+Dv))

    if causal:
        row = jax.lax.broadcasted_iota(jnp.int32, (T, T), 0)
        col = jax.lax.broadcasted_iota(jnp.int32, (T, T), 1)
        # large finite negative (robust vs. -inf NaNs); hoisted out of loops
        neg_mask = jnp.where(row < col, -1e30, 0.0).astype(jnp.float32)[None]

    k_base = nb_heads * dim_qk
    v_base = 2 * nb_heads * dim_qk
    avs = []
    # TODO(synk): switch to a flash-style KV-tiled online softmax before T
    # grows beyond ~128 (full (T, T) f32 scores per head held in vregs here).
    for h in range(nb_heads):                            # static unroll (H small)
        q = qkv[:, h * dim_qk:(h + 1) * dim_qk].reshape(NB, T, dim_qk)
        k = qkv[:, k_base + h * dim_qk: k_base + (h + 1) * dim_qk
                ].reshape(NB, T, dim_qk)
        v = qkv[:, v_base + h * dim_v: v_base + (h + 1) * dim_v
                ].reshape(NB, T, dim_v)

        # per-sequence scores, batched over NB (single dot_general)
        a = jnp.einsum('btd,bsd->bts',
                       q.astype(jnp.bfloat16), k.astype(jnp.bfloat16),
                       preferred_element_type=jnp.float32)   # (NB, T, T)
        if causal:
            a = a + neg_mask
        a = a - jnp.max(a, axis=-1, keepdims=True)
        p = jnp.exp(a)
        # approx reciprocal (EUP): <1% relative error on attention rows.
        p = p * pl.reciprocal(jnp.sum(p, axis=-1, keepdims=True), approx=True)
        av = jnp.einsum('bts,bsd->btd',
                        p.astype(jnp.bfloat16), v.astype(jnp.bfloat16),
                        preferred_element_type=jnp.float32)  # (NB, T, Dv)
        avs.append(av.reshape(NBT, dim_v))

    # fuse the output projection across heads: one (NBT, H*Dv) @ (H*Dv, C)
    av_slab = jnp.concatenate(avs, axis=-1)              # (NBT, H*Dv)
    y = jnp.dot(av_slab.astype(jnp.bfloat16), wo_ref[0],
                preferred_element_type=jnp.float32)      # (NBT, C)
    r = r + y

    # --- FFN sub-block ----------------------------------------------------
    xn = _layernorm(r, ln2_w_ref[0], ln2_b_ref[0])
    hdn = jnp.dot(xn.astype(jnp.bfloat16), fc1_w_ref[0],
                  preferred_element_type=jnp.float32) + fc1_b_ref[0]
    hdn = jnp.maximum(hdn, 0.0)
    y = jnp.dot(hdn.astype(jnp.bfloat16), fc2_w_ref[0],
                preferred_element_type=jnp.float32) + fc2_b_ref[0]
    r = r + y

    out_ref[...] = r.reshape(NB, T, C)


def readout_kernel(x_ref, w_ref, b_ref, out_ref):
    out_ref[...] = (
        jnp.dot(x_ref[...].astype(jnp.bfloat16), w_ref[...],
                preferred_element_type=jnp.float32)
        + b_ref[...]
    )


# ----------------------------------------------------------------------------
# Wrappers
# ----------------------------------------------------------------------------
def _pick_nb(N, T, target_rows=128):
    """Sequences per grid step: NB*T ~ target_rows, N % NB == 0, and keep
    >= 2 batch tiles when possible so the grid can split across v7x cores."""
    nb = max(1, min(N, max(1, target_rows // max(T, 1))))
    while nb > 1 and N % nb != 0:
        nb -= 1
    if nb > 1 and N // nb < 2:
        nb = max(1, nb // 2)
        while nb > 1 and N % nb != 0:
            nb -= 1
    return nb


def _trunk_cost(N, T, C, H, Dk, Dv, Hid, nb_blocks):
    qkvd = H * (2 * Dk + Dv)
    flops_blk = (2 * N * T * C * qkvd            # qkv projection
                 + 2 * N * H * T * T * Dk        # scores
                 + 2 * N * H * T * T * Dv        # AV
                 + 2 * N * T * (H * Dv) * C      # output projection
                 + 2 * N * T * C * Hid           # fc1
                 + 2 * N * T * Hid * C)          # fc2
    trans_blk = N * H * T * T + 4 * N * T        # exp + rsqrt/recip
    w_bytes = nb_blocks * 2 * (C * qkvd + H * Dv * C + 2 * C * Hid)  # bf16
    act_bytes = 2 * N * T * C * 4
    return pl.CostEstimate(flops=int(nb_blocks * flops_blk),
                           transcendentals=int(nb_blocks * trans_blk),
                           bytes_accessed=int(w_bytes + act_bytes))


def _trunk_vmem_bytes(NB, T, C, H, Dk, Dv, Hid):
    qkvd = H * (2 * Dk + Dv)
    act = NB * T * C * 4                                  # x block (f32)
    out = NB * T * C * 4                                  # resident residual
    pe = T * C * 4
    wblk = 2 * (C * qkvd + H * Dv * C + 2 * C * Hid) + 4 * (4 * C + 2 * Hid)
    est = 2 * (act + pe + wblk) + out + (8 << 20)         # 2x = pipeline bufs
    return int(min(128 << 20, max(32 << 20, est)))


def run_trunk(x, pe, trunk_params, *, nb_blocks, nb_heads, dim_qk, dim_v,
              causal, dim_hidden):
    N, T, C = x.shape
    NB = _pick_nb(N, T)
    grid = (N // NB, nb_blocks)

    def wspec(arr):
        nd = arr.ndim
        return pl.BlockSpec((1,) + arr.shape[1:],
                            lambda n, b, _nd=nd: (b,) + (0,) * (_nd - 1))

    kernel = partial(trunk_kernel, nb_heads=nb_heads, dim_qk=dim_qk,
                     dim_v=dim_v, causal=causal)
    return pl.pallas_call(
        kernel,
        out_shape=jax.ShapeDtypeStruct((N, T, C), jnp.float32),
        grid=grid,
        in_specs=[pl.BlockSpec((NB, T, C), lambda n, b: (n, 0, 0)),
                  pl.BlockSpec((T, C), lambda n, b: (0, 0))]
                 + [wspec(p) for p in trunk_params],
        out_specs=pl.BlockSpec((NB, T, C), lambda n, b: (n, 0, 0)),
        compiler_params=pltpu.CompilerParams(
            dimension_semantics=("parallel", "arbitrary"),
            vmem_limit_bytes=_trunk_vmem_bytes(NB, T, C, nb_heads, dim_qk,
                                               dim_v, dim_hidden)),
        cost_estimate=_trunk_cost(N, T, C, nb_heads, dim_qk, dim_v,
                                  dim_hidden, nb_blocks),
    )(x, pe, *trunk_params)


def _pick_tile(total, target, align):
    t = min(target, total)
    t -= t % align
    while t >= align and total % t:
        t -= align
    return t if t >= align and total % t == 0 else total


def run_readout(x2d, w, b, *, tm=256, tn=256):
    # Tiled, lane-dense readout matmul: grid over (M tiles, V tiles).
    # TODO(synk): add a K-tiled accumulator axis (last, "arbitrary") once
    # vocab / dim_model grow beyond single-block contraction.
    M, C = x2d.shape
    V = w.shape[1]
    tm = _pick_tile(M, tm, 8)
    tn = _pick_tile(V, tn, 128)
    grid = (pl.cdiv(M, tm), pl.cdiv(V, tn))
    return pl.pallas_call(
        readout_kernel,
        out_shape=jax.ShapeDtypeStruct((M, V), jnp.float32),
        grid=grid,
        in_specs=[pl.BlockSpec((tm, C), lambda i, j: (i, 0)),
                  pl.BlockSpec((C, tn), lambda i, j: (0, j)),
                  pl.BlockSpec((1, tn), lambda i, j: (0, j))],
        out_specs=pl.BlockSpec((tm, tn), lambda i, j: (i, j)),
        compiler_params=pltpu.CompilerParams(
            dimension_semantics=("parallel", "parallel")),
    )(x2d, w, b)


def positional_encoding_table(T, C, len_max):
    # matches AddPositionalEncoding.forward (the sin(t) addend)
    u = jnp.arange(T, dtype=jnp.float32)[:, None]
    j = jnp.arange(C, dtype=jnp.float32)[None, :]
    k = j % 2.0
    t = u / (len_max ** ((j - k) / C)) + (math.pi / 2.0) * k
    return jnp.sin(t)                                     # (T, C)


def picogpt_forward(tokens, kernel_params, *, nb_blocks, nb_heads, dim_qk,
                    dim_v, dim_hidden, causal, len_max):
    emb, trunk, ro_w, ro_b = kernel_params
    N, T = tokens.shape
    C = emb.shape[1]
    # F.pad(input, (1, -1)): shift tokens right by one, pad with token 0.
    shifted = jnp.concatenate(
        [jnp.zeros((N, 1), dtype=tokens.dtype), tokens[:, :-1]], axis=1)
    x = emb[shifted]                                   # embedding gather (glue)
    pe = positional_encoding_table(T, C, len_max)      # tiny (T, C) table
    x = run_trunk(x, pe, trunk, nb_blocks=nb_blocks, nb_heads=nb_heads,
                  dim_qk=dim_qk, dim_v=dim_v, causal=causal,
                  dim_hidden=dim_hidden)
    logits = run_readout(x.reshape(N * T, C), ro_w, ro_b)
    return logits.reshape(N, T, ro_w.shape[1])


# ----------------------------------------------------------------------------
# Parameters: module-layout init (shapes follow the PyTorch module), then
# a packing step that lays weights out for the kernels (fused QKV with the
# softmax scale folded into Wq, cross-head Wo, (in,out) linears, bf16 storage).
# ----------------------------------------------------------------------------
def init_params(key, *, voc_size, dim_model, dim_keys, dim_hidden,
                nb_heads, nb_blocks):
    dim_v = dim_model // nb_heads
    keys = iter(jax.random.split(key, 8 * nb_blocks + 3))

    emb = jax.random.normal(next(keys), (voc_size, dim_model),
                            dtype=jnp.float32) * 0.02

    def randw(k, *d):
        return jax.random.normal(k, d, dtype=jnp.float32) / math.sqrt(d[-1])

    blocks = []
    for _ in range(nb_blocks):
        blk = dict(
            ln1_w=jnp.ones((dim_model,), jnp.float32),
            ln1_b=jnp.zeros((dim_model,), jnp.float32),
            wq=randw(next(keys), nb_heads, dim_keys, dim_model),
            wk=randw(next(keys), nb_heads, dim_keys, dim_model),
            wv=randw(next(keys), nb_heads, dim_v, dim_model),
            wo=randw(next(keys), dim_v * nb_heads, dim_model),
            ln2_w=jnp.ones((dim_model,), jnp.float32),
            ln2_b=jnp.zeros((dim_model,), jnp.float32),
            fc1_w=randw(next(keys), dim_hidden, dim_model),   # torch (out, in)
            fc1_b=jax.random.normal(next(keys), (dim_hidden,),
                                    jnp.float32) * 0.01,
            fc2_w=randw(next(keys), dim_model, dim_hidden),
            fc2_b=jax.random.normal(next(keys), (dim_model,),
                                    jnp.float32) * 0.01,
        )
        blocks.append(blk)

    ro_w = randw(next(keys), voc_size, dim_model)             # torch (out, in)
    ro_b = jax.random.normal(next(keys), (voc_size,), jnp.float32) * 0.01
    return emb, blocks, ro_w, ro_b


def pack_params(params):
    emb, blocks, ro_w, ro_b = params
    H, Dk, C = blocks[0]['wq'].shape
    scale = 1.0 / math.sqrt(Dk)

    def stack_vec(name):
        return jnp.stack([b[name] for b in blocks])[:, None, :]   # (B, 1, dim)

    def cols(w):                         # (H, D, C) -> (C, H*D)  (head-major)
        return jnp.transpose(w, (2, 0, 1)).reshape(C, -1)

    # softmax scale is folded into the Wq columns here (not applied at runtime)
    wqkv = jnp.stack([
        jnp.concatenate([cols(b['wq']) * scale, cols(b['wk']), cols(b['wv'])],
                        axis=1)
        for b in blocks]).astype(jnp.bfloat16)          # (B, C, H*(2Dk+Dv))
    wo = jnp.stack([b['wo'] for b in blocks]).astype(jnp.bfloat16)  # (B, H*Dv, C)
    fc1_w = jnp.stack([b['fc1_w'].T for b in blocks]).astype(jnp.bfloat16)
    fc2_w = jnp.stack([b['fc2_w'].T for b in blocks]).astype(jnp.bfloat16)

    trunk = (stack_vec('ln1_w'), stack_vec('ln1_b'), wqkv, wo,
             stack_vec('ln2_w'), stack_vec('ln2_b'),
             fc1_w, stack_vec('fc1_b'), fc2_w, stack_vec('fc2_b'))
    ro_wT = ro_w.T.astype(jnp.bfloat16)                 # (C, V)
    ro_b2 = ro_b[None, :]                               # (1, V)
    return emb, trunk, ro_wT, ro_b2


# ----------------------------------------------------------------------------
# Pure-JAX reference (mirrors the PyTorch forward, f32) for correctness check
# ----------------------------------------------------------------------------
def ref_forward(tokens, params, *, nb_heads, dim_qk, causal, len_max):
    emb, blocks, ro_w, ro_b = params
    N, T = tokens.shape
    shifted = jnp.concatenate(
        [jnp.zeros((N, 1), dtype=tokens.dtype), tokens[:, :-1]], axis=1)
    x = emb[shifted]
    x = x + positional_encoding_table(T, x.shape[-1], len_max)[None]
    for blk in blocks:
        r = x
        xn = _layernorm(r, blk['ln1_w'], blk['ln1_b'])
        q = jnp.einsum('ntc,hdc->nhtd', xn, blk['wq'])
        k = jnp.einsum('ntc,hdc->nhtd', xn, blk['wk'])
        v = jnp.einsum('ntc,hdc->nhtd', xn, blk['wv'])
        a = jnp.einsum('nhtd,nhsd->nhts', q, k) / math.sqrt(dim_qk)
        if causal:
            t = jnp.arange(T)
            mask = t[None, None, :, None] < t[None, None, None, :]
            a = jnp.where(mask, -jnp.inf, a)
        a = jax.nn.softmax(a, axis=-1)
        y = jnp.einsum('nhts,nhsd->nthd', a, v).reshape(N, T, -1)
        y = y @ blk['wo']
        r = r + y
        xn = _layernorm(r, blk['ln2_w'], blk['ln2_b'])
        h = jnp.maximum(xn @ blk['fc1_w'].T + blk['fc1_b'], 0.0)
        y = h @ blk['fc2_w'].T + blk['fc2_b']
        x = r + y
    return x @ ro_w.T + ro_b


# ----------------------------------------------------------------------------
if __name__ == "__main__":
    # Lane-dense config: C=128 lanes, hidden=256, vocab=128, T=16.
    # N=16 so each trunk grid step sees NB=8 sequences (NB*T = 128 MXU rows)
    # while keeping 2 batch tiles for megacore.
    voc_size, dim_model, dim_keys, dim_hidden = 128, 128, 32, 256
    nb_heads, nb_blocks, causal = 2, 2, True
    len_max = 100000.0
    N, T = 16, 16
    dim_v = dim_model // nb_heads

    key = jax.random.PRNGKey(0)
    key_tok, key_w = jax.random.split(key)
    tokens = jax.random.randint(key_tok, (N, T), 0, voc_size, dtype=jnp.int32)

    params = init_params(key_w, voc_size=voc_size, dim_model=dim_model,
                         dim_keys=dim_keys, dim_hidden=dim_hidden,
                         nb_heads=nb_heads, nb_blocks=nb_blocks)
    kernel_params = pack_params(params)

    out = picogpt_forward(tokens, kernel_params, nb_blocks=nb_blocks,
                          nb_heads=nb_heads, dim_qk=dim_keys, dim_v=dim_v,
                          dim_hidden=dim_hidden, causal=causal,
                          len_max=len_max)
    out = jax.block_until_ready(out)

    ref = ref_forward(tokens, params, nb_heads=nb_heads, dim_qk=dim_keys,
                      causal=causal, len_max=len_max)
    assert out.shape == (N, T, voc_size), out.shape
    # bf16 matmul operands + approx-reciprocal softmax -> relative tolerance.
    err = float(jnp.max(jnp.abs(out - ref)))
    scale_ref = float(jnp.max(jnp.abs(ref))) + 1e-6
    assert err / scale_ref < 5e-2, (err, scale_ref)

    # TODO(synk): cross_entropy() and inplace_ar() (training loss / sampling
    # loop) are not part of the forward hot path; not ported.
    print("KERNEL_OK")
</pallas_src>

<mosaic_0001>
module attributes {stable_mosaic.version = 11 : i64} {
  func.func @trunk_kernel(%arg0: i32, %arg1: i32, %arg2: memref<8x16x128xf32, #tpu.memory_space<vmem>>, %arg3: memref<16x128xf32, #tpu.memory_space<vmem>>, %arg4: memref<1x1x128xf32, #tpu.memory_space<vmem>>, %arg5: memref<1x1x128xf32, #tpu.memory_space<vmem>>, %arg6: memref<1x128x256xbf16, #tpu.memory_space<vmem>>, %arg7: memref<1x128x128xbf16, #tpu.memory_space<vmem>>, %arg8: memref<1x1x128xf32, #tpu.memory_space<vmem>>, %arg9: memref<1x1x128xf32, #tpu.memory_space<vmem>>, %arg10: memref<1x128x256xbf16, #tpu.memory_space<vmem>>, %arg11: memref<1x1x256xf32, #tpu.memory_space<vmem>>, %arg12: memref<1x256x128xbf16, #tpu.memory_space<vmem>>, %arg13: memref<1x1x128xf32, #tpu.memory_space<vmem>>, %arg14: memref<8x16x128xf32, #tpu.memory_space<vmem>>) attributes {dimension_semantics = [#tpu.dimension_semantics<parallel>, #tpu.dimension_semantics<arbitrary>], iteration_bounds = array<i64: 2, 2>, scalar_prefetch = 0 : i64, scratch_operands = 0 : i64, tpu.core_type = #tpu.core_type<tc>, window_params = [{transform_indices = @transform_0, window_bounds = array<i64: 8, 16, 128>}, {pipeline_mode = #tpu.pipeline_mode<synchronous>, transform_indices = @transform_1, window_bounds = array<i64: 16, 128>}, {transform_indices = @transform_2, window_bounds = array<i64: 1, 1, 128>}, {transform_indices = @transform_3, window_bounds = array<i64: 1, 1, 128>}, {transform_indices = @transform_4, window_bounds = array<i64: 1, 128, 256>}, {transform_indices = @transform_5, window_bounds = array<i64: 1, 128, 128>}, {transform_indices = @transform_6, window_bounds = array<i64: 1, 1, 128>}, {transform_indices = @transform_7, window_bounds = array<i64: 1, 1, 128>}, {transform_indices = @transform_8, window_bounds = array<i64: 1, 128, 256>}, {transform_indices = @transform_9, window_bounds = array<i64: 1, 1, 256>}, {transform_indices = @transform_10, window_bounds = array<i64: 1, 256, 128>}, {transform_indices = @transform_11, window_bounds = array<i64: 1, 1, 128>}, {transform_indices = @transform_12, window_bounds = array<i64: 8, 16, 128>}]} {
    %c0_i32 = arith.constant 0 : i32
    %0 = arith.cmpi eq, %arg1, %c0_i32 : i32
    %1 = arith.extui %0 : i1 to i32
    %c0_i32_0 = arith.constant 0 : i32
    %2 = arith.cmpi ne, %1, %c0_i32_0 : i32
    scf.if %2 {
      %c0_60 = arith.constant 0 : index
      %c0_61 = arith.constant 0 : index
      %c0_62 = arith.constant 0 : index
      %145 = vector.load %arg2[%c0_60, %c0_61, %c0_62] : memref<8x16x128xf32, #tpu.memory_space<vmem>>, vector<8x16x128xf32>
      %c0_63 = arith.constant 0 : index
      %c0_64 = arith.constant 0 : index
      %146 = vector.load %arg3[%c0_63, %c0_64] : memref<16x128xf32, #tpu.memory_space<vmem>>, vector<16x128xf32>
      %147 = vector.shape_cast %146 : vector<16x128xf32> to vector<1x16x128xf32>
      %148 = vector.broadcast %147 : vector<1x16x128xf32> to vector<8x16x128xf32>
      %149 = arith.addf %145, %148 : vector<8x16x128xf32>
      %c0_65 = arith.constant 0 : index
      %c0_66 = arith.constant 0 : index
      %c0_67 = arith.constant 0 : index
      %150 = vector.load %arg14[%c0_65, %c0_66, %c0_67] : memref<8x16x128xf32, #tpu.memory_space<vmem>>, vector<8x16x128xf32>
      tpu.vector_store %arg14[%c0_65, %c0_66, %c0_67], %149 {strides = array<i32>} : memref<8x16x128xf32, #tpu.memory_space<vmem>>, vector<8x16x128xf32>,
    } else {
    }
    %c0 = arith.constant 0 : index
    %c0_1 = arith.constant 0 : index
    %c0_2 = arith.constant 0 : index
    %3 = vector.load %arg14[%c0, %c0_1, %c0_2] : memref<8x16x128xf32, #tpu.memory_space<vmem>>, vector<8x16x128xf32>
    %4 = vector.shape_cast %3 : vector<8x16x128xf32> to vector<128x128xf32>
    %c0_3 = arith.constant 0 : index
    %c0_4 = arith.constant 0 : index
    %c0_5 = arith.constant 0 : index
    %5 = vector.load %arg4[%c0_3, %c0_4, %c0_5] : memref<1x1x128xf32, #tpu.memory_space<vmem>>, vector<1x1x128xf32>
    %6 = vector.shape_cast %5 : vector<1x1x128xf32> to vector<1x128xf32>
    %c0_6 = arith.constant 0 : index
    %c0_7 = arith.constant 0 : index
    %c0_8 = arith.constant 0 : index
    %7 = vector.load %arg5[%c0_6, %c0_7, %c0_8] : memref<1x1x128xf32, #tpu.memory_space<vmem>>, vector<1x1x128xf32>
    %8 = vector.shape_cast %7 : vector<1x1x128xf32> to vector<1x128xf32>
    %cst = arith.constant dense<0.000000e+00> : vector<128xf32>
    %9 = vector.multi_reduction <add>, %4, %cst [1] : vector<128x128xf32> to vector<128xf32>
    %10 = vector.shape_cast %9 : vector<128xf32> to vector<128x1xf32>
    %cst_9 = arith.constant 1.280000e+02 : f32
    %11 = vector.broadcast %cst_9 : f32 to vector<128x1xf32>
    %12 = arith.divf %10, %11 : vector<128x1xf32>
    %13 = vector.broadcast %12 : vector<128x1xf32> to vector<128x128xf32>
    %14 = arith.subf %4, %13 : vector<128x128xf32>
    %15 = arith.mulf %14, %14 : vector<128x128xf32>
    %cst_10 = arith.constant dense<0.000000e+00> : vector<128xf32>
    %16 = vector.multi_reduction <add>, %15, %cst_10 [1] : vector<128x128xf32> to vector<128xf32>
    %17 = vector.shape_cast %16 : vector<128xf32> to vector<128x1xf32>
    %cst_11 = arith.constant 1.280000e+02 : f32
    %18 = vector.broadcast %cst_11 : f32 to vector<128x1xf32>
    %19 = arith.divf %17, %18 : vector<128x1xf32>
    %20 = vector.broadcast %12 : vector<128x1xf32> to vector<128x128xf32>
    %21 = arith.subf %4, %20 : vector<128x128xf32>
    %cst_12 = arith.constant 9.99999974E-6 : f32
    %22 = vector.broadcast %cst_12 : f32 to vector<128x1xf32>
    %23 = arith.addf %19, %22 : vector<128x1xf32>
    %24 = math.rsqrt %23 : vector<128x1xf32>
    %25 = vector.broadcast %24 : vector<128x1xf32> to vector<128x128xf32>
    %26 = arith.mulf %21, %25 : vector<128x128xf32>
    %27 = vector.broadcast %6 : vector<1x128xf32> to vector<128x128xf32>
    %28 = arith.mulf %26, %27 : vector<128x128xf32>
    %29 = vector.broadcast %8 : vector<1x128xf32> to vector<128x128xf32>
    %30 = arith.addf %28, %29 : vector<128x128xf32>
    %31 = arith.truncf %30 : vector<128x128xf32> to vector<128x128xbf16>
    %c0_13 = arith.constant 0 : index
    %c0_14 = arith.constant 0 : index
    %c0_15 = arith.constant 0 : index
    %32 = vector.load %arg6[%c0_13, %c0_14, %c0_15] : memref<1x128x256xbf16, #tpu.memory_space<vmem>>, vector<1x128x256xbf16>
    %33 = vector.shape_cast %32 : vector<1x128x256xbf16> to vector<128x256xbf16>
    %cst_16 = arith.constant dense<0.000000e+00> : vector<128x256xf32>
    %34 = tpu.matmul %31, %33, %cst_16 {dimension_numbers = #tpu.dot_dimension_numbers<[1], [0], [0], [1], [0, 0, 1, 1], [], []>} : vector<128x128xbf16>, vector<128x256xbf16>, vector<128x256xf32> -> vector<128x256xf32>
    %35 = tpu.iota {dimensions = array<i32: 0>} : vector<16x16xi32>
    %36 = tpu.iota {dimensions = array<i32: 1>} : vector<16x16xi32>
    %37 = arith.cmpi slt, %35, %36 : vector<16x16xi32>
    %cst_17 = arith.constant -1.000000e+30 : f32
    %cst_18 = arith.constant 0.000000e+00 : f32
    %38 = vector.broadcast %cst_17 : f32 to vector<16x16xf32>
    %39 = vector.broadcast %cst_18 : f32 to vector<16x16xf32>
    %40 = arith.select %37, %38, %39 : vector<16x16xi1>, vector<16x16xf32>
    %41 = vector.shape_cast %40 : vector<16x16xf32> to vector<1x16x16xf32>
    %42 = vector.extract_strided_slice %34 {offsets = [0, 0], sizes = [128, 32], strides = [1, 1]} : vector<128x256xf32> to vector<128x32xf32>
    %43 = vector.shape_cast %42 : vector<128x32xf32> to vector<8x16x32xf32>
    %44 = vector.extract_strided_slice %34 {offsets = [0, 64], sizes = [128, 32], strides = [1, 1]} : vector<128x256xf32> to vector<128x32xf32>
    %45 = vector.shape_cast %44 : vector<128x32xf32> to vector<8x16x32xf32>
    %46 = vector.extract_strided_slice %34 {offsets = [0, 128], sizes = [128, 64], strides = [1, 1]} : vector<128x256xf32> to vector<128x64xf32>
    %47 = vector.shape_cast %46 : vector<128x64xf32> to vector<8x16x64xf32>
    %48 = arith.truncf %43 : vector<8x16x32xf32> to vector<8x16x32xbf16>
    %49 = arith.truncf %45 : vector<8x16x32xf32> to vector<8x16x32xbf16>
    "tpu.trace_start"() <{level = 10 : i32, message = "btd,bsd->bts"}> : () -> ()
    %cst_19 = arith.constant dense<0.000000e+00> : vector<8x16x16xf32>
    %50 = tpu.matmul %48, %49, %cst_19 {dimension_numbers = #tpu.dot_dimension_numbers<[2], [2], [1], [1], [0, 0, 0, 1, 1, 1], [0], [0]>} : vector<8x16x32xbf16>, vector<8x16x32xbf16>, vector<8x16x16xf32> -> vector<8x16x16xf32>
    "tpu.trace_stop"() : () -> ()
    %51 = vector.broadcast %41 : vector<1x16x16xf32> to vector<8x16x16xf32>
    %52 = arith.addf %50, %51 : vector<8x16x16xf32>
    %cst_20 = arith.constant dense<0xFF800000> : vector<8x16xf32>
    %53 = vector.multi_reduction <maximumf>, %52, %cst_20 [2] : vector<8x16x16xf32> to vector<8x16xf32>
    %54 = vector.shape_cast %53 : vector<8x16xf32> to vector<8x16x1xf32>
    %55 = vector.broadcast %54 : vector<8x16x1xf32> to vector<8x16x16xf32>
    %56 = arith.subf %52, %55 : vector<8x16x16xf32>
    %57 = math.exp %56 : vector<8x16x16xf32>
    %cst_21 = arith.constant dense<0.000000e+00> : vector<8x16xf32>
    %58 = vector.multi_reduction <add>, %57, %cst_21 [2] : vector<8x16x16xf32> to vector<8x16xf32>
    %59 = vector.shape_cast %58 : vector<8x16xf32> to vector<8x16x1xf32>
    %60 = tpu.reciprocal %59 {approx = true} : vector<8x16x1xf32> -> vector<8x16x1xf32>
    %61 = vector.broadcast %60 : vector<8x16x1xf32> to vector<8x16x16xf32>
    %62 = arith.mulf %57, %61 : vector<8x16x16xf32>
    %63 = arith.truncf %62 : vector<8x16x16xf32> to vector<8x16x16xbf16>
    %64 = arith.truncf %47 : vector<8x16x64xf32> to vector<8x16x64xbf16>
    "tpu.trace_start"() <{level = 10 : i32, message = "bts,bsd->btd"}> : () -> ()
    %cst_22 = arith.constant dense<0.000000e+00> : vector<8x16x64xf32>
    %65 = tpu.matmul %63, %64, %cst_22 {dimension_numbers = #tpu.dot_dimension_numbers<[2], [1], [1], [2], [0, 0, 0, 1, 1, 2], [0], [0]>} : vector<8x16x16xbf16>, vector<8x16x64xbf16>, vector<8x16x64xf32> -> vector<8x16x64xf32>
    "tpu.trace_stop"() : () -> ()
    %66 = vector.shape_cast %65 : vector<8x16x64xf32> to vector<128x64xf32>
    %67 = vector.extract_strided_slice %34 {offsets = [0, 32], sizes = [128, 32], strides = [1, 1]} : vector<128x256xf32> to vector<128x32xf32>
    %68 = vector.shape_cast %67 : vector<128x32xf32> to vector<8x16x32xf32>
    %69 = vector.extract_strided_slice %34 {offsets = [0, 96], sizes = [128, 32], strides = [1, 1]} : vector<128x256xf32> to vector<128x32xf32>
    %70 = vector.shape_cast %69 : vector<128x32xf32> to vector<8x16x32xf32>
    %71 = vector.extract_strided_slice %34 {offsets = [0, 192], sizes = [128, 64], strides = [1, 1]} : vector<128x256xf32> to vector<128x64xf32>
    %72 = vector.shape_cast %71 : vector<128x64xf32> to vector<8x16x64xf32>
    %73 = arith.truncf %68 : vector<8x16x32xf32> to vector<8x16x32xbf16>
    %74 = arith.truncf %70 : vector<8x16x32xf32> to vector<8x16x32xbf16>
    "tpu.trace_start"() <{level = 10 : i32, message = "btd,bsd->bts"}> : () -> ()
    %cst_23 = arith.constant dense<0.000000e+00> : vector<8x16x16xf32>
    %75 = tpu.matmul %73, %74, %cst_23 {dimension_numbers = #tpu.dot_dimension_numbers<[2], [2], [1], [1], [0, 0, 0, 1, 1, 1], [0], [0]>} : vector<8x16x32xbf16>, vector<8x16x32xbf16>, vector<8x16x16xf32> -> vector<8x16x16xf32>
    "tpu.trace_stop"() : () -> ()
    %76 = vector.broadcast %41 : vector<1x16x16xf32> to vector<8x16x16xf32>
    %77 = arith.addf %75, %76 : vector<8x16x16xf32>
    %cst_24 = arith.constant dense<0xFF800000> : vector<8x16xf32>
    %78 = vector.multi_reduction <maximumf>, %77, %cst_24 [2] : vector<8x16x16xf32> to vector<8x16xf32>
    %79 = vector.shape_cast %78 : vector<8x16xf32> to vector<8x16x1xf32>
    %80 = vector.broadcast %79 : vector<8x16x1xf32> to vector<8x16x16xf32>
    %81 = arith.subf %77, %80 : vector<8x16x16xf32>
    %82 = math.exp %81 : vector<8x16x16xf32>
    %cst_25 = arith.constant dense<0.000000e+00> : vector<8x16xf32>
    %83 = vector.multi_reduction <add>, %82, %cst_25 [2] : vector<8x16x16xf32> to vector<8x16xf32>
    %84 = vector.shape_cast %83 : vector<8x16xf32> to vector<8x16x1xf32>
    %85 = tpu.reciprocal %84 {approx = true} : vector<8x16x1xf32> -> vector<8x16x1xf32>
    %86 = vector.broadcast %85 : vector<8x16x1xf32> to vector<8x16x16xf32>
    %87 = arith.mulf %82, %86 : vector<8x16x16xf32>
    %88 = arith.truncf %87 : vector<8x16x16xf32> to vector<8x16x16xbf16>
    %89 = arith.truncf %72 : vector<8x16x64xf32> to vector<8x16x64xbf16>
    "tpu.trace_start"() <{level = 10 : i32, message = "bts,bsd->btd"}> : () -> ()
    %cst_26 = arith.constant dense<0.000000e+00> : vector<8x16x64xf32>
    %90 = tpu.matmul %88, %89, %cst_26 {dimension_numbers = #tpu.dot_dimension_numbers<[2], [1], [1], [2], [0, 0, 0, 1, 1, 2], [0], [0]>} : vector<8x16x16xbf16>, vector<8x16x64xbf16>, vector<8x16x64xf32> -> vector<8x16x64xf32>
    "tpu.trace_stop"() : () -> ()
    %91 = vector.shape_cast %90 : vector<8x16x64xf32> to vector<128x64xf32>
    %92 = tpu.concatenate %66, %91 in 1 : vector<128x64xf32>, vector<128x64xf32> -> vector<128x128xf32>
    %93 = arith.truncf %92 : vector<128x128xf32> to vector<128x128xbf16>
    %c0_27 = arith.constant 0 : index
    %c0_28 = arith.constant 0 : index
    %c0_29 = arith.constant 0 : index
    %94 = vector.load %arg7[%c0_27, %c0_28, %c0_29] : memref<1x128x128xbf16, #tpu.memory_space<vmem>>, vector<1x128x128xbf16>
    %95 = vector.shape_cast %94 : vector<1x128x128xbf16> to vector<128x128xbf16>
    %cst_30 = arith.constant dense<0.000000e+00> : vector<128x128xf32>
    %96 = tpu.matmul %93, %95, %cst_30 {dimension_numbers = #tpu.dot_dimension_numbers<[1], [0], [0], [1], [0, 0, 1, 1], [], []>} : vector<128x128xbf16>, vector<128x128xbf16>, vector<128x128xf32> -> vector<128x128xf32>
    %97 = arith.addf %4, %96 : vector<128x128xf32>
    %c0_31 = arith.constant 0 : index
    %c0_32 = arith.constant 0 : index
    %c0_33 = arith.constant 0 : index
    %98 = vector.load %arg8[%c0_31, %c0_32, %c0_33] : memref<1x1x128xf32, #tpu.memory_space<vmem>>, vector<1x1x128xf32>
    %99 = vector.shape_cast %98 : vector<1x1x128xf32> to vector<1x128xf32>
    %c0_34 = arith.constant 0 : index
    %c0_35 = arith.constant 0 : index
    %c0_36 = arith.constant 0 : index
    %100 = vector.load %arg9[%c0_34, %c0_35, %c0_36] : memref<1x1x128xf32, #tpu.memory_space<vmem>>, vector<1x1x128xf32>
    %101 = vector.shape_cast %100 : vector<1x1x128xf32> to vector<1x128xf32>
    %cst_37 = arith.constant dense<0.000000e+00> : vector<128xf32>
    %102 = vector.multi_reduction <add>, %97, %cst_37 [1] : vector<128x128xf32> to vector<128xf32>
    %103 = vector.shape_cast %102 : vector<128xf32> to vector<128x1xf32>
    %cst_38 = arith.constant 1.280000e+02 : f32
    %104 = vector.broadcast %cst_38 : f32 to vector<128x1xf32>
    %105 = arith.divf %103, %104 : vector<128x1xf32>
    %106 = vector.broadcast %105 : vector<128x1xf32> to vector<128x128xf32>
    %107 = arith.subf %97, %106 : vector<128x128xf32>
    %108 = arith.mulf %107, %107 : vector<128x128xf32>
    %cst_39 = arith.constant dense<0.000000e+00> : vector<128xf32>
    %109 = vector.multi_reduction <add>, %108, %cst_39 [1] : vector<128x128xf32> to vector<128xf32>
    %110 = vector.shape_cast %109 : vector<128xf32> to vector<128x1xf32>
    %cst_40 = arith.constant 1.280000e+02 : f32
    %111 = vector.broadcast %cst_40 : f32 to vector<128x1xf32>
    %112 = arith.divf %110, %111 : vector<128x1xf32>
    %113 = vector.broadcast %105 : vector<128x1xf32> to vector<128x128xf32>
    %114 = arith.subf %97, %113 : vector<128x128xf32>
    %cst_41 = arith.constant 9.99999974E-6 : f32
    %115 = vector.broadcast %cst_41 : f32 to vector<128x1xf32>
    %116 = arith.addf %112, %115 : vector<128x1xf32>
    %117 = math.rsqrt %116 : vector<128x1xf32>
    %118 = vector.broadcast %117 : vector<128x1xf32> to vector<128x128xf32>
    %119 = arith.mulf %114, %118 : vector<128x128xf32>
    %120 = vector.broadcast %99 : vector<1x128xf32> to vector<128x128xf32>
    %121 = arith.mulf %119, %120 : vector<128x128xf32>
    %122 = vector.broadcast %101 : vector<1x128xf32> to vector<128x128xf32>
    %123 = arith.addf %121, %122 : vector<128x128xf32>
    %124 = arith.truncf %123 : vector<128x128xf32> to vector<128x128xbf16>
    %c0_42 = arith.constant 0 : index
    %c0_43 = arith.constant 0 : index
    %c0_44 = arith.constant 0 : index
    %125 = vector.load %arg10[%c0_42, %c0_43, %c0_44] : memref<1x128x256xbf16, #tpu.memory_space<vmem>>, vector<1x128x256xbf16>
    %126 = vector.shape_cast %125 : vector<1x128x256xbf16> to vector<128x256xbf16>
    %cst_45 = arith.constant dense<0.000000e+00> : vector<128x256xf32>
    %127 = tpu.matmul %124, %126, %cst_45 {dimension_numbers = #tpu.dot_dimension_numbers<[1], [0], [0], [1], [0, 0, 1, 1], [], []>} : vector<128x128xbf16>, vector<128x256xbf16>, vector<128x256xf32> -> vector<128x256xf32>
    %c0_46 = arith.constant 0 : index
    %c0_47 = arith.constant 0 : index
    %c0_48 = arith.constant 0 : index
    %128 = vector.load %arg11[%c0_46, %c0_47, %c0_48] : memref<1x1x256xf32, #tpu.memory_space<vmem>>, vector<1x1x256xf32>
    %129 = vector.shape_cast %128 : vector<1x1x256xf32> to vector<1x256xf32>
    %130 = vector.broadcast %129 : vector<1x256xf32> to vector<128x256xf32>
    %131 = arith.addf %127, %130 : vector<128x256xf32>
    %cst_49 = arith.constant 0.000000e+00 : f32
    %132 = vector.broadcast %cst_49 : f32 to vector<128x256xf32>
    %133 = arith.maximumf %131, %132 : vector<128x256xf32>
    %134 = arith.truncf %133 : vector<128x256xf32> to vector<128x256xbf16>
    %c0_50 = arith.constant 0 : index
    %c0_51 = arith.constant 0 : index
    %c0_52 = arith.constant 0 : index
    %135 = vector.load %arg12[%c0_50, %c0_51, %c0_52] : memref<1x256x128xbf16, #tpu.memory_space<vmem>>, vector<1x256x128xbf16>
    %136 = vector.shape_cast %135 : vector<1x256x128xbf16> to vector<256x128xbf16>
    %cst_53 = arith.constant dense<0.000000e+00> : vector<128x128xf32>
    %137 = tpu.matmul %134, %136, %cst_53 {dimension_numbers = #tpu.dot_dimension_numbers<[1], [0], [0], [1], [0, 0, 1, 1], [], []>} : vector<128x256xbf16>, vector<256x128xbf16>, vector<128x128xf32> -> vector<128x128xf32>
    %c0_54 = arith.constant 0 : index
    %c0_55 = arith.constant 0 : index
    %c0_56 = arith.constant 0 : index
    %138 = vector.load %arg13[%c0_54, %c0_55, %c0_56] : memref<1x1x128xf32, #tpu.memory_space<vmem>>, vector<1x1x128xf32>
    %139 = vector.shape_cast %138 : vector<1x1x128xf32> to vector<1x128xf32>
    %140 = vector.broadcast %139 : vector<1x128xf32> to vector<128x128xf32>
    %141 = arith.addf %137, %140 : vector<128x128xf32>
    %142 = arith.addf %97, %141 : vector<128x128xf32>
    %143 = vector.shape_cast %142 : vector<128x128xf32> to vector<8x16x128xf32>
    %c0_57 = arith.constant 0 : index
    %c0_58 = arith.constant 0 : index
    %c0_59 = arith.constant 0 : index
    %144 = vector.load %arg14[%c0_57, %c0_58, %c0_59] : memref<8x16x128xf32, #tpu.memory_space<vmem>>, vector<8x16x128xf32>
    tpu.vector_store %arg14[%c0_57, %c0_58, %c0_59], %143 {strides = array<i32>} : memref<8x16x128xf32, #tpu.memory_space<vmem>>, vector<8x16x128xf32>,
    return
  }
  func.func @transform_0(%arg0: i32, %arg1: i32) -> (i32, i32, i32) {
    %c0_i32 = arith.constant 0 : i32
    %c0_i32_0 = arith.constant 0 : i32
    %c0_i32_1 = arith.constant 0 : i32
    return %arg0, %c0_i32, %c0_i32_0 : i32, i32, i32
  }
  func.func @transform_1(%arg0: i32, %arg1: i32) -> (i32, i32) {
    %c0_i32 = arith.constant 0 : i32
    %c0_i32_0 = arith.constant 0 : i32
    %c0_i32_1 = arith.constant 0 : i32
    return %c0_i32, %c0_i32_0 : i32, i32
  }
  func.func @transform_2(%arg0: i32, %arg1: i32) -> (i32, i32, i32) {
    %c0_i32 = arith.constant 0 : i32
    %c0_i32_0 = arith.constant 0 : i32
    %c0_i32_1 = arith.constant 0 : i32
    return %arg1, %c0_i32, %c0_i32_0 : i32, i32, i32
  }
  func.func @transform_3(%arg0: i32, %arg1: i32) -> (i32, i32, i32) {
    %c0_i32 = arith.constant 0 : i32
    %c0_i32_0 = arith.constant 0 : i32
    %c0_i32_1 = arith.constant 0 : i32
    return %arg1, %c0_i32, %c0_i32_0 : i32, i32, i32
  }
  func.func @transform_4(%arg0: i32, %arg1: i32) -> (i32, i32, i32) {
    %c0_i32 = arith.constant 0 : i32
    %c0_i32_0 = arith.constant 0 : i32
    %c0_i32_1 = arith.constant 0 : i32
    return %arg1, %c0_i32, %c0_i32_0 : i32, i32, i32
  }
  func.func @transform_5(%arg0: i32, %arg1: i32) -> (i32, i32, i32) {
    %c0_i32 = arith.constant 0 : i32
    %c0_i32_0 = arith.constant 0 : i32
    %c0_i32_1 = arith.constant 0 : i32
    return %arg1, %c0_i32, %c0_i32_0 : i32, i32, i32
  }
  func.func @transform_6(%arg0: i32, %arg1: i32) -> (i32, i32, i32) {
    %c0_i32 = arith.constant 0 : i32
    %c0_i32_0 = arith.constant 0 : i32
    %c0_i32_1 = arith.constant 0 : i32
    return %arg1, %c0_i32, %c0_i32_0 : i32, i32, i32
  }
  func.func @transform_7(%arg0: i32, %arg1: i32) -> (i32, i32, i32) {
    %c0_i32 = arith.constant 0 : i32
    %c0_i32_0 = arith.constant 0 : i32
    %c0_i32_1 = arith.constant 0 : i32
    return %arg1, %c0_i32, %c0_i32_0 : i32, i32, i32
  }
  func.func @transform_8(%arg0: i32, %arg1: i32) -> (i32, i32, i32) {
    %c0_i32 = arith.constant 0 : i32
    %c0_i32_0 = arith.constant 0 : i32
    %c0_i32_1 = arith.constant 0 : i32
    return %arg1, %c0_i32, %c0_i32_0 : i32, i32, i32
  }
  func.func @transform_9(%arg0: i32, %arg1: i32) -> (i32, i32, i32) {
    %c0_i32 = arith.constant 0 : i32
    %c0_i32_0 = arith.constant 0 : i32
    %c0_i32_1 = arith.constant 0 : i32
    return %arg1, %c0_i32, %c0_i32_0 : i32, i32, i32
  }
  func.func @transform_10(%arg0: i32, %arg1: i32) -> (i32, i32, i32) {
    %c0_i32 = arith.constant 0 : i32
    %c0_i32_0 = arith.constant 0 : i32
    %c0_i32_1 = arith.constant 0 : i32
    return %arg1, %c0_i32, %c0_i32_0 : i32, i32, i32
  }
  func.func @transform_11(%arg0: i32, %arg1: i32) -> (i32, i32, i32) {
    %c0_i32 = arith.constant 0 : i32
    %c0_i32_0 = arith.constant 0 : i32
    %c0_i32_1 = arith.constant 0 : i32
    return %arg1, %c0_i32, %c0_i32_0 : i32, i32, i32
  }
  func.func @transform_12(%arg0: i32, %arg1: i32) -> (i32, i32, i32) {
    %c0_i32 = arith.constant 0 : i32
    %c0_i32_0 = arith.constant 0 : i32
    %c0_i32_1 = arith.constant 0 : i32
    return %arg0, %c0_i32, %c0_i32_0 : i32, i32, i32
  }
}

</mosaic_0001>

<bundles_post_ra>
// kernel: tpu_custom_call.1
= control target key start
LH: loop header
LB: loop body
LE: loop exit
PB: predicated region body
PF: predicated region fallthrough
CT: control target
= control target key end

     0   :  { %s7548_s0 = inlined_call_operand.hbm [shape: f32[16,16,128], index: 0, kind: input, shape index: {}]   ;;  %s7549_s1 = inlined_call_operand.hbm [shape: f32[16,128], index: 1, kind: input, shape index: {}]   ;;  %s7550_s2 = inlined_call_operand.vmem [shape: f32[2,1,128], index: 2, kind: input, shape index: {}]   ;;  %s7551_s3 = inlined_call_operand.vmem [shape: f32[2,1,128], index: 3, kind: input, shape index: {}]   ;;  %s7552_s4 = inlined_call_operand.hbm [shape: bf16[2,128,256], index: 4, kind: input, shape index: {}]   ;;  %s7553_s5 = inlined_call_operand.hbm [shape: bf16[2,128,128], index: 5, kind: input, shape index: {}]   ;;  %s7554_s6 = inlined_call_operand.vmem [shape: f32[2,1,128], index: 6, kind: input, shape index: {}]   ;;  %s7555_s7 = inlined_call_operand.vmem [shape: f32[2,1,128], index: 7, kind: input, shape index: {}]   ;;  %s7556_s8 = inlined_call_operand.hbm [shape: bf16[2,128,256], index: 8, kind: input, shape index: {}]   ;;  %s7557_s9 = inlined_call_operand.vmem [shape: f32[2,1,256], index: 9, kind: input, shape index: {}]   ;;  %s7558_s10 = inlined_call_operand.hbm [shape: bf16[2,256,128], index: 10, kind: input, shape index: {}]   ;;  %s7559_s11 = inlined_call_operand.vmem [shape: f32[2,1,128], index: 11, kind: input, shape index: {}]   ;;  %s7560_s12 = inlined_call_operand.hbm [shape: f32[16,16,128], index: 12, kind: output, shape index: {}]  }
   0x1   :  { %7589 = sst [smem:[#allocation29_spill]] %s7548_s0 }
   0x2   :  { %7590 = sst [smem:[#allocation30_spill]] %s7549_s1 }
   0x3   :  { %7591 = sst [smem:[#allocation31_spill]] %s7551_s3 }
   0x4   :  { %7592 = sst [smem:[#allocation32_spill]] %s7552_s4 }
   0x5   :  { %7593 = sst [smem:[#allocation33_spill]] %s7553_s5 }
   0x6   :  { %7594 = sst [smem:[#allocation34_spill]] %s7554_s6 }
   0x7   :  { %7595 = sst [smem:[#allocation35_spill]] %s7555_s7 }
   0x8   :  { %7596 = sst [smem:[#allocation36_spill]] %s7556_s8 }
   0x9   :  { %7597 = sst [smem:[#allocation37_spill]] %s7557_s9 }
   0xa   :  { %7598 = sst [smem:[#allocation38_spill]] %s7558_s10 }
   0xb   :  { %7599 = sst [smem:[#allocation39_spill]] %s7559_s11 }
   0xc   :  { %7600 = sst [smem:[#allocation40_spill]] %s7560_s12 }
   0xd   :  { %17 = vsyncpa [#allocation3], 0 }
   0xe   :  { %19 = vsyncpa [#allocation3 + $0x1], 0 }
   0xf   :  { %20 = vsyncpa [#allocation6], 0 }
  0x10   :  { %21 = vsyncpa [#allocation4], 0 }
  0x11   :  { %23 = vsyncpa [#allocation4 + $0x1], 0  ;;  %s5787_s21 = smov 0   ;;  %s5789_s22 = smov 0  }
  0x12   :  { %s5791_s23 = smov 0   ;;  %s5793_s24 = smov 0  }
  0x13   :  { %s5795_s25 = smov 0   ;;  %s5797_s26 = smov 0  }
  0x14   :  { %s5799_s27 = smov 0   ;;  %s5801_s28 = smov 0  }
  0x15   :  { %s5803_s29 = smov 0   ;;  %s5805_s30 = smov 0  }
  0x16   :  { %s5807_s13 = smov 0  }
  0x17 LB: > { %7601 = sst [smem:[#allocation16_spill]] %s5665_s22  ;;  %s38_s14 = sadd.s32 1, %s5693_s29  ;;  %s5701_s13 = sphi %s5807_s13, %s29_s13   ;;  %s5697_s30 = sphi %s5805_s30, %s7670_s30   ;;  %s5693_s29 = sphi %s5803_s29, %s7669_s29   ;;  %s5689_s28 = sphi %s5801_s28, %s7668_s28   ;;  %s5685_s27 = sphi %s5799_s27, %s7667_s27   ;;  %s5681_s26 = sphi %s5797_s26, %s7666_s26   ;;  %s5677_s25 = sphi %s5795_s25, %s7672_s25   ;;  %s5673_s24 = sphi %s5793_s24, %s7671_s24   ;;  %s5669_s23 = sphi %s5791_s23, %s7664_s23   ;;  %s5665_s22 = sphi %s5789_s22, %s7663_s22   ;;  %s5661_s21 = sphi %s5787_s21, %s7662_s21  }
  0x18   : > { %7602 = sst [smem:[#allocation17_spill]] %s5669_s23  ;;  %s41_s15 = sadd.s32 1, %s5697_s30 }
  0x19   : > { %7603 = sst [smem:[#allocation18_spill]] %s5673_s24  ;;  %p39_p0 = scmp.ge.s32.totalorder %s38_s14, 2 }
  0x1a   : > { %7604 = sst [smem:[#allocation19_spill]] %s5681_s26  ;;  %s48_s16 = sadd.s32 1, %s5681_s26 }
  0x1b   : > { %7605 = sst [smem:[#allocation20_spill]] %s5689_s28  ;;  %p7565_p1 = scmp.ne.s32.totalorder %s5681_s26, %s5677_s25 }
  0x1c   : > { %7606 = sst [smem:[#allocation21_spill]] %s5693_s29  ;;  %p7567_p2 = scmp.eq.s32.totalorder %s5701_s13, 0 }
  0x1d   : > { %7607 = sst [smem:[#allocation22_spill]] %s5697_s30  ;;  %s7674_s14 = smov (%p39_p0, %s38_s14), 0 }
  0x1e   : > { %7608 = sst [smem:[#allocation23_spill]] %s5701_s13  ;;  %s7676_s15 = smov (!%p39_p0, %s41_s15), %s5697_s30 }
  0x1f   : > { %7609 = sst [smem:[#allocation24_spill]] %s7674_s14  ;;  %p5856_p3 = por %p7567_p2, %p7565_p1 }
  0x20   : > { %s144_s18 = ssub.s32 %s5693_s29, %s7674_s14  ;;  %p43_p4 = scmp.ge.s32.totalorder %s7676_s15, 2 }
  0x21   : > { %p5862_p5 = scmp.eq.s32.totalorder %s144_s18, 0  ;;  %p7566_p6 = scmp.lt.s32.totalorder %s5701_s13, 4 }
  0x22   : > { %s7678_s15 = smov (%p43_p4, %s7676_s15), 0  ;;  %s405_s12 = sand.u32 1, %s5701_s13  }
  0x23   : > { %7612 = sst [smem:[#allocation25_spill]] %s7678_s15  ;;  %s45_s20 = ssub.s32 %s5697_s30, %s7678_s15 }
  0x24   : > { %p46_p7 = scmp.eq.s32.totalorder %s45_s20, 0  ;;  %s407_s28 = sand.u32 1, %s5681_s26  }
  0x25   : > { %s4553_s9 = sshll.u32 %s5697_s30, 11  ;;  %s4427_s7 = sshll.u32 %s407_s28, 7 }
  0x26   : > { %s5875_s11 = scalar_select %p46_p7, %s5681_s26, %s48_s16  }
  0x27   : > { %s7614_s0 = sld [smem:[#allocation29_spill]]  ;;  %p5886_p8 = pnand %p7566_p6, %p5856_p3 }
  0x28   : > { %7613 = sst [smem:[#allocation26_spill]] %s5875_s11  ;;  %s409_s16 = scalar_lea.vmem [#allocation2], %s4427_s7 }
  0x29   : > { %s417_s20 = sshll.u32 %s409_s16, 4  ;;  %s5892_s28 = scalar_lea.sflag [#allocation3], %s405_s12  ;;  %s5890_s20 = int_to_ptr.vmem [resolvable:$true] %s417_s20 }
  0x2a   : > { %p5395_p10 = pneg %p5886_p8 }
  0x2d   : > { %s5880_s14 = scalar_lea.hbm %s7614_s0, %s4553_s9  ;;  %s5398_s17 = scalar_lea.hbm %s7614_s0, 4096 }
  0x2e   : > { %s5393_s3 = scalar_lea.hbm %s5880_s14, 2048  ;;  %p5399_p13 = scmp.lt.u32.totalorder %s5880_s14, %s7614_s0 }
  0x2f   : > { %p5394_p9 = scmp.ne.s32.totalorder %s5880_s14, %s5393_s3  ;;  %p5400_p0 = scmp.lt.u32.totalorder %s5398_s17, %s5393_s3 }
  0x30   : > { %p5402_p4 = scmp.lt.u32.totalorder %s5393_s3, %s5880_s14 }
  0x31   : > { %p5396_p11 = pnand %p5395_p10, %p5394_p9  ;;  %p5401_p3 = por %p5400_p0, %p5399_p13 }
  0x33   : > { %p5397_p12 = pneg %p5396_p11  ;;  %p5403_p7 = por %p5402_p4, %p5401_p3 }
  0x35   : > { %p5404_p1 = pnand %p5403_p7, %p5397_p12 }
  0x37   : > { %5407 = shalt.err (!%p5404_p1)
}
  0x38   : > { %s5408_s7 = scalar_lea.vmem %s5890_s20, 2048  ;;  %s5703_s12 = smov [#allocation2]  }
  0x39   : > { %p5409_p9 = scmp.ne.s32.totalorder %s5890_s20, %s5408_s7  ;;  %s5413_s16 = sshll.u32 %s5703_s12, 4  ;;  %s5414_s16 = int_to_ptr.vmem [resolvable:$false] %s5413_s16 }
  0x3a   : > { %s5415_s30 = scalar_lea.vmem %s5414_s16, 4096  ;;  %p5416_p2 = scmp.lt.s32.totalorder %s5890_s20, %s5414_s16 }
  0x3b   : > { %p5411_p11 = pnand %p5409_p9, %p5395_p10  ;;  %p5417_p13 = scmp.lt.s32.totalorder %s5415_s30, %s5408_s7 }
  0x3d   : > { %p5412_p6 = pneg %p5411_p11  ;;  %p5418_p0 = por %p5417_p13, %p5416_p2 }
  0x3f   : > { %p5419_p3 = pnand %p5418_p0, %p5412_p6 }
  0x41   : > { %5422 = shalt.err (!%p5419_p3)
}
  0x42   : > { %s7568_s15 = smov 128   ;;  %s7570_s3 = smov 8  }
  0x43   : > { %4951 = dma.hbm_to_vmem [thread:$0]  (!%p5886_p8), %s5880_s14, 2048, %s5890_s20, %s5892_s28, %s7568_s15, %s7568_s15, %s7570_s3  }
  0x44   : > { %s5924_s6 = sshll.u32 %s5693_s29, 11  ;;  %s147_s9 = sadd.s32 1, %s5669_s23 }
  0x45   : > { %p154_p1 = scmp.ne.s32.totalorder %s5669_s23, %s5665_s22  ;;  %p7617_p2 = scmp.eq.s32.totalorder %s5701_s13, 0 }
  0x46   : > { %s5932_s17 = scalar_select %p5862_p5, %s5669_s23, %s147_s9  }
  0x47   : > { %p156_p6 = por %p154_p1, %p7617_p2  ;;  %s441_s7 = sand.u32 1, %s5669_s23  }
  0x48   : > { %7616 = sst [smem:[#allocation27_spill]] %s5932_s17  ;;  %s5937_s12 = sshll.u32 %s441_s7, 7 }
  0x49   : > { %s7618_s4 = sld [smem:[#allocation32_spill]]  ;;  %p7619_p8 = scmp.lt.s32.totalorder %s5701_s13, 4 }
  0x4a   : > { %s443_s19 = scalar_lea.vmem [#allocation7], %s5937_s12  ;;  %s5952_s9 = sshll.u32 %s441_s7, 6 }
  0x4b   : > { %p5947_p10 = pnand %p7619_p8, %p156_p6  ;;  %s450_s20 = sshll.u32 %s443_s19, 4  ;;  %s5954_s20 = int_to_ptr.vmem [resolvable:$true] %s450_s20 }
  0x4d   : > { %s7620_s14 = scalar_select %p5947_p10, 1, 0 }
  0x4e   : > { %p5960_p12 = pneg %p5947_p10 }
  0x4f   : > { %s5943_s18 = scalar_lea.hbm %s7618_s4, %s5924_s6  ;;  %s5428_s0 = scalar_lea.hbm %s7618_s4, 4096 }
  0x50   : > { %s5423_s16 = scalar_lea.hbm %s5943_s18, 2048  ;;  %p5429_p9 = scmp.lt.u32.totalorder %s5943_s18, %s7618_s4 }
  0x51   : > { %p5424_p5 = scmp.ne.s32.totalorder %s5943_s18, %s5423_s16  ;;  %p5430_p11 = scmp.lt.u32.totalorder %s5428_s0, %s5423_s16 }
  0x52   : > { %p5432_p0 = scmp.lt.u32.totalorder %s5423_s16, %s5943_s18 }
  0x53   : > { %p5426_p4 = pnand %p5960_p12, %p5424_p5  ;;  %p5431_p13 = por %p5430_p11, %p5429_p9 }
  0x55   : > { %p5427_p7 = pneg %p5426_p4  ;;  %p5433_p3 = por %p5432_p0, %p5431_p13 }
  0x57   : > { %p5434_p1 = pnand %p5433_p3, %p5427_p7 }
  0x59   : > { %5437 = shalt.err (!%p5434_p1)
}
  0x5a   : > { %s5438_s11 = scalar_lea.vmem %s5954_s20, 2048  ;;  %s5706_s15 = smov [#allocation7]  }
  0x5b   : > { %p5439_p2 = scmp.ne.s32.totalorder %s5954_s20, %s5438_s11  ;;  %s5443_s3 = sshll.u32 %s5706_s15, 4  ;;  %s5444_s3 = int_to_ptr.vmem [resolvable:$false] %s5443_s3 }
  0x5c   : > { %s5445_s19 = scalar_lea.vmem %s5444_s3, 4096  ;;  %p5446_p5 = scmp.lt.s32.totalorder %s5954_s20, %s5444_s3 }
  0x5d   : > { %p5441_p6 = pnand %p5439_p2, %p5960_p12  ;;  %p5447_p4 = scmp.lt.s32.totalorder %s5445_s19, %s5438_s11 }
  0x5f   : > { %p5442_p8 = pneg %p5441_p6  ;;  %p5448_p9 = por %p5447_p4, %p5446_p5 }
  0x61   : > { %p5449_p11 = pnand %p5448_p9, %p5442_p8 }
  0x63   : > { %5452 = shalt.err (!%p5449_p11)
}
  0x64   : > { %s7622_s0 = smov 8   ;;  %s7623_s16 = smov 128  }
  0x65   : > { %4954 = dma.hbm_to_vmem [thread:$0]  (!%p5947_p10), %s5943_s18, 2048, %s5954_s20, %s5892_s28, %s7623_s16, %s7623_s16, %s7622_s0  }
  0x66   : > { %s4555_s7 = sshll.u32 %s5693_s29, 10  ;;  %s7624_s5 = sld [smem:[#allocation33_spill]] }
  0x67   : > { %s464_s3 = scalar_lea.vmem [#allocation8], %s5952_s9 }
  0x68   : > { %s471_s19 = sshll.u32 %s464_s3, 4  ;;  %s5994_s19 = int_to_ptr.vmem [resolvable:$true] %s471_s19 }
  0x6c   : > { %s5991_s11 = scalar_lea.hbm %s7624_s5, %s4555_s7  ;;  %s5458_s29 = scalar_lea.hbm %s7624_s5, 2048 }
  0x6d   : > { %s5453_s17 = scalar_lea.hbm %s5991_s11, 1024  ;;  %p5459_p3 = scmp.lt.u32.totalorder %s5991_s11, %s7624_s5 }
  0x6e   : > { %p5454_p7 = scmp.ne.s32.totalorder %s5991_s11, %s5453_s17  ;;  %p5460_p1 = scmp.lt.u32.totalorder %s5458_s29, %s5453_s17 }
  0x6f   : > { %p5462_p6 = scmp.lt.u32.totalorder %s5453_s17, %s5991_s11 }
  0x70   : > { %p5456_p13 = pnand %p5454_p7, %p5960_p12  ;;  %p5461_p2 = por %p5460_p1, %p5459_p3 }
  0x72   : > { %p5457_p0 = pneg %p5456_p13  ;;  %p5463_p8 = por %p5462_p6, %p5461_p2 }
  0x74   : > { %p5464_p5 = pnand %p5463_p8, %p5457_p0 }
  0x76   : > { %5467 = shalt.err (!%p5464_p5)
}
  0x77   : > { %s5468_s9 = scalar_lea.vmem %s5994_s19, 1024  ;;  %s5707_s15 = smov [#allocation8]  }
  0x78   : > { %p5469_p4 = scmp.ne.s32.totalorder %s5994_s19, %s5468_s9  ;;  %s5473_s3 = sshll.u32 %s5707_s15, 4  ;;  %s5474_s3 = int_to_ptr.vmem [resolvable:$false] %s5473_s3 }
  0x79   : > { %s5475_s18 = scalar_lea.vmem %s5474_s3, 2048  ;;  %p5476_p7 = scmp.lt.s32.totalorder %s5994_s19, %s5474_s3 }
  0x7a   : > { %p5471_p9 = pnand %p5469_p4, %p5960_p12  ;;  %p5477_p13 = scmp.lt.s32.totalorder %s5475_s18, %s5468_s9 }
  0x7c   : > { %p5472_p11 = pneg %p5471_p9  ;;  %p5478_p3 = por %p5477_p13, %p5476_p7 }
  0x7e   : > { %p5479_p1 = pnand %p5478_p3, %p5472_p11 }
  0x80   : > { %5482 = shalt.err (!%p5479_p1)
}
  0x81   : > { %s7574_s29 = smov 64   ;;  %s7575_s17 = smov 4  }
  0x82   : > { %4957 = dma.hbm_to_vmem [thread:$0]  (!%p5947_p10), %s5991_s11, 1024, %s5994_s19, %s5892_s28, %s7574_s29, %s7574_s29, %s7575_s17  }
  0x83   : > { %s7625_s8 = sld [smem:[#allocation36_spill]]  ;;  %s497_s9 = scalar_lea.vmem [#allocation9], %s5937_s12 }
  0x84   : > { %s504_s15 = sshll.u32 %s497_s9, 4  ;;  %s6028_s15 = int_to_ptr.vmem [resolvable:$true] %s504_s15 }
  0x89   : > { %s6025_s7 = scalar_lea.hbm %s7625_s8, %s5924_s6  ;;  %s5488_s19 = scalar_lea.hbm %s7625_s8, 4096 }
  0x8a   : > { %s5483_s3 = scalar_lea.hbm %s6025_s7, 2048  ;;  %p5489_p8 = scmp.lt.u32.totalorder %s6025_s7, %s7625_s8 }
  0x8b   : > { %p5484_p0 = scmp.ne.s32.totalorder %s6025_s7, %s5483_s3  ;;  %p5490_p5 = scmp.lt.u32.totalorder %s5488_s19, %s5483_s3 }
  0x8c   : > { %p5492_p9 = scmp.lt.u32.totalorder %s5483_s3, %s6025_s7 }
  0x8d   : > { %p5486_p2 = pnand %p5484_p0, %p5960_p12  ;;  %p5491_p4 = por %p5490_p5, %p5489_p8 }
  0x8f   : > { %p5487_p6 = pneg %p5486_p2  ;;  %p5493_p11 = por %p5492_p9, %p5491_p4 }
  0x91   : > { %p5494_p7 = pnand %p5493_p11, %p5487_p6 }
  0x93   : > { %5497 = shalt.err (!%p5494_p7)
}
  0x94   : > { %s5498_s9 = scalar_lea.vmem %s6028_s15, 2048  ;;  %s5710_s18 = smov [#allocation9]  }
  0x95   : > { %p5499_p13 = scmp.ne.s32.totalorder %s6028_s15, %s5498_s9  ;;  %s5503_s11 = sshll.u32 %s5710_s18, 4  ;;  %s5504_s11 = int_to_ptr.vmem [resolvable:$false] %s5503_s11 }
  0x96   : > { %s5505_s20 = scalar_lea.vmem %s5504_s11, 4096  ;;  %p5506_p0 = scmp.lt.s32.totalorder %s6028_s15, %s5504_s11 }
  0x97   : > { %p5501_p3 = pnand %p5499_p13, %p5960_p12  ;;  %p5507_p2 = scmp.lt.s32.totalorder %s5505_s20, %s5498_s9 }
  0x99   : > { %p5502_p1 = pneg %p5501_p3  ;;  %p5508_p8 = por %p5507_p2, %p5506_p0 }
  0x9b   : > { %p5509_p5 = pnand %p5508_p8, %p5502_p1 }
  0x9d   : > { %5512 = shalt.err (!%p5509_p5)
}
  0x9e   : > { %4960 = dma.hbm_to_vmem [thread:$0]  (!%p5947_p10), %s6025_s7, 2048, %s6028_s15, %s5892_s28, %s7623_s16, %s7623_s16, %s7622_s0  }
  0x9f   : > { %s6056_s3 = sadd.s32 4294967295, %s5701_s13   ;;  %s4423_s19 = sadd.s32 4294967294, %s5701_s13  }
  0xa0   : > { %p61_p6 = scmp.ne.s32.totalorder %s5677_s25, %s5673_s24  ;;  %p7578_p4 = scmp.eq.s32.totalorder %s6056_s3, 0 }
  0xa1   : > { %p160_p9 = scmp.ne.s32.totalorder %s5665_s22, %s5661_s21  ;;  %p366_p11 = scmp.eq.s32.totalorder %s6056_s3, 3 }
  0xa2   : > { %p372_p7 = scmp.eq.s32.totalorder %s4423_s19, 3  ;;  %p6067_p13 = por %p7578_p4, %p61_p6 }
  0xa3   : > { %p6073_p3 = por %p160_p9, %p7578_p4  ;;  %p7628_p1 = scmp.ne.s32.totalorder %s5681_s26, %s5677_s25 }
  0xa4   : > { %s7626_s4 = scalar_select %p6067_p13, 1, 0 }
  0xa5   : > { %s7627_s7 = scalar_select %p6073_p3, 1, 0 }
  0xa6   : > { %p6080_p0 = por %p366_p11, %p7628_p1  ;;  %p6084_p2 = por %p372_p7, %p61_p6 }
  0xa7   : > { %p4424_p8 = scmp.ge.s32.totalorder %s5701_s13, 1  ;;  %p379_p5 = scmp.lt.s32.totalorder %s5701_s13, 5 }
  0xa8   : > { %s7629_s15 = scalar_select %p6080_p0, 1, 0 }
  0xa9   : > { %s7630_s21 = scalar_select %p6084_p2, 1, 0 }
  0xaa   : > { %p6090_p10 = pnand %p4424_p8, %p379_p5  ;;  %s5711_s18 = smov [#allocation5]  }
  0xab   : > { %7631 = sst [smem:[#allocation28_spill]] %s7630_s21  ;;  %s391_s11 = sshll.u32 %s5711_s18, 4  ;;  %s6102_s11 = int_to_ptr.vmem [resolvable:$true] %s391_s11 }
  0xac   : > { %s7632_s9 = scalar_select %p6090_p10, 1, 0 }
  0xad   : > { %p4944_p9 = pneg %p6090_p10  ;;  %s7633_s10 = sld [smem:[#allocation38_spill]] }
  0xae   : > { %s525_s17 = scalar_lea.vmem [#allocation10], %s5937_s12 }
  0xaf   : > { %s532_s5 = sshll.u32 %s525_s17, 4  ;;  %p6107_p6 = pnand %p4944_p9, %p7578_p4  ;;  %s6111_s5 = int_to_ptr.vmem [resolvable:$true] %s532_s5 }
  0xb3   : > { %s6100_s29 = scalar_lea.hbm %s7633_s10, %s5924_s6  ;;  %s5518_s19 = scalar_lea.hbm %s7633_s10, 4096 }
  0xb4   : > { %s5513_s18 = scalar_lea.hbm %s6100_s29, 2048  ;;  %p5519_p8 = scmp.lt.u32.totalorder %s6100_s29, %s7633_s10 }
  0xb5   : > { %p5514_p11 = scmp.ne.s32.totalorder %s6100_s29, %s5513_s18  ;;  %p5520_p5 = scmp.lt.u32.totalorder %s5518_s19, %s5513_s18 }
  0xb6   : > { %p5522_p4 = scmp.lt.u32.totalorder %s5513_s18, %s6100_s29 }
  0xb7   : > { %p5516_p7 = pnand %p5514_p11, %p5960_p12  ;;  %p5521_p9 = por %p5520_p5, %p5519_p8 }
  0xb9   : > { %p5517_p1 = pneg %p5516_p7  ;;  %p5523_p2 = por %p5522_p4, %p5521_p9 }
  0xbb   : > { %p5524_p0 = pnand %p5523_p2, %p5517_p1 }
  0xbd   : > { %5527 = shalt.err (!%p5524_p0)
}
  0xbe   : > { %s5528_s12 = scalar_lea.vmem %s6111_s5, 2048  ;;  %s5712_s17 = smov [#allocation10]  }
  0xbf   : > { %p5529_p11 = scmp.ne.s32.totalorder %s6111_s5, %s5528_s12  ;;  %s5533_s6 = sshll.u32 %s5712_s17, 4  ;;  %s5534_s6 = int_to_ptr.vmem [resolvable:$false] %s5533_s6 }
  0xc0   : > { %s5535_s23 = scalar_lea.vmem %s5534_s6, 4096  ;;  %p5536_p13 = scmp.lt.s32.totalorder %s6111_s5, %s5534_s6 }
  0xc1   : > { %p5531_p7 = pnand %p5529_p11, %p5960_p12  ;;  %p5537_p10 = scmp.lt.s32.totalorder %s5535_s23, %s5528_s12 }
  0xc3   : > { %p5532_p3 = pneg %p5531_p7  ;;  %p5538_p8 = por %p5537_p10, %p5536_p13 }
  0xc5   : > { %p5539_p5 = pnand %p5538_p8, %p5532_p3 }
  0xc7   : > { %5542 = shalt.err (!%p5539_p5)
}
  0xc8   : > { %p7635_p4 = scmp.ne.s32.totalorder %s7620_s14, 0  ;;  %s7636_s26 = smov 4  }
  0xc9   : > { %s7637_s18 = smov 64   ;;  %s7638_s1 = sld [smem:[#allocation30_spill]] }
  0xca   : > { %4963 = dma.hbm_to_vmem [thread:$0]  (!%p7635_p4), %s6100_s29, 2048, %s6111_s5, %s5892_s28, %s7637_s18, %s7637_s18, %s7636_s26  }
  0xcb   : > { %p5545_p12 = pneg %p6107_p6 }
  0xcf   : > { %s5543_s19 = scalar_lea.hbm %s7638_s1, 256 }
  0xd0   : > { %p5544_p10 = scmp.ne.s32.totalorder %s7638_s1, %s5543_s19  ;;  %p5550_p0 = scmp.lt.u32.totalorder %s5543_s19, %s7638_s1 }
  0xd2   : > { %p5546_p13 = pnand %p5545_p12, %p5544_p10 }
  0xd4   : > { %p5547_p3 = pneg %p5546_p13 }
  0xd6   : > { %p5552_p2 = pnand %p5550_p0, %p5547_p3 }
  0xd8   : > { %5555 = shalt.err (!%p5552_p2)
}
  0xd9   : > { %s5556_s5 = scalar_lea.vmem %s6102_s11, 256  ;;  %p5564_p7 = scmp.lt.s32.totalorder %s6102_s11, %s6102_s11 }
  0xda   : > { %p5557_p1 = scmp.ne.s32.totalorder %s6102_s11, %s5556_s5  ;;  %p5565_p8 = scmp.lt.s32.totalorder %s5556_s5, %s5556_s5 }
  0xdc   : > { %p5559_p9 = pnand %p5557_p1, %p5545_p12  ;;  %p5566_p5 = por %p5565_p8, %p5564_p7 }
  0xde   : > { %p5560_p11 = pneg %p5559_p9 }
  0xe0   : > { %p5567_p4 = pnand %p5566_p5, %p5560_p11 }
  0xe2   : > { %5570 = shalt.err (!%p5567_p4)
}
  0xe3   : > { %4947 = dma.hbm_to_vmem [thread:$0]  (!%p6107_p6), %s7638_s1, 256, %s6102_s11, [#allocation6], %s7623_s16, %s7623_s16, %s7622_s0  }
  0xe4   : > { %p7639_p10 = scmp.ne.s32.totalorder %s7632_s9, 0 }
  0xe5   : > { %s552_s23 = sand.u32 (!%p7639_p10), 1, %s6056_s3   ;;  %s7583_s26 = sand.u32 (!%p7639_p10), 1, %s5677_s25  }
  0xe6   : > { %550 = sbr.rel (%p7639_p10) target bundleno = 3561 (0xde9), region = 68  ;;  %s4444_s18 = sshll.u32 (!%p7639_p10), %s7583_s26, 7 }
  0xe7   : > { %s553_s8 = scalar_lea.sflag (!%p7639_p10), [#allocation3], %s552_s23  ;;  %s6168_s30 = scalar_lea.vmem (!%p7639_p10), [#allocation2], %s4444_s18 }
  0xe8   : > { %p7640_p12 = scmp.ne.s32.totalorder (!%p7639_p10), %s7626_s4, 0 }
  0xed   : > { %5644 = dma.done.wait (%p7640_p12), %s553_s8, 2048  }
  0xee   : > { %5646 = vsyncadd (%p7640_p12), %s553_s8, 4294965248  ;;  %p7641_p6 = scmp.eq.s32.totalorder %s6056_s3, 0 }
  0xf0   : > { %5648 = dma.done.wait (%p7641_p6), [#allocation6], 256   ;;  %p7642_p13 = pmov %p7641_p6 }
  0xf1   : > { %s567_s0 = sand.u32 1, %s5665_s22   ;;  %p7643_p3 = scmp.ne.s32.totalorder %s7627_s7, 0 }
  0xf2   : > { %5650 = vsyncadd (%p7642_p13), [#allocation6], 4294967040  ;;  %s4446_s16 = sshll.u32 %s567_s0, 7 }
  0xf3   : > { %s6179_s9 = scalar_lea.vmem [#allocation7], %s4446_s16 }
  0xf4   : > { %5652 = dma.done.wait (%p7643_p3), %s553_s8, 7168  }
  0xf5   : > { %5654 = vsyncadd (%p7643_p3), %s553_s8, 4294960128  ;;  %s4447_s4 = sshll.u32 %s567_s0, 6  ;;  %p677_p0 = scmp.lt.s32.totalorder %s5685_s27, 1 }
  0xf6   : > { %s7644_s7 = sld [smem:[#allocation31_spill]]  ;;  %s7645_s28 = sld [smem:[#allocation34_spill]] }
  0xf7   : > { %s6187_s11 = scalar_select %p677_p0, %s5685_s27, 1 }
  0xf8   : > { %s7646_s0 = sld [smem:[#allocation35_spill]]  ;;  %s7647_s10 = sld [smem:[#allocation39_spill]] }
  0xf9   : > { %s4451_s1 = sshll.u32 %s6187_s11, 1  ;;  %s7648_s19 = sld [smem:[#allocation37_spill]] }
  0xfa   : > { %s6215_s17 = scalar_lea.vmem [#allocation8], %s4447_s4  ;;  %s6217_s6 = scalar_lea.vmem [#allocation9], %s4446_s16 }
  0xfb   : > { %s6221_s12 = scalar_lea.vmem [#allocation11], %s4444_s18  ;;  %p4452_p2 = scmp.ne.s32.totalorder %s5685_s27, 0 }
  0xfc   : > { %s682_s14 = scalar_lea.vmem %s7644_s7, %s6187_s11  ;;  %s685_s29 = scalar_lea.vmem %s7645_s28, %s6187_s11  ;;  %v702_v0 = vld [vmem:[%s6168_s30] sm:$0xff] (!%p4452_p2)  ;;  %v703_v2 = vld [vmem:[%s6168_s30 + $0x8] sm:$0xff] (!%p4452_p2)  ;;  %v704_v5 = vld [vmem:[%s6168_s30 + $0x10] sm:$0xff] (!%p4452_p2) }
  0xfd   : > { %s6219_s7 = scalar_lea.vmem [#allocation10], %s4446_s16  ;;  %701 = sbr.rel (%p4452_p2) target bundleno = 264 (0x108), region = 96  ;;  %v718_v1 = vld [vmem:[#allocation5] sm:$0xff] (!%p4452_p2)  ;;  %v719_v4 = vld [vmem:[#allocation5 + $0x8] sm:$0xff] (!%p4452_p2)  ;;  %v705_v6 = vld [vmem:[%s6168_s30 + $0x18] sm:$0xff] (!%p4452_p2) }
  0xfe   : > { %s688_s26 = scalar_lea.vmem %s7646_s0, %s6187_s11  ;;  %s695_s22 = scalar_lea.vmem %s7647_s10, %s6187_s11  ;;  %v720_v3 = vadd.f32 (!%p4452_p2), %v718_v1, %v702_v0  ;;  %v721_v7 = vadd.f32 (!%p4452_p2), %v719_v4, %v703_v2  ;;  %v722_v8 = vadd.f32 (!%p4452_p2), %v718_v1, %v704_v5  ;;  %v723_v9 = vadd.f32 (!%p4452_p2), %v719_v4, %v705_v6  ;;  %v706_v10 = vld [vmem:[%s6168_s30 + $0x20] sm:$0xff] (!%p4452_p2)  ;;  %v707_v11 = vld [vmem:[%s6168_s30 + $0x28] sm:$0xff] (!%p4452_p2)  ;;  %v708_v12 = vld [vmem:[%s6168_s30 + $0x30] sm:$0xff] (!%p4452_p2) }
  0xff   : > { %s6213_s13 = scalar_lea.vmem %s7648_s19, %s4451_s1  ;;  %v724_v13 = vadd.f32 (!%p4452_p2), %v718_v1, %v706_v10  ;;  %v725_v14 = vadd.f32 (!%p4452_p2), %v719_v4, %v707_v11  ;;  %v726_v15 = vadd.f32 (!%p4452_p2), %v718_v1, %v708_v12  ;;  %v709_v16 = vld [vmem:[%s6168_s30 + $0x38] sm:$0xff] (!%p4452_p2)  ;;  %v710_v17 = vld [vmem:[%s6168_s30 + $0x40] sm:$0xff] (!%p4452_p2)  ;;  %v711_v18 = vld [vmem:[%s6168_s30 + $0x48] sm:$0xff] (!%p4452_p2) }
 0x100   : > { %736 = vst [vmem:[%s6221_s12] sm:$0xff] (!%p4452_p2), %v720_v3  ;;  %737 = vst [vmem:[%s6221_s12 + $0x8] sm:$0xff] (!%p4452_p2), %v721_v7  ;;  %v727_v19 = vadd.f32 (!%p4452_p2), %v719_v4, %v709_v16  ;;  %v728_v20 = vadd.f32 (!%p4452_p2), %v718_v1, %v710_v17  ;;  %v729_v21 = vadd.f32 (!%p4452_p2), %v719_v4, %v711_v18  ;;  %v712_v22 = vld [vmem:[%s6168_s30 + $0x50] sm:$0xff] (!%p4452_p2)  ;;  %v713_v23 = vld [vmem:[%s6168_s30 + $0x58] sm:$0xff] (!%p4452_p2) }
 0x101   : > { %738 = vst [vmem:[%s6221_s12 + $0x10] sm:$0xff] (!%p4452_p2), %v722_v8  ;;  %739 = vst [vmem:[%s6221_s12 + $0x18] sm:$0xff] (!%p4452_p2), %v723_v9  ;;  %v714_v24 = vld [vmem:[%s6168_s30 + $0x60] sm:$0xff] (!%p4452_p2)  ;;  %v730_v25 = vadd.f32 (!%p4452_p2), %v718_v1, %v712_v22  ;;  %v731_v26 = vadd.f32 (!%p4452_p2), %v719_v4, %v713_v23  ;;  %v715_v28 = vld [vmem:[%s6168_s30 + $0x68] sm:$0xff] (!%p4452_p2) }
 0x102   : > { %740 = vst [vmem:[%s6221_s12 + $0x20] sm:$0xff] (!%p4452_p2), %v724_v13  ;;  %741 = vst [vmem:[%s6221_s12 + $0x28] sm:$0xff] (!%p4452_p2), %v725_v14  ;;  %v732_v27 = vadd.f32 (!%p4452_p2), %v718_v1, %v714_v24  ;;  %v716_v29 = vld [vmem:[%s6168_s30 + $0x70] sm:$0xff] (!%p4452_p2)  ;;  %v717_v30 = vld [vmem:[%s6168_s30 + $0x78] sm:$0xff] (!%p4452_p2)  ;;  %v733_v31 = vadd.f32 (!%p4452_p2), %v719_v4, %v715_v28 }
 0x103   : > { %742 = vst [vmem:[%s6221_s12 + $0x30] sm:$0xff] (!%p4452_p2), %v726_v15  ;;  %743 = vst [vmem:[%s6221_s12 + $0x38] sm:$0xff] (!%p4452_p2), %v727_v19  ;;  %v734_v32 = vadd.f32 (!%p4452_p2), %v718_v1, %v716_v29  ;;  %v735_v33 = vadd.f32 (!%p4452_p2), %v719_v4, %v717_v30 }
 0x104   : > { %744 = vst [vmem:[%s6221_s12 + $0x40] sm:$0xff] %v728_v20  ;;  %745 = vst [vmem:[%s6221_s12 + $0x48] sm:$0xff] %v729_v21 }
 0x105   : > { %746 = vst [vmem:[%s6221_s12 + $0x50] sm:$0xff] %v730_v25  ;;  %747 = vst [vmem:[%s6221_s12 + $0x58] sm:$0xff] %v731_v26 }
 0x106   : > { %748 = vst [vmem:[%s6221_s12 + $0x60] sm:$0xff] %v732_v27  ;;  %749 = vst [vmem:[%s6221_s12 + $0x68] sm:$0xff] %v733_v31 }
 0x107   : > { %750 = vst [vmem:[%s6221_s12 + $0x70] sm:$0xff] %v734_v32  ;;  %751 = vst [vmem:[%s6221_s12 + $0x78] sm:$0xff] %v735_v33 }
 0x108 PF: > { %v5113_v50 = vld [vmem:[%s6179_s9 + $0x4] ss:$8 sps:$4 sm:$0xff]   ;;  %v5115_v51 = vld [vmem:[%s6179_s9] ss:$8 sps:$4 sm:$0xff]   ;;  %v5116_v52 = vld [vmem:[%s6179_s9 + $0x14] ss:$8 sps:$4 sm:$0xff]   ;;  %s7649_s24 = scalar_lea.vmem %s7550_s2, %s6187_s11 }
 0x109   : > { %1095 = vmatprep.subr.bf16.mxu0 %v5113_v50  ;;  %v5118_v27 = vld [vmem:[%s6179_s9 + $0x10] ss:$8 sps:$4 sm:$0xff]   ;;  %v5119_v33 = vld [vmem:[%s6179_s9 + $0x24] ss:$8 sps:$4 sm:$0xff]   ;;  %v5122_v50 = vld [vmem:[%s6179_s9 + $0x34] ss:$8 sps:$4 sm:$0xff]  }
 0x10a   : > { %1096 = vmatpush1.bf16.msra.mxu0 %v5115_v51  ;;  %vm5715_vm0 = vmmov 0   ;;  %s5716_s30 = smov 64   ;;  %vm1228_vm1 = vcmask 261120   ;;  %vm1626_vm4 = vcmask 130048   ;;  %s5717_s16 = smov 32   ;;  %vm3211_vm5 = vcmask 523264  }
 0x10b   : > { %v752_v34 = vld [vmem:[%s6221_s12] sm:$0xff]  ;;  %v753_v36 = vld [vmem:[%s6221_s12 + $0x8] sm:$0xff]  ;;  %1097 = vmatprep.subr.bf16.mxu0 %v5116_v52  ;;  %s4191_s8 = sshll.u32 %s6221_s12, 4  ;;  %s7655_s20 = sld [smem:[#allocation40_spill]]  ;;  %s7480_s8 = int_to_ptr.vmem [resolvable:$true] %s4191_s8 }
 0x10c   : > { %v754_v35 = vld [vmem:[%s6221_s12 + $0x10] sm:$0xff]  ;;  %770 = vadd.xlane.f32.xlu0 %v752_v34  ;;  %v755_v37 = vld [vmem:[%s6221_s12 + $0x18] sm:$0xff]  ;;  %s5571_s1 = scalar_lea.vmem %s7480_s8, 2048  ;;  %p7657_p9 = scmp.ne.s32.totalorder %s7629_s15, 0 }
 0x10d   : > { %774 = vadd.xlane.f32.xlu1 %v754_v35  ;;  %v756_v38 = vld [vmem:[%s6221_s12 + $0x20] sm:$0xff]  ;;  %v757_v39 = vld [vmem:[%s6221_s12 + $0x28] sm:$0xff]  ;;  %v6271_v44 = vld [vmem:[%s6221_s12 + $0x50] sm:$0xff]  ;;  %p5572_p1 = scmp.ne.s32.totalorder %s7480_s8, %s5571_s1  ;;  %s5719_s10 = smov [#allocation11]  }
 0x10e   : > { %v758_v40 = vld [vmem:[%s6221_s12 + $0x30] sm:$0xff]  ;;  %v759_v41 = vld [vmem:[%s6221_s12 + $0x38] sm:$0xff]  ;;  %v6279_v46 = vld [vmem:[%s6221_s12 + $0x60] sm:$0xff]  ;;  %1098 = vmatpush1.bf16.msra.mxu0 %v5118_v27 }
 0x10f   : > { %v6265_v42 = vld [vmem:[%s6221_s12 + $0x40] sm:$0xff]  ;;  %v6268_v43 = vld [vmem:[%s6221_s12 + $0x48] sm:$0xff]  ;;  %v6274_v45 = vld [vmem:[%s6221_s12 + $0x58] sm:$0xff]  ;;  %1099 = vmatprep.subr.bf16.mxu0 %v5119_v33  ;;  %p5573_p11 = pnand %p5572_p1, %p7657_p9 }
 0x110   : > { %772 = vadd.xlane.f32.xlu0 %v753_v36  ;;  %v6282_v47 = vld [vmem:[%s6221_s12 + $0x68] sm:$0xff]  ;;  %v6287_v48 = vld [vmem:[%s6221_s12 + $0x70] sm:$0xff]  ;;  %v6290_v49 = vld [vmem:[%s6221_s12 + $0x78] sm:$0xff] }
 0x111   : > { %776 = vadd.xlane.f32.xlu1 %v755_v37  ;;  %p5574_p7 = pneg %p5573_p11 }
 0x114   : > { %778 = vadd.xlane.f32.xlu0 %v756_v38 }
 0x115   : > { %780 = vadd.xlane.f32.xlu1 %v757_v39 }
 0x118   : > { %782 = vadd.xlane.f32.xlu0 %v758_v40 }
 0x119   : > { %784 = vadd.xlane.f32.xlu1 %v759_v41 }
 0x11c   : > { %786 = vadd.xlane.f32.xlu0 %v6265_v42 }
 0x11d   : > { %788 = vadd.xlane.f32.xlu1 %v6268_v43 }
 0x120   : > { %790 = vadd.xlane.f32.xlu0 %v6271_v44 }
 0x121   : > { %792 = vadd.xlane.f32.xlu1 %v6274_v45 }
 0x124   : > { %794 = vadd.xlane.f32.xlu0 %v6279_v46 }
 0x125   : > { %796 = vadd.xlane.f32.xlu1 %v6282_v47 }
 0x128   : > { %798 = vadd.xlane.f32.xlu0 %v6287_v48 }
 0x129   : > { %800 = vadd.xlane.f32.xlu1 %v6290_v49 }
 0x199   : > { %v771_v53 = vpop.xlane.xlu0 %770 }
 0x19a   : > { %v775_v54 = vpop.xlane.xlu1 %774  ;;  %v803_v55 = vmul.f32 0.0078125, %v771_v53  ;;  %v5124_v53 = vld [vmem:[%s6179_s9 + $0x30] ss:$8 sps:$4 sm:$0xff]  }
 0x19b   : > { %v805_v56 = vmul.f32 0.0078125, %v775_v54 }
 0x19c   : > { %v6299_v57 = vsub.f32 %v752_v34, %v803_v55 }
 0x19d   : > { %v6301_v58 = vsub.f32 %v754_v35, %v805_v56  ;;  %v773_v59 = vpop.xlane.xlu0 %772 }
 0x19e   : > { %v777_v60 = vpop.xlane.xlu1 %776  ;;  %v804_v61 = vmul.f32 0.0078125, %v773_v59  ;;  %v835_v62 = vmul.f32 %v6299_v57, %v6299_v57 }
 0x19f   : > { %v806_v63 = vmul.f32 0.0078125, %v777_v60  ;;  %v837_v0 = vmul.f32 %v6301_v58, %v6301_v58  ;;  %v5125_v60 = vld [vmem:[%s6179_s9 + $0x44] ss:$8 sps:$4 sm:$0xff]  }
 0x1a0   : > { %851 = vadd.xlane.f32.xlu0 %v835_v62  ;;  %v6307_v1 = vsub.f32 %v753_v36, %v804_v61  ;;  %v5127_v61 = vld [vmem:[%s6179_s9 + $0x40] ss:$8 sps:$4 sm:$0xff]  }
 0x1a1   : > { %v6309_v2 = vsub.f32 %v755_v37, %v806_v63  ;;  %v779_v3 = vpop.xlane.xlu0 %778 }
 0x1a2   : > { %v781_v4 = vpop.xlane.xlu1 %780  ;;  %v807_v5 = vmul.f32 0.0078125, %v779_v3  ;;  %v836_v6 = vmul.f32 %v6307_v1, %v6307_v1  ;;  %v5133_v3 = vld [vmem:[%s6179_s9 + $0x60] ss:$8 sps:$4 sm:$0xff]  }
 0x1a3   : > { %v808_v7 = vmul.f32 0.0078125, %v781_v4  ;;  %v838_v8 = vmul.f32 %v6309_v2, %v6309_v2  ;;  %v5134_v4 = vld [vmem:[%s6179_s9 + $0x74] ss:$8 sps:$4 sm:$0xff]  }
 0x1a4   : > { %855 = vadd.xlane.f32.xlu0 %v837_v0  ;;  %853 = vadd.xlane.f32.xlu1 %v836_v6  ;;  %v6315_v9 = vsub.f32 %v756_v38, %v807_v5  ;;  %v5130_v0 = vld [vmem:[%s6179_s9 + $0x50] ss:$8 sps:$4 sm:$0xff]   ;;  %v5713_v6 = vmov 0  }
 0x1a5   : > { %v6317_v10 = vsub.f32 %v757_v39, %v808_v7  ;;  %v783_v11 = vpop.xlane.xlu0 %782  ;;  %v5121_v39 = vld [vmem:[%s6179_s9 + $0x20] ss:$8 sps:$4 sm:$0xff]   ;;  %v5136_v5 = vld [vmem:[%s6179_s9 + $0x70] ss:$8 sps:$4 sm:$0xff]   ;;  %1127 = vmatprep.mubr.bf16.mxu0 %v5713_v6 }
 0x1a6   : > { %v785_v12 = vpop.xlane.xlu1 %784  ;;  %v809_v13 = vmul.f32 0.0078125, %v783_v11  ;;  %v839_v14 = vmul.f32 %v6315_v9, %v6315_v9  ;;  %1100 = vmatpush1.bf16.msra.mxu0 %v5121_v39 }
 0x1a7   : > { %v810_v15 = vmul.f32 0.0078125, %v785_v12  ;;  %v840_v16 = vmul.f32 %v6317_v10, %v6317_v10  ;;  %1101 = vmatprep.subr.bf16.mxu0 %v5122_v50 }
 0x1a8   : > { %857 = vadd.xlane.f32.xlu1 %v838_v8  ;;  %859 = vadd.xlane.f32.xlu0 %v839_v14  ;;  %v6323_v17 = vsub.f32 %v758_v40, %v809_v13 }
 0x1a9   : > { %v6325_v18 = vsub.f32 %v759_v41, %v810_v15  ;;  %v787_v19 = vpop.xlane.xlu0 %786 }
 0x1aa   : > { %v789_v20 = vpop.xlane.xlu1 %788  ;;  %v811_v21 = vmul.f32 0.0078125, %v787_v19  ;;  %v841_v22 = vmul.f32 %v6323_v17, %v6323_v17  ;;  %1102 = vmatpush1.bf16.msra.mxu0 %v5124_v53 }
 0x1ab   : > { %v812_v23 = vmul.f32 0.0078125, %v789_v20  ;;  %v842_v24 = vmul.f32 %v6325_v18, %v6325_v18  ;;  %1103 = vmatprep.subr.bf16.mxu0 %v5125_v60 }
 0x1ac   : > { %861 = vadd.xlane.f32.xlu1 %v840_v16  ;;  %863 = vadd.xlane.f32.xlu0 %v841_v22  ;;  %v6332_v25 = vsub.f32 %v6265_v42, %v811_v21 }
 0x1ad   : > { %v6335_v26 = vsub.f32 %v6268_v43, %v812_v23  ;;  %v791_v28 = vpop.xlane.xlu0 %790 }
 0x1ae   : > { %v793_v29 = vpop.xlane.xlu1 %792  ;;  %v813_v30 = vmul.f32 0.0078125, %v791_v28  ;;  %v843_v31 = vmul.f32 %v6332_v25, %v6332_v25  ;;  %1104 = vmatpush1.bf16.msra.mxu0 %v5127_v61 }
 0x1af   : > { %v814_v32 = vmul.f32 0.0078125, %v793_v29  ;;  %v844_v34 = vmul.f32 %v6335_v26, %v6335_v26 }
 0x1b0   : > { %865 = vadd.xlane.f32.xlu1 %v842_v24  ;;  %867 = vadd.xlane.f32.xlu0 %v843_v31  ;;  %v6344_v35 = vsub.f32 %v6271_v44, %v813_v30 }
 0x1b1   : > { %v6347_v36 = vsub.f32 %v6274_v45, %v814_v32  ;;  %v795_v37 = vpop.xlane.xlu0 %794 }
 0x1b2   : > { %v797_v38 = vpop.xlane.xlu1 %796  ;;  %v815_v40 = vmul.f32 0.0078125, %v795_v37  ;;  %v845_v41 = vmul.f32 %v6344_v35, %v6344_v35 }
 0x1b3   : > { %v816_v42 = vmul.f32 0.0078125, %v797_v38  ;;  %v846_v43 = vmul.f32 %v6347_v36, %v6347_v36  ;;  %v6391_v38 = vld [vmem:[%s7649_s24] ss:$0 sm:$0xff]  ;;  %s5575_s24 = sshll.u32 %s5719_s10, 4  ;;  %s5576_s24 = int_to_ptr.vmem [resolvable:$false] %s5575_s24 }
 0x1b4   : > { %869 = vadd.xlane.f32.xlu1 %v844_v34  ;;  %871 = vadd.xlane.f32.xlu0 %v845_v41  ;;  %v6355_v44 = vsub.f32 %v6279_v46, %v815_v40  ;;  %s5577_s27 = scalar_lea.vmem %s5576_s24, 4096  ;;  %p5578_p8 = scmp.lt.s32.totalorder %s7480_s8, %s5576_s24 }
 0x1b5   : > { %v6358_v45 = vsub.f32 %v6282_v47, %v816_v42  ;;  %v799_v51 = vpop.xlane.xlu0 %798  ;;  %p5579_p5 = scmp.lt.s32.totalorder %s5577_s27, %s5571_s1 }
 0x1b6   : > { %v801_v52 = vpop.xlane.xlu1 %800  ;;  %v817_v54 = vmul.f32 0.0078125, %v799_v51  ;;  %v847_v55 = vmul.f32 %v6355_v44, %v6355_v44 }
 0x1b7   : > { %v818_v56 = vmul.f32 0.0078125, %v801_v52  ;;  %v848_v46 = vmul.f32 %v6358_v45, %v6358_v45  ;;  %p5580_p4 = por %p5579_p5, %p5578_p8 }
 0x1b8   : > { %873 = vadd.xlane.f32.xlu1 %v846_v43  ;;  %875 = vadd.xlane.f32.xlu0 %v847_v55  ;;  %v6367_v47 = vsub.f32 %v6287_v48, %v817_v54  ;;  %v5128_v48 = vld [vmem:[%s6179_s9 + $0x54] ss:$8 sps:$4 sm:$0xff]  }
 0x1b9   : > { %v6370_v59 = vsub.f32 %v6290_v49, %v818_v56  ;;  %1105 = vmatprep.subr.bf16.mxu0 %v5128_v48  ;;  %v5131_v49 = vld [vmem:[%s6179_s9 + $0x64] ss:$8 sps:$4 sm:$0xff]   ;;  %s5718_s9 = smov 96   ;;  %p5581_p10 = pnand %p5580_p4, %p5574_p7 }
 0x1ba   : > { %v849_v62 = vmul.f32 %v6367_v47, %v6367_v47  ;;  %1106 = vmatpush1.bf16.msra.mxu0 %v5130_v0 }
 0x1bb   : > { %v850_v63 = vmul.f32 %v6370_v59, %v6370_v59  ;;  %1107 = vmatprep.subr.bf16.mxu0 %v5131_v49 }
 0x1bc   : > { %877 = vadd.xlane.f32.xlu1 %v848_v46  ;;  %879 = vadd.xlane.f32.xlu0 %v849_v62 }
 0x1be   : > { %1108 = vmatpush1.bf16.msra.mxu0 %v5133_v3 }
 0x1bf   : > { %1109 = vmatprep.subr.bf16.mxu0 %v5134_v4 }
 0x1c0   : > { %881 = vadd.xlane.f32.xlu1 %v850_v63 }
 0x1c2   : > { %1110 = vmatpush1.bf16.msra.mxu0 %v5136_v5 }
 0x22d   : > { %v852_v7 = vpop.xlane.xlu0 %851 }
 0x22e   : > { %v883_v8 = vmul.f32 0.0078125, %v852_v7 }
 0x230   : > { %v899_v11 = vadd.f32 1e-05, %v883_v8 }
 0x231   : > { %v854_v12 = vpop.xlane.xlu1 %853  ;;  %v856_v13 = vpop.xlane.xlu0 %855 }
 0x232   : > { %5185 = vrsqrt.f32 %v899_v11  ;;  %v884_v14 = vmul.f32 0.0078125, %v854_v12  ;;  %v885_v15 = vmul.f32 0.0078125, %v856_v13 }
 0x234   : > { %v900_v16 = vadd.f32 1e-05, %v884_v14  ;;  %v901_v19 = vadd.f32 1e-05, %v885_v15 }
 0x235   : > { %v858_v20 = vpop.xlane.xlu1 %857  ;;  %v860_v21 = vpop.xlane.xlu0 %859 }
 0x236   : > { %5187 = vrsqrt.f32 %v900_v16  ;;  %v886_v22 = vmul.f32 0.0078125, %v858_v20  ;;  %v887_v24 = vmul.f32 0.0078125, %v860_v21 }
 0x237   : > { %5189 = vrsqrt.f32 %v901_v19 }
 0x238   : > { %v902_v23 = vadd.f32 1e-05, %v886_v22  ;;  %v903_v30 = vadd.f32 1e-05, %v887_v24 }
 0x239   : > { %v862_v27 = vpop.xlane.xlu1 %861  ;;  %v864_v32 = vpop.xlane.xlu0 %863 }
 0x23a   : > { %5191 = vrsqrt.f32 %v902_v23  ;;  %v888_v28 = vmul.f32 0.0078125, %v862_v27  ;;  %v889_v40 = vmul.f32 0.0078125, %v864_v32 }
 0x23c   : > { %v5186_v29 = vpop.eup %5185  ;;  %v904_v31 = vadd.f32 1e-05, %v888_v28  ;;  %v905_v54 = vadd.f32 1e-05, %v889_v40 }
 0x23d   : > { %v866_v33 = vpop.xlane.xlu1 %865  ;;  %v931_v34 = vmul.f32 %v5186_v29, %v6299_v57  ;;  %v6400_v57 = vld [vmem:[%s682_s14] ss:$0 sm:$0xff]  ;;  %v868_v55 = vpop.xlane.xlu0 %867 }
 0x23e   : > { %5193 = vrsqrt.f32 %v904_v31  ;;  %v890_v37 = vmul.f32 0.0078125, %v866_v33  ;;  %v891_v0 = vmul.f32 0.0078125, %v868_v55 }
 0x23f   : > { %5195 = vrsqrt.f32 %v903_v30  ;;  %v953_v42 = vmul.f32 %v6391_v38, %v931_v34 }
 0x240   : > { %v5188_v39 = vpop.eup %5187  ;;  %v906_v50 = vadd.f32 1e-05, %v890_v37  ;;  %v907_v7 = vadd.f32 1e-05, %v891_v0 }
 0x241   : > { %v932_v41 = vmul.f32 %v5188_v39, %v6307_v1  ;;  %v5190_v43 = vpop.eup %5189  ;;  %v870_v51 = vpop.xlane.xlu1 %869  ;;  %v975_v56 = vadd.f32 %v6400_v57, %v953_v42 }
 0x242   : > { %v933_v46 = vmul.f32 %v5190_v43, %v6301_v58  ;;  %5197 = vrsqrt.f32 %v906_v50  ;;  %v892_v61 = vmul.f32 0.0078125, %v870_v51  ;;  %v872_v8 = vpop.xlane.xlu0 %871 }
 0x243   : > { %v954_v52 = vmul.f32 %v6391_v38, %v932_v41  ;;  %5199 = vrsqrt.f32 %v905_v54  ;;  %v893_v19 = vmul.f32 0.0078125, %v872_v8 }
 0x244   : > { %v5192_v53 = vpop.eup %5191  ;;  %v955_v49 = vmul.f32 %v6391_v38, %v933_v46  ;;  %v908_v4 = vadd.f32 1e-05, %v892_v61 }
 0x245   : > { %v976_v1 = vadd.f32 %v6400_v57, %v954_v52  ;;  %v934_v60 = vmul.f32 %v5192_v53, %v6309_v2  ;;  %v874_v5 = vpop.xlane.xlu1 %873  ;;  %v909_v24 = vadd.f32 1e-05, %v893_v19 }
 0x246   : > { %v977_v11 = vadd.f32 %v6400_v57, %v955_v49  ;;  %5201 = vrsqrt.f32 %v908_v4  ;;  %v894_v13 = vmul.f32 0.0078125, %v874_v5  ;;  %v876_v27 = vpop.xlane.xlu0 %875 }
 0x247   : > { %v991_v62 = vpack.c.bf16 %v976_v1, %v975_v56  ;;  %v956_v63 = vmul.f32 %v6391_v38, %v934_v60  ;;  %5203 = vrsqrt.f32 %v907_v7  ;;  %v895_v34 = vmul.f32 0.0078125, %v876_v27 }
 0x248   : > { %v5194_v48 = vpop.eup %5193  ;;  %v910_v22 = vadd.f32 1e-05, %v894_v13 }
 0x249   : > { %1128 = vmatmul.mubr.bf16.vlgmr.msra.gmra.mrb[0].mxu0 %v991_v62  ;;  %v5196_v3 = vpop.eup %5195  ;;  %v978_v58 = vadd.f32 %v6400_v57, %v956_v63  ;;  %v936_v2 = vmul.f32 %v5194_v48, %v6317_v10  ;;  %v878_v10 = vpop.xlane.xlu1 %877  ;;  %v911_v42 = vadd.f32 1e-05, %v895_v34 }
 0x24a   : > { %1137 = vmatprep.mubr.bf16.mxu0 %v5713_v6  ;;  %v935_v12 = vmul.f32 %v5196_v3, %v6315_v9  ;;  %5205 = vrsqrt.f32 %v910_v22  ;;  %v896_v30 = vmul.f32 0.0078125, %v878_v10  ;;  %v880_v43 = vpop.xlane.xlu0 %879 }
 0x24b   : > { %v992_v14 = vpack.c.bf16 %v978_v58, %v977_v11  ;;  %v958_v15 = vmul.f32 %v6391_v38, %v936_v2  ;;  %5207 = vrsqrt.f32 %v909_v24  ;;  %v897_v56 = vmul.f32 0.0078125, %v880_v43 }
 0x24c   : > { %v5198_v16 = vpop.eup %5197  ;;  %v957_v20 = vmul.f32 %v6391_v38, %v935_v12  ;;  %v912_v40 = vadd.f32 1e-05, %v896_v30 }
 0x24d   : > { %v5200_v21 = vpop.eup %5199  ;;  %v980_v23 = vadd.f32 %v6400_v57, %v958_v15  ;;  %v938_v9 = vmul.f32 %v5198_v16, %v6325_v18  ;;  %v882_v18 = vpop.xlane.xlu1 %881 }
 0x24e   : > { %v979_v28 = vadd.f32 %v6400_v57, %v957_v20  ;;  %v937_v29 = vmul.f32 %v5200_v21, %v6323_v17  ;;  %5209 = vrsqrt.f32 %v912_v40  ;;  %v898_v52 = vmul.f32 0.0078125, %v882_v18 }
 0x24f   : > { %v960_v32 = vmul.f32 %v6391_v38, %v938_v9  ;;  %5211 = vrsqrt.f32 %v911_v42 }
 0x250   : > { %v993_v31 = vpack.c.bf16 %v980_v23, %v979_v28  ;;  %v5202_v33 = vpop.eup %5201  ;;  %v959_v37 = vmul.f32 %v6391_v38, %v937_v29  ;;  %v914_v60 = vadd.f32 1e-05, %v898_v52 }
 0x251   : > { %1138 = vmatmul.mubr.bf16.gmra.mrb[4].mxu0 %v992_v14  ;;  %v5204_v39 = vpop.eup %5203  ;;  %v982_v41 = vadd.f32 %v6400_v57, %v960_v32  ;;  %v940_v17 = vmul.f32 %v5202_v33, %v6335_v26 }
 0x252   : > { %1147 = vmatprep.mubr.bf16.mxu0 %v5713_v6  ;;  %v981_v50 = vadd.f32 %v6400_v57, %v959_v37  ;;  %v939_v51 = vmul.f32 %v5204_v39, %v6332_v25  ;;  %v913_v25 = vadd.f32 1e-05, %v897_v56  ;;  %5213 = vrsqrt.f32 %v914_v60 }
 0x253   : > { %v962_v54 = vmul.f32 %v6391_v38, %v940_v17 }
 0x254   : > { %v994_v53 = vpack.c.bf16 %v982_v41, %v981_v50  ;;  %v5206_v55 = vpop.eup %5205  ;;  %v961_v1 = vmul.f32 %v6391_v38, %v939_v51  ;;  %5215 = vrsqrt.f32 %v913_v25 }
 0x255   : > { %v5208_v46 = vpop.eup %5207  ;;  %v984_v26 = vadd.f32 %v6400_v57, %v962_v54  ;;  %v942_v61 = vmul.f32 %v5206_v55, %v6347_v36 }
 0x256   : > { %v983_v62 = vadd.f32 %v6400_v57, %v961_v1  ;;  %v941_v63 = vmul.f32 %v5208_v46, %v6344_v35 }
 0x257   : > { %v964_v0 = vmul.f32 %v6391_v38, %v942_v61 }
 0x258   : > { %v995_v48 = vpack.c.bf16 %v984_v26, %v983_v62  ;;  %v5210_v49 = vpop.eup %5209  ;;  %v963_v3 = vmul.f32 %v6391_v38, %v941_v63 }
 0x259   : > { %1148 = vmatmul.mubr.bf16.gmra.mrb[8].mxu0 %v993_v31  ;;  %v5212_v4 = vpop.eup %5211  ;;  %v986_v5 = vadd.f32 %v6400_v57, %v964_v0  ;;  %v944_v36 = vmul.f32 %v5210_v49, %v6358_v45 }
 0x25a   : > { %1157 = vmatprep.mubr.bf16.mxu0 %v5713_v6  ;;  %v985_v58 = vadd.f32 %v6400_v57, %v963_v3  ;;  %v943_v35 = vmul.f32 %v5212_v4, %v6355_v44 }
 0x25b   : > { %v966_v7 = vmul.f32 %v6391_v38, %v944_v36 }
 0x25c   : > { %v996_v2 = vpack.c.bf16 %v986_v5, %v985_v58  ;;  %v5214_v8 = vpop.eup %5213  ;;  %v965_v11 = vmul.f32 %v6391_v38, %v943_v35 }
 0x25d   : > { %v988_v13 = vadd.f32 %v6400_v57, %v966_v7  ;;  %v946_v14 = vmul.f32 %v5214_v8, %v6370_v59  ;;  %v5714_v59 = vmov 0.0  }
 0x25e   : > { %v5216_v12 = vpop.eup %5215  ;;  %v987_v45 = vadd.f32 %v6400_v57, %v965_v11  ;;  %4710 = vmatprep.subr.bf16.mxu1 %v5714_v59  ;;  %4704 = vmatprep.subr.bf16.mxu0 %v5714_v59 }
 0x25f   : > { %v945_v15 = vmul.f32 %v5216_v12, %v6367_v47  ;;  %v968_v44 = vmul.f32 %v6391_v38, %v946_v14  ;;  %4712 = vmatprep.mubr.msk.bf16.mxu1 %vm5715_vm0, %v5714_v59 }
 0x260   : > { %v997_v16 = vpack.c.bf16 %v988_v13, %v987_v45 }
 0x261   : > { %1158 = vmatmul.mubr.bf16.gmra.mrb[12].mxu0 %v994_v53  ;;  %v967_v19 = vmul.f32 %v6391_v38, %v945_v15  ;;  %v990_v20 = vadd.f32 %v6400_v57, %v968_v44 }
 0x262   : > { %1167 = vmatprep.mubr.bf16.mxu0 %v5713_v6 }
 0x263   : > { %v989_v21 = vadd.f32 %v6400_v57, %v967_v19 }
 0x265   : > { %v998_v22 = vpack.c.bf16 %v990_v20, %v989_v21 }
 0x269   : > { %1168 = vmatmul.mubr.bf16.gmra.mrb[16].mxu0 %v995_v48 }
 0x26a   : > { %1177 = vmatprep.mubr.bf16.mxu0 %v5713_v6 }
 0x271   : > { %1178 = vmatmul.mubr.bf16.gmra.mrb[20].mxu0 %v996_v2 }
 0x272   : > { %1187 = vmatprep.mubr.bf16.mxu0 %v5713_v6 }
 0x279   : > { %1188 = vmatmul.mubr.bf16.gmra.mrb[24].mxu0 %v997_v16 }
 0x27a   : > { %1197 = vmatprep.mubr.bf16.mxu0 %v5713_v6 }
 0x281   : > { %1198 = vmatmul.mubr.bf16.gmra.mrb[28].mxu0 %v998_v22 }
 0x282   : > { %4706 = vmatprep.mubr.msk.bf16.mxu0 %vm5715_vm0, %v5714_v59 }
 0x31c   : > { %v1129_v10 = vpop.f32.mrb[0].mxu0 }
 0x31d   : > { %v1131_v47 = vpop.f32.mrb[1].mxu0 }
 0x31e   : > { %v1133_v23 = vpop.f32.mrb[2].mxu0 }
 0x31f   : > { %v6460_v38 = vpack.c.bf16 %v1133_v23, %v1129_v10  ;;  %v1135_v57 = vpop.f32.mrb[3].mxu0  ;;  %v1208_v23 = vlaneseq }
 0x320   : > { %v6462_v9 = vpack.c.bf16 %v1135_v57, %v1131_v47 }
 0x324   : > { %v1139_v24 = vpop.f32.mrb[4].mxu0 }
 0x325   : > { %v1141_v27 = vpop.f32.mrb[5].mxu0 }
 0x326   : > { %v1143_v28 = vpop.f32.mrb[6].mxu0 }
 0x327   : > { %v6464_v29 = vpack.c.bf16 %v1143_v28, %v1139_v24  ;;  %v1145_v30 = vpop.f32.mrb[7].mxu0  ;;  %v6560_v28 = vshrl.u32 %v1208_v23, 7 }
 0x328   : > { %v6466_v31 = vpack.c.bf16 %v1145_v30, %v1141_v27 }
 0x329   : > { %1277 = vrot.lane.b32.xlu0 %v6464_v29, %s5716_s30 }
 0x32c   : > { %v1149_v32 = vpop.f32.mrb[8].mxu0 }
 0x32d   : > { %v1151_v33 = vpop.f32.mrb[9].mxu0 }
 0x32e   : > { %v1153_v34 = vpop.f32.mrb[10].mxu0 }
 0x32f   : > { %v6470_v37 = vpack.c.bf16 %v1153_v34, %v1149_v32  ;;  %v1155_v39 = vpop.f32.mrb[11].mxu0  ;;  %v1212_v32 = vand.u32 127, %v1208_v23 }
 0x330   : > { %v6472_v40 = vpack.c.bf16 %v1155_v39, %v1151_v33  ;;  %v1210_v33 = vadd.s32 8, %v6560_v28 }
 0x331   : > { %1327 = vrot.lane.b32.xlu1 %v6470_v37, %s5716_s30  ;;  %vm1213_vm2 = vcmp.lt.s32.totalorder %v6560_v28, %v1212_v32 }
 0x332   : > { %vm1214_vm3 = vcmp.lt.s32.totalorder %v1210_v33, %v1212_v32 }
 0x334   : > { %v1159_v18 = vpop.f32.mrb[12].mxu0 }
 0x335   : > { %1226 = vrot.lane.b32.xlu1 %v6460_v38, %s5716_s30  ;;  %v1161_v41 = vpop.f32.mrb[13].mxu0 }
 0x336   : > { %v1163_v17 = vpop.f32.mrb[14].mxu0 }
 0x337   : > { %v6478_v42 = vpack.c.bf16 %v1163_v17, %v1159_v18  ;;  %v1165_v43 = vpop.f32.mrb[15].mxu0  ;;  %v6565_v17 = vsel %vm1213_vm2, -1e+30, %v5714_v59 }
 0x338   : > { %v6480_v50 = vpack.c.bf16 %v1165_v43, %v1161_v41 }
 0x339   : > { %1377 = vrot.lane.b32.xlu1 %v6478_v42, %s5716_s30 }
 0x33c   : > { %v1169_v51 = vpop.f32.mrb[16].mxu0 }
 0x33d   : > { %v1171_v52 = vpop.f32.mrb[17].mxu0 }
 0x33e   : > { %v1173_v53 = vpop.f32.mrb[18].mxu0 }
 0x33f   : > { %v6484_v54 = vpack.c.bf16 %v1173_v53, %v1169_v51  ;;  %v1175_v55 = vpop.f32.mrb[19].mxu0  ;;  %v6571_v53 = vsel %vm1214_vm3, -1e+30, %v5714_v59 }
 0x340   : > { %v6486_v56 = vpack.c.bf16 %v1175_v55, %v1171_v52 }
 0x341   : > { %1427 = vrot.lane.b32.xlu0 %v6484_v54, %s5716_s30 }
 0x344   : > { %v1179_v1 = vpop.f32.mrb[20].mxu0 }
 0x345   : > { %v1181_v46 = vpop.f32.mrb[21].mxu0 }
 0x346   : > { %v1183_v60 = vpop.f32.mrb[22].mxu0 }
 0x347   : > { %v6490_v26 = vpack.c.bf16 %v1183_v60, %v1179_v1  ;;  %v1185_v61 = vpop.f32.mrb[23].mxu0 }
 0x348   : > { %v6492_v25 = vpack.c.bf16 %v1185_v61, %v1181_v46 }
 0x349   : > { %1477 = vrot.lane.b32.xlu1 %v6490_v26, %s5716_s30 }
 0x34c   : > { %v1189_v62 = vpop.f32.mrb[24].mxu0 }
 0x34d   : > { %v1191_v63 = vpop.f32.mrb[25].mxu0 }
 0x34e   : > { %v1193_v48 = vpop.f32.mrb[26].mxu0 }
 0x34f   : > { %v6496_v0 = vpack.c.bf16 %v1193_v48, %v1189_v62  ;;  %v1195_v49 = vpop.f32.mrb[27].mxu0 }
 0x350   : > { %v6498_v3 = vpack.c.bf16 %v1195_v49, %v1191_v63 }
 0x351   : > { %1527 = vrot.lane.b32.xlu0 %v6496_v0, %s5716_s30 }
 0x354   : > { %v1199_v4 = vpop.f32.mrb[28].mxu0 }
 0x355   : > { %v1201_v5 = vpop.f32.mrb[29].mxu0 }
 0x356   : > { %v1203_v36 = vpop.f32.mrb[30].mxu0 }
 0x357   : > { %v6502_v58 = vpack.c.bf16 %v1203_v36, %v1199_v4  ;;  %v1205_v35 = vpop.f32.mrb[31].mxu0 }
 0x358   : > { %v6504_v2 = vpack.c.bf16 %v1205_v35, %v1201_v5 }
 0x359   : > { %1577 = vrot.lane.b32.xlu1 %v6502_v58, %s5716_s30 }
 0x39b   : > { %v1278_v7 = vpop.permute.xlu0 %1277 }
 0x39c   : > { %v1283_v8 = vsel %vm1228_vm1, %v1278_v7, 0 }
 0x39d   : > { %4711 = vmatpush3.bf16.xpose.msra.mxu1 %v1283_v8 }
 0x39e   : > { %4716 = vmatprep.subr.bf16.mxu1 %v5714_v59 }
 0x3a3   : > { %v1328_v11 = vpop.permute.xlu1 %1327 }
 0x3a4   : > { %v1333_v12 = vsel %vm1228_vm1, %v1328_v11, 0  ;;  %4713 = vmatmul.mubr.msk.bf16.vlgmr.msra.gmra.mrb[0].mxu1 %vm1228_vm1, %v6464_v29 }
 0x3a5   : > { %4717 = vmatpush3.bf16.xpose.msra.mxu1 %v1333_v12  ;;  %4718 = vmatprep.mubr.msk.bf16.mxu1 %vm5715_vm0, %v5714_v59 }
 0x3a6   : > { %4722 = vmatprep.subr.bf16.mxu1 %v5714_v59 }
 0x3a7   : > { %v1227_v13 = vpop.permute.xlu1 %1226 }
 0x3a8   : > { %v1233_v14 = vsel %vm1228_vm1, %v1227_v13, 0 }
 0x3a9   : > { %4705 = vmatpush3.bf16.xpose.msra.mxu0 %v1233_v14 }
 0x3aa   : > { %4770 = vmatprep.subr.bf16.mxu0 %v5714_v59 }
 0x3ab   : > { %v1378_v45 = vpop.permute.xlu1 %1377 }
 0x3ac   : > { %v1383_v15 = vsel %vm1228_vm1, %v1378_v45, 0  ;;  %4719 = vmatmul.mubr.msk.bf16.vlgmr.msra.gmra.mrb[4].mxu1 %vm1228_vm1, %v6470_v37 }
 0x3ad   : > { %4723 = vmatpush3.bf16.xpose.msra.mxu1 %v1383_v15  ;;  %4724 = vmatprep.mubr.msk.bf16.mxu1 %vm5715_vm0, %v5714_v59 }
 0x3ae   : > { %4728 = vmatprep.subr.bf16.mxu1 %v5714_v59 }
 0x3b0   : > { %4707 = vmatmul.mubr.msk.bf16.vlgmr.msra.gmra.mrb[32].mxu0 %vm1228_vm1, %v6460_v38 }
 0x3b1   : > { %4771 = vmatpush3.bf16.msra.mxu0 %v6480_v50  ;;  %4772 = vmatprep.mubr.msk.bf16.mxu0 %vm5715_vm0, %v5714_v59 }
 0x3b2   : > { %4782 = vmatprep.subr.bf16.mxu0 %v5714_v59 }
 0x3b3   : > { %v1428_v16 = vpop.permute.xlu0 %1427 }
 0x3b4   : > { %v1433_v44 = vsel %vm1228_vm1, %v1428_v16, 0  ;;  %4725 = vmatmul.mubr.msk.bf16.vlgmr.msra.gmra.mrb[8].mxu1 %vm1228_vm1, %v6478_v42 }
 0x3b5   : > { %4729 = vmatpush3.bf16.xpose.msra.mxu1 %v1433_v44  ;;  %4730 = vmatprep.mubr.msk.bf16.mxu1 %vm5715_vm0, %v5714_v59 }
 0x3b6   : > { %4734 = vmatprep.subr.bf16.mxu1 %v5714_v59 }
 0x3bb   : > { %v1478_v19 = vpop.permute.xlu1 %1477 }
 0x3bc   : > { %v1483_v20 = vsel %vm1228_vm1, %v1478_v19, 0  ;;  %4731 = vmatmul.mubr.msk.bf16.vlgmr.msra.gmra.mrb[12].mxu1 %vm1228_vm1, %v6484_v54 }
 0x3bd   : > { %4735 = vmatpush3.bf16.xpose.msra.mxu1 %v1483_v20  ;;  %4736 = vmatprep.mubr.msk.bf16.mxu1 %vm5715_vm0, %v5714_v59 }
 0x3be   : > { %4740 = vmatprep.subr.bf16.mxu1 %v5714_v59 }
 0x3c3   : > { %v1528_v21 = vpop.permute.xlu0 %1527 }
 0x3c4   : > { %v1533_v22 = vsel %vm1228_vm1, %v1528_v21, 0  ;;  %4737 = vmatmul.mubr.msk.bf16.vlgmr.msra.gmra.mrb[16].mxu1 %vm1228_vm1, %v6490_v26 }
 0x3c5   : > { %4741 = vmatpush3.bf16.xpose.msra.mxu1 %v1533_v22  ;;  %4742 = vmatprep.mubr.msk.bf16.mxu1 %vm5715_vm0, %v5714_v59 }
 0x3c6   : > { %4746 = vmatprep.subr.bf16.mxu1 %v5714_v59 }
 0x3cb   : > { %v1578_v10 = vpop.permute.xlu1 %1577 }
 0x3cc   : > { %v1583_v47 = vsel %vm1228_vm1, %v1578_v10, 0  ;;  %4743 = vmatmul.mubr.msk.bf16.vlgmr.msra.gmra.mrb[20].mxu1 %vm1228_vm1, %v6496_v0 }
 0x3cd   : > { %4747 = vmatpush3.bf16.xpose.msra.mxu1 %v1583_v47  ;;  %4748 = vmatprep.mubr.msk.bf16.mxu1 %vm5715_vm0, %v5714_v59 }
 0x3ce   : > { %4752 = vmatprep.subr.bf16.mxu1 %v5714_v59 }
 0x3d4   : > { %4749 = vmatmul.mubr.msk.bf16.vlgmr.msra.gmra.mrb[24].mxu1 %vm1228_vm1, %v6502_v58 }
 0x3d5   : > { %4753 = vmatpush3.bf16.msra.mxu1 %v6462_v9  ;;  %4754 = vmatprep.mubr.msk.bf16.mxu1 %vm5715_vm0, %v5714_v59 }
 0x3d6   : > { %4758 = vmatprep.subr.bf16.mxu1 %v5714_v59 }
 0x477   : > { %v1319_v57 = vpop.f32.mrb[0].mxu1 }
 0x478   : > { %v4714_v24 = vpop.f32.mrb[1].mxu1  ;;  %v6574_v1 = vadd.f32 %v1319_v57, %v6565_v17 }
 0x479   : > { %v1322_v27 = vpop.f32.mrb[2].mxu1 }
 0x47a   : > { %v4715_v30 = vpop.f32.mrb[3].mxu1  ;;  %v6587_v5 = vadd.f32 %v1322_v27, %v6571_v53  ;;  %v1633_v35 = vsel %vm1626_vm4, %v6574_v1, -inf }
 0x47c   : > { %v1636_v12 = vsel %vm1626_vm4, %v6587_v5, -inf }
 0x47f   : > { %v1369_v34 = vpop.f32.mrb[4].mxu1 }
 0x480   : > { %v4720_v39 = vpop.f32.mrb[5].mxu1  ;;  %v6597_v11 = vadd.f32 %v1369_v34, %v6565_v17 }
 0x481   : > { %v1372_v18 = vpop.f32.mrb[6].mxu1 }
 0x482   : > { %v4721_v41 = vpop.f32.mrb[7].mxu1  ;;  %v6582_v63 = vadd.f32 %v1372_v18, %v6571_v53  ;;  %v1639_v20 = vsel %vm1626_vm4, %v6597_v11, -inf }
 0x483   : > { %v1269_v43 = vpop.f32.mrb[32].mxu0 }
 0x484   : > { %v6568_v51 = vadd.f32 %v1269_v43, %v6565_v17  ;;  %v4708_v52 = vpop.f32.mrb[33].mxu0  ;;  %v1642_v8 = vsel %vm1626_vm4, %v6582_v63, -inf }
 0x485   : > { %v1272_v55 = vpop.f32.mrb[34].mxu0 }
 0x486   : > { %v6577_v46 = vadd.f32 %v1272_v55, %v6571_v53  ;;  %v4709_v60 = vpop.f32.mrb[35].mxu0  ;;  %v1627_v61 = vsel %vm1626_vm4, %v6568_v51, -inf }
 0x487   : > { %1628 = vmax.xlane.f32.xlu0 %v1627_v61  ;;  %v1419_v62 = vpop.f32.mrb[8].mxu1 }
 0x488   : > { %v4726_v48 = vpop.f32.mrb[9].mxu1  ;;  %v1630_v49 = vsel %vm1626_vm4, %v6577_v46, -inf  ;;  %v6604_v16 = vadd.f32 %v1419_v62, %v6565_v17 }
 0x489   : > { %1631 = vmax.xlane.f32.xlu1 %v1630_v49  ;;  %v1422_v4 = vpop.f32.mrb[10].mxu1 }
 0x48a   : > { %v4727_v36 = vpop.f32.mrb[11].mxu1  ;;  %v6592_v7 = vadd.f32 %v1422_v4, %v6571_v53  ;;  %v1645_v10 = vsel %vm1626_vm4, %v6604_v16, -inf }
 0x48b   : > { %1634 = vmax.xlane.f32.xlu0 %v1633_v35 }
 0x48c   : > { %v1648_v45 = vsel %vm1626_vm4, %v6592_v7, -inf }
 0x48d   : > { %1643 = vmax.xlane.f32.xlu1 %v1642_v8 }
 0x48f   : > { %1637 = vmax.xlane.f32.xlu0 %v1636_v12  ;;  %v1469_v13 = vpop.f32.mrb[12].mxu1 }
 0x490   : > { %v4732_v14 = vpop.f32.mrb[13].mxu1  ;;  %v6614_v22 = vadd.f32 %v1469_v13, %v6565_v17 }
 0x491   : > { %1649 = vmax.xlane.f32.xlu1 %v1648_v45  ;;  %v1472_v15 = vpop.f32.mrb[14].mxu1 }
 0x492   : > { %v6607_v44 = vadd.f32 %v1472_v15, %v6571_v53  ;;  %v4733_v19 = vpop.f32.mrb[15].mxu1  ;;  %v1651_v32 = vsel %vm1626_vm4, %v6614_v22, -inf }
 0x493   : > { %1640 = vmax.xlane.f32.xlu0 %v1639_v20 }
 0x494   : > { %v1654_v21 = vsel %vm1626_vm4, %v6607_v44, -inf }
 0x495   : > { %1655 = vmax.xlane.f32.xlu1 %v1654_v21 }
 0x497   : > { %1646 = vmax.xlane.f32.xlu0 %v1645_v10  ;;  %v1519_v47 = vpop.f32.mrb[16].mxu1 }
 0x498   : > { %v4738_v23 = vpop.f32.mrb[17].mxu1  ;;  %v6619_v24 = vadd.f32 %v1519_v47, %v6565_v17 }
 0x499   : > { %v1522_v57 = vpop.f32.mrb[18].mxu1 }
 0x49a   : > { %v6622_v27 = vadd.f32 %v1522_v57, %v6571_v53  ;;  %v4739_v30 = vpop.f32.mrb[19].mxu1  ;;  %v1657_v34 = vsel %vm1626_vm4, %v6619_v24, -inf }
 0x49b   : > { %1652 = vmax.xlane.f32.xlu0 %v1651_v32 }
 0x49c   : > { %v1660_v33 = vsel %vm1626_vm4, %v6622_v27, -inf }
 0x49d   : > { %1661 = vmax.xlane.f32.xlu1 %v1660_v33 }
 0x49f   : > { %1658 = vmax.xlane.f32.xlu0 %v1657_v34  ;;  %v1569_v39 = vpop.f32.mrb[20].mxu1 }
 0x4a0   : > { %v6631_v18 = vadd.f32 %v1569_v39, %v6565_v17  ;;  %v4744_v41 = vpop.f32.mrb[21].mxu1 }
 0x4a1   : > { %v1572_v43 = vpop.f32.mrb[22].mxu1 }
 0x4a2   : > { %v6634_v52 = vadd.f32 %v1572_v43, %v6571_v53  ;;  %v4745_v55 = vpop.f32.mrb[23].mxu1  ;;  %v1663_v60 = vsel %vm1626_vm4, %v6631_v18, -inf }
 0x4a3   : > { %1664 = vmax.xlane.f32.xlu0 %v1663_v60 }
 0x4a4   : > { %v1666_v61 = vsel %vm1626_vm4, %v6634_v52, -inf }
 0x4a5   : > { %1667 = vmax.xlane.f32.xlu1 %v1666_v61 }
 0x4a7   : > { %v1619_v62 = vpop.f32.mrb[24].mxu1 }
 0x4a8   : > { %v6641_v48 = vadd.f32 %v1619_v62, %v6565_v17  ;;  %v4750_v49 = vpop.f32.mrb[25].mxu1 }
 0x4a9   : > { %v1622_v4 = vpop.f32.mrb[26].mxu1 }
 0x4aa   : > { %v6644_v36 = vadd.f32 %v1622_v4, %v6571_v53  ;;  %v4751_v35 = vpop.f32.mrb[27].mxu1  ;;  %v1669_v8 = vsel %vm1626_vm4, %v6641_v48, -inf }
 0x4ab   : > { %1670 = vmax.xlane.f32.xlu0 %v1669_v8 }
 0x4ac   : > { %v1672_v12 = vsel %vm1626_vm4, %v6644_v36, -inf }
 0x4ad   : > { %1673 = vmax.xlane.f32.xlu1 %v1672_v12 }
 0x514   : > { %v1629_v13 = vpop.xlane.xlu0 %1628 }
 0x515   : > { %v1675_v14 = vsub.f32 %v6568_v51, %v1629_v13 }
 0x516   : > { %v1632_v45 = vpop.xlane.xlu1 %1631 }
 0x517   : > { %v1691_v15 = vmul.f32 1.442695, %v1675_v14  ;;  %v1676_v19 = vsub.f32 %v6577_v46, %v1632_v45 }
 0x518   : > { %v1635_v20 = vpop.xlane.xlu0 %1634 }
 0x519   : > { %5217 = vpow2.f32 %v1691_v15  ;;  %v1693_v21 = vmul.f32 1.442695, %v1676_v19  ;;  %v1677_v10 = vsub.f32 %v6574_v1, %v1635_v20 }
 0x51a   : > { %v1644_v47 = vpop.xlane.xlu1 %1643 }
 0x51b   : > { %5219 = vpow2.f32 %v1693_v21  ;;  %v1695_v23 = vmul.f32 1.442695, %v1677_v10  ;;  %v1680_v57 = vsub.f32 %v6582_v63, %v1644_v47 }
 0x51c   : > { %v1638_v30 = vpop.xlane.xlu0 %1637 }
 0x51d   : > { %5221 = vpow2.f32 %v1695_v23  ;;  %v1678_v32 = vsub.f32 %v6587_v5, %v1638_v30  ;;  %v1701_v51 = vmul.f32 1.442695, %v1680_v57 }
 0x51e   : > { %v1650_v33 = vpop.xlane.xlu1 %1649 }
 0x51f   : > { %v1697_v34 = vmul.f32 1.442695, %v1678_v32  ;;  %v1682_v39 = vsub.f32 %v6592_v7, %v1650_v33 }
 0x520   : > { %v1641_v46 = vpop.xlane.xlu0 %1640 }
 0x521   : > { %5223 = vpow2.f32 %v1697_v34  ;;  %v1679_v41 = vsub.f32 %v6597_v11, %v1641_v46  ;;  %v1705_v55 = vmul.f32 1.442695, %v1682_v39 }
 0x522   : > { %v1656_v43 = vpop.xlane.xlu1 %1655  ;;  %5225 = vpow2.f32 %v1701_v51 }
 0x523   : > { %v6657_v1 = vpop.eup %5217  ;;  %v1699_v60 = vmul.f32 1.442695, %v1679_v41  ;;  %v1684_v63 = vsub.f32 %v6607_v44, %v1656_v43 }
 0x524   : > { %v1647_v61 = vpop.xlane.xlu0 %1646  ;;  %v1723_v5 = vsel %vm1626_vm4, %v6657_v1, 0.0 }
 0x525   : > { %v6662_v62 = vpop.eup %5219  ;;  %5227 = vpow2.f32 %v1699_v60  ;;  %v1681_v7 = vsub.f32 %v6604_v16, %v1647_v61  ;;  %1724 = vadd.xlane.f32.xlu0 %v1723_v5  ;;  %v1709_v4 = vmul.f32 1.442695, %v1684_v63 }
 0x526   : > { %v1726_v11 = vsel %vm1626_vm4, %v6662_v62, 0.0  ;;  %5229 = vpow2.f32 %v1705_v55 }
 0x527   : > { %v6667_v49 = vpop.eup %5221  ;;  %v1703_v35 = vmul.f32 1.442695, %v1681_v7  ;;  %1727 = vadd.xlane.f32.xlu1 %v1726_v11 }
 0x528   : > { %v1653_v44 = vpop.xlane.xlu0 %1652  ;;  %v1729_v8 = vsel %vm1626_vm4, %v6667_v49, 0.0 }
 0x529   : > { %5231 = vpow2.f32 %v1703_v35  ;;  %v1683_v12 = vsub.f32 %v6614_v22, %v1653_v44  ;;  %1730 = vadd.xlane.f32.xlu0 %v1729_v8 }
 0x52a   : > { %v1662_v13 = vpop.xlane.xlu1 %1661  ;;  %5233 = vpow2.f32 %v1709_v4 }
 0x52b   : > { %v6672_v16 = vpop.eup %5223  ;;  %v1707_v14 = vmul.f32 1.442695, %v1683_v12  ;;  %v1686_v45 = vsub.f32 %v6622_v27, %v1662_v13 }
 0x52c   : > { %v1659_v15 = vpop.xlane.xlu0 %1658  ;;  %v1732_v19 = vsel %vm1626_vm4, %v6672_v16, 0.0  ;;  %v6677_v20 = vpop.eup %5225 }
 0x52d   : > { %5235 = vpow2.f32 %v1707_v14  ;;  %v1713_v21 = vmul.f32 1.442695, %v1686_v45  ;;  %v1685_v10 = vsub.f32 %v6619_v24, %v1659_v15  ;;  %1733 = vadd.xlane.f32.xlu1 %v1732_v19  ;;  %v1738_v57 = vsel %vm1626_vm4, %v6677_v20, 0.0 }
 0x52f   : > { %v6680_v22 = vpop.eup %5227  ;;  %5237 = vpow2.f32 %v1713_v21  ;;  %v1711_v47 = vmul.f32 1.442695, %v1685_v10 }
 0x530   : > { %v1665_v23 = vpop.xlane.xlu0 %1664  ;;  %v1735_v27 = vsel %vm1626_vm4, %v6680_v22, 0.0  ;;  %v6686_v30 = vpop.eup %5229 }
 0x531   : > { %5239 = vpow2.f32 %v1711_v47  ;;  %v1687_v32 = vsub.f32 %v6631_v18, %v1665_v23  ;;  %1739 = vadd.xlane.f32.xlu1 %v1738_v57  ;;  %1736 = vadd.xlane.f32.xlu0 %v1735_v27  ;;  %v1744_v39 = vsel %vm1626_vm4, %v6686_v30, 0.0 }
 0x532   : > { %v1668_v24 = vpop.xlane.xlu1 %1667 }
 0x533   : > { %v6689_v33 = vpop.eup %5231  ;;  %v1715_v51 = vmul.f32 1.442695, %v1687_v32  ;;  %v1688_v34 = vsub.f32 %v6634_v52, %v1668_v24 }
 0x534   : > { %v1741_v46 = vsel %vm1626_vm4, %v6689_v33, 0.0  ;;  %v6696_v41 = vpop.eup %5233 }
 0x535   : > { %5241 = vpow2.f32 %v1715_v51  ;;  %v1717_v43 = vmul.f32 1.442695, %v1688_v34  ;;  %1745 = vadd.xlane.f32.xlu1 %v1744_v39  ;;  %1742 = vadd.xlane.f32.xlu0 %v1741_v46  ;;  %v1750_v60 = vsel %vm1626_vm4, %v6696_v41, 0.0 }
 0x537   : > { %v6698_v18 = vpop.eup %5235  ;;  %5243 = vpow2.f32 %v1717_v43 }
 0x538   : > { %v1671_v55 = vpop.xlane.xlu0 %1670  ;;  %v1747_v52 = vsel %vm1626_vm4, %v6698_v18, 0.0 }
 0x539   : > { %v6704_v63 = vpop.eup %5237  ;;  %v1689_v61 = vsub.f32 %v6641_v48, %v1671_v55  ;;  %1751 = vadd.xlane.f32.xlu1 %v1750_v60  ;;  %1748 = vadd.xlane.f32.xlu0 %v1747_v52 }
 0x53a   : > { %v1756_v11 = vsel %vm1626_vm4, %v6704_v63, 0.0  ;;  %v1674_v14 = vpop.xlane.xlu1 %1673 }
 0x53b   : > { %v6707_v5 = vpop.eup %5239  ;;  %v1719_v7 = vmul.f32 1.442695, %v1689_v61  ;;  %v1690_v45 = vsub.f32 %v6644_v36, %v1674_v14 }
 0x53c   : > { %v1753_v4 = vsel %vm1626_vm4, %v6707_v5, 0.0 }
 0x53d   : > { %5245 = vpow2.f32 %v1719_v7  ;;  %1757 = vadd.xlane.f32.xlu1 %v1756_v11  ;;  %1754 = vadd.xlane.f32.xlu0 %v1753_v4  ;;  %v1721_v15 = vmul.f32 1.442695, %v1690_v45 }
 0x53f   : > { %v6713_v35 = vpop.eup %5241  ;;  %5247 = vpow2.f32 %v1721_v15 }
 0x540   : > { %v1759_v44 = vsel %vm1626_vm4, %v6713_v35, 0.0 }
 0x541   : > { %v6717_v48 = vpop.eup %5243  ;;  %1760 = vadd.xlane.f32.xlu0 %v1759_v44 }
 0x542   : > { %v1762_v8 = vsel %vm1626_vm4, %v6717_v48, 0.0 }
 0x543   : > { %1763 = vadd.xlane.f32.xlu1 %v1762_v8 }
 0x547   : > { %v6721_v12 = vpop.eup %5245 }
 0x548   : > { %v1765_v13 = vsel %vm1626_vm4, %v6721_v12, 0.0 }
 0x549   : > { %1766 = vadd.xlane.f32.xlu0 %v1765_v13  ;;  %v6733_v19 = vpop.eup %5247 }
 0x54a   : > { %v1768_v36 = vsel %vm1626_vm4, %v6733_v19, 0.0 }
 0x554   : > { %2224 = vrot.lane.b32.xlu1 %v6464_v29, %s5717_s16 }
 0x55f   : > { %2173 = vrot.lane.b32.xlu0 %v6460_v38, %s5717_s16 }
 0x563   : > { %2275 = vrot.lane.b32.xlu0 %v6470_v37, %s5717_s16 }
 0x567   : > { %2273 = vrot.lane.b32.xlu0 %v6470_v37, %s5718_s9 }
 0x56b   : > { %2377 = vrot.lane.b32.xlu0 %v6484_v54, %s5717_s16 }
 0x56f   : > { %2375 = vrot.lane.b32.xlu0 %v6484_v54, %s5718_s9 }
 0x573   : > { %2479 = vrot.lane.b32.xlu0 %v6496_v0, %s5717_s16 }
 0x577   : > { %2477 = vrot.lane.b32.xlu0 %v6496_v0, %s5718_s9 }
 0x578   : > { %1769 = vadd.xlane.f32.xlu1 %v1768_v36 }
 0x589   : > { %2171 = vrot.lane.b32.xlu1 %v6460_v38, %s5718_s9 }
 0x58d   : > { %2222 = vrot.lane.b32.xlu1 %v6464_v29, %s5718_s9 }
 0x591   : > { %2326 = vrot.lane.b32.xlu1 %v6478_v42, %s5717_s16 }
 0x595   : > { %2324 = vrot.lane.b32.xlu1 %v6478_v42, %s5718_s9 }
 0x599   : > { %2428 = vrot.lane.b32.xlu1 %v6490_v26, %s5717_s16 }
 0x59d   : > { %2426 = vrot.lane.b32.xlu1 %v6490_v26, %s5718_s9 }
 0x5a1   : > { %2530 = vrot.lane.b32.xlu1 %v6502_v58, %s5717_s16 }
 0x5a5   : > { %2528 = vrot.lane.b32.xlu1 %v6502_v58, %s5718_s9 }
 0x5b2   : > { %v1725_v37 = vpop.xlane.xlu0 %1724 }
 0x5b3   : > { %5249 = vrcp.f32 %v1725_v37 }
 0x5b4   : > { %v1728_v54 = vpop.xlane.xlu1 %1727 }
 0x5b5   : > { %5251 = vrcp.f32 %v1728_v54 }
 0x5b6   : > { %v1731_v0 = vpop.xlane.xlu0 %1730 }
 0x5b7   : > { %5253 = vrcp.f32 %v1731_v0 }
 0x5ba   : > { %v1734_v38 = vpop.xlane.xlu1 %1733 }
 0x5bb   : > { %5255 = vrcp.f32 %v1734_v38 }
 0x5bd   : > { %v5250_v29 = vpop.eup %5249 }
 0x5be   : > { %v1740_v21 = vpop.xlane.xlu1 %1739  ;;  %v1737_v10 = vpop.xlane.xlu0 %1736  ;;  %v1787_v47 = vmul.f32 %v5250_v29, %v6657_v1 }
 0x5bf   : > { %v5252_v42 = vpop.eup %5251  ;;  %5257 = vrcp.f32 %v1740_v21 }
 0x5c0   : > { %v1788_v26 = vmul.f32 %v5252_v42, %v6662_v62  ;;  %5259 = vrcp.f32 %v1737_v10 }
 0x5c1   : > { %v5254_v27 = vpop.eup %5253 }
 0x5c2   : > { %v1746_v23 = vpop.xlane.xlu1 %1745  ;;  %v1743_v58 = vpop.xlane.xlu0 %1742  ;;  %v1803_v57 = vpack.c.bf16 %v1788_v26, %v1787_v47  ;;  %v1789_v51 = vmul.f32 %v5254_v27, %v6667_v49 }
 0x5c3   : > { %5261 = vrcp.f32 %v1746_v23 }
 0x5c4   : > { %5263 = vrcp.f32 %v1743_v58  ;;  %4755 = vmatmul.mubr.msk.bf16.vlgmr.msra.gmra.mrb[28].mxu1 %vm1626_vm4, %v1803_v57 }
 0x5c5   : > { %v5256_v32 = vpop.eup %5255  ;;  %4759 = vmatpush3.bf16.msra.mxu1 %v6466_v31  ;;  %4760 = vmatprep.mubr.msk.bf16.mxu1 %vm5715_vm0, %v5714_v59 }
 0x5c6   : > { %v1790_v1 = vmul.f32 %v5256_v32, %v6672_v16  ;;  %v1752_v24 = vpop.xlane.xlu1 %1751  ;;  %v1749_v62 = vpop.xlane.xlu0 %1748  ;;  %4764 = vmatprep.subr.bf16.mxu1 %v5714_v59 }
 0x5c7   : > { %5265 = vrcp.f32 %v1752_v24 }
 0x5c8   : > { %5267 = vrcp.f32 %v1749_v62  ;;  %v1804_v43 = vpack.c.bf16 %v1790_v1, %v1789_v51 }
 0x5c9   : > { %v5258_v34 = vpop.eup %5257 }
 0x5ca   : > { %v1758_v39 = vpop.xlane.xlu1 %1757  ;;  %v1755_v46 = vpop.xlane.xlu0 %1754  ;;  %v1792_v49 = vmul.f32 %v5258_v34, %v6677_v20 }
 0x5cb   : > { %v5260_v55 = vpop.eup %5259  ;;  %5269 = vrcp.f32 %v1758_v39 }
 0x5cc   : > { %5271 = vrcp.f32 %v1755_v46  ;;  %4761 = vmatmul.mubr.msk.bf16.vlgmr.msra.gmra.mrb[32].mxu1 %vm1626_vm4, %v1804_v43  ;;  %v1791_v52 = vmul.f32 %v5260_v55, %v6680_v22 }
 0x5cd   : > { %v5262_v60 = vpop.eup %5261  ;;  %4765 = vmatpush3.bf16.msra.mxu1 %v6472_v40  ;;  %4766 = vmatprep.mubr.msk.bf16.mxu1 %vm5715_vm0, %v5714_v59 }
 0x5ce   : > { %v5264_v16 = vpop.eup %5263  ;;  %v1794_v61 = vmul.f32 %v5262_v60, %v6686_v30  ;;  %4776 = vmatprep.subr.bf16.mxu1 %v5714_v59  ;;  %v1761_v11 = vpop.xlane.xlu0 %1760  ;;  %v1805_v13 = vpack.c.bf16 %v1792_v49, %v1791_v52 }
 0x5cf   : > { %v1793_v7 = vmul.f32 %v5264_v16, %v6689_v33 }
 0x5d0   : > { %v1764_v4 = vpop.xlane.xlu1 %1763 }
 0x5d1   : > { %5273 = vrcp.f32 %v1764_v4  ;;  %v1806_v44 = vpack.c.bf16 %v1794_v61, %v1793_v7  ;;  %v5266_v8 = vpop.eup %5265 }
 0x5d2   : > { %v5268_v14 = vpop.eup %5267  ;;  %5275 = vrcp.f32 %v1761_v11  ;;  %v1796_v30 = vmul.f32 %v5266_v8, %v6696_v41 }
 0x5d3   : > { %4773 = vmatmul.mubr.msk.bf16.vlgmr.msra.gmra.mrb[36].mxu0 %vm1626_vm4, %v1806_v44  ;;  %v1795_v33 = vmul.f32 %v5268_v14, %v6698_v18 }
 0x5d4   : > { %4783 = vmatpush3.bf16.msra.mxu0 %v6492_v25  ;;  %4767 = vmatmul.mubr.msk.bf16.vlgmr.msra.gmra.mrb[36].mxu1 %vm1626_vm4, %v1805_v13  ;;  %v2225_v21 = vpop.permute.xlu1 %2224 }
 0x5d5   : > { %v5270_v20 = vpop.eup %5269  ;;  %4777 = vmatpush3.bf16.msra.mxu1 %v6486_v56  ;;  %4784 = vmatprep.mubr.msk.bf16.mxu0 %vm5715_vm0, %v5714_v59  ;;  %v1807_v37 = vpack.c.bf16 %v1796_v30, %v1795_v33  ;;  %v2230_v34 = vsel %vm1228_vm1, %v2225_v21, 0 }
 0x5d6   : > { %v5272_v22 = vpop.eup %5271  ;;  %v1798_v45 = vmul.f32 %v5270_v20, %v6704_v63  ;;  %4794 = vmatprep.subr.bf16.mxu0 %v5714_v59  ;;  %4778 = vmatprep.mubr.msk.bf16.mxu1 %vm5715_vm0, %v5714_v59  ;;  %v1767_v0 = vpop.xlane.xlu0 %1766 }
 0x5d7   : > { %v1797_v15 = vmul.f32 %v5272_v22, %v6707_v5  ;;  %4788 = vmatprep.subr.bf16.mxu1 %v5714_v59  ;;  %5277 = vrcp.f32 %v1767_v0 }
 0x5d9   : > { %v1808_v36 = vpack.c.bf16 %v1798_v45, %v1797_v15 }
 0x5da   : > { %v2174_v5 = vpop.permute.xlu0 %2173 }
 0x5db   : > { %v5274_v54 = vpop.eup %5273  ;;  %4785 = vmatmul.mubr.msk.bf16.vlgmr.msra.gmra.mrb[40].mxu0 %vm1626_vm4, %v1808_v36  ;;  %v2179_v29 = vsel %vm1228_vm1, %v2174_v5, 0 }
 0x5dc   : > { %4795 = vmatpush3.bf16.msra.mxu0 %v6504_v2  ;;  %4779 = vmatmul.mubr.msk.bf16.vlgmr.msra.gmra.mrb[40].mxu1 %vm1626_vm4, %v1807_v37  ;;  %v5276_v41 = vpop.eup %5275  ;;  %v1800_v18 = vmul.f32 %v5274_v54, %v6717_v48 }
 0x5dd   : > { %4789 = vmatpush3.bf16.msra.mxu1 %v6498_v3  ;;  %4790 = vmatprep.mubr.msk.bf16.mxu1 %vm5715_vm0, %v5714_v59  ;;  %v1799_v63 = vmul.f32 %v5276_v41, %v6713_v35 }
 0x5de   : > { %4800 = vmatprep.subr.bf16.mxu1 %v5714_v59  ;;  %4796 = vmatprep.mubr.msk.bf16.mxu0 %vm5715_vm0, %v5714_v59  ;;  %v2276_v48 = vpop.permute.xlu0 %2275 }
 0x5df   : > { %4806 = vmatprep.subr.bf16.mxu0 %v5714_v59  ;;  %v1809_v38 = vpack.c.bf16 %v1800_v18, %v1799_v63  ;;  %v2281_v35 = vsel %vm1228_vm1, %v2276_v48, 0 }
 0x5e1   : > { %v5278_v58 = vpop.eup %5277 }
 0x5e2   : > { %v2274_v10 = vpop.permute.xlu0 %2273  ;;  %v1801_v27 = vmul.f32 %v5278_v58, %v6721_v12 }
 0x5e4   : > { %4791 = vmatmul.mubr.msk.bf16.vlgmr.msra.gmra.mrb[44].mxu1 %vm1626_vm4, %v1809_v38 }
 0x5e5   : > { %4802 = vmatprep.mubr.msk.bf16.mxu1 %vm5715_vm0, %v5714_v59 }
 0x5e6   : > { %4801 = vmatpush3.bf16.xpose.msra.mxu1 %v2179_v29  ;;  %v2378_v26 = vpop.permute.xlu0 %2377 }
 0x5e7   : > { %4812 = vmatprep.subr.bf16.mxu1 %v5714_v59  ;;  %v2383_v24 = vsel %vm1228_vm1, %v2378_v26, 0 }
 0x5ea   : > { %v2376_v32 = vpop.permute.xlu0 %2375 }
 0x5ee   : > { %v2480_v12 = vpop.permute.xlu0 %2479 }
 0x5ef   : > { %v2485_v39 = vsel %vm1228_vm1, %v2480_v12, 0 }
 0x5f2   : > { %v2478_v55 = vpop.permute.xlu0 %2477 }
 0x605   : > { %v1770_v42 = vpop.xlane.xlu1 %1769 }
 0x606   : > { %5279 = vrcp.f32 %v1770_v42 }
 0x609   : > { %v2172_v47 = vpop.permute.xlu1 %2171 }
 0x60a   : > { %4803 = vmatmul.mubr.msk.bf16.vlgmr.msra.gmra.mrb[48].mxu1 %vm1228_vm1, %v2172_v47 }
 0x60b   : > { %4813 = vmatpush3.bf16.xpose.msra.mxu1 %v2281_v35  ;;  %4814 = vmatprep.mubr.msk.bf16.mxu1 %vm5715_vm0, %v5714_v59 }
 0x60c   : > { %4824 = vmatprep.subr.bf16.mxu1 %v5714_v59 }
 0x60d   : > { %v2223_v23 = vpop.permute.xlu1 %2222 }
 0x610   : > { %v5280_v57 = vpop.eup %5279 }
 0x611   : > { %v1802_v1 = vmul.f32 %v5280_v57, %v6733_v19  ;;  %v2327_v62 = vpop.permute.xlu1 %2326 }
 0x612   : > { %4815 = vmatmul.mubr.msk.bf16.vlgmr.msra.gmra.mrb[52].mxu1 %vm1228_vm1, %v2274_v10  ;;  %v2332_v46 = vsel %vm1228_vm1, %v2327_v62, 0 }
 0x613   : > { %4825 = vmatpush3.bf16.xpose.msra.mxu1 %v2383_v24  ;;  %v1810_v51 = vpack.c.bf16 %v1802_v1, %v1801_v27  ;;  %4826 = vmatprep.mubr.msk.bf16.mxu1 %vm5715_vm0, %v5714_v59 }
 0x614   : > { %4836 = vmatprep.subr.bf16.mxu1 %v5714_v59 }
 0x615   : > { %4797 = vmatmul.mubr.msk.bf16.vlgmr.msra.gmra.mrb[44].mxu0 %vm1626_vm4, %v1810_v51  ;;  %v2325_v19 = vpop.permute.xlu1 %2324 }
 0x616   : > { %4807 = vmatpush3.bf16.xpose.msra.mxu0 %v2230_v34  ;;  %4808 = vmatprep.mubr.msk.bf16.mxu0 %vm5715_vm0, %v5714_v59 }
 0x617   : > { %4818 = vmatprep.subr.bf16.mxu0 %v5714_v59 }
 0x619   : > { %v2429_v43 = vpop.permute.xlu1 %2428 }
 0x61a   : > { %4827 = vmatmul.mubr.msk.bf16.vlgmr.msra.gmra.mrb[56].mxu1 %vm1228_vm1, %v2376_v32  ;;  %v2434_v16 = vsel %vm1228_vm1, %v2429_v43, 0 }
 0x61b   : > { %4837 = vmatpush3.bf16.xpose.msra.mxu1 %v2485_v39  ;;  %4838 = vmatprep.mubr.msk.bf16.mxu1 %vm5715_vm0, %v5714_v59 }
 0x61c   : > { %4848 = vmatprep.subr.bf16.mxu1 %v5714_v59 }
 0x61d   : > { %4809 = vmatmul.mubr.msk.bf16.vlgmr.msra.gmra.mrb[48].mxu0 %vm1228_vm1, %v2223_v23  ;;  %v2427_v60 = vpop.permute.xlu1 %2426 }
 0x61e   : > { %4819 = vmatpush3.bf16.xpose.msra.mxu0 %v2332_v46  ;;  %4820 = vmatprep.mubr.msk.bf16.mxu0 %vm5715_vm0, %v5714_v59 }
 0x61f   : > { %4830 = vmatprep.subr.bf16.mxu0 %v5714_v59 }
 0x621   : > { %v2531_v49 = vpop.permute.xlu1 %2530 }
 0x622   : > { %4839 = vmatmul.mubr.msk.bf16.vlgmr.msra.gmra.mrb[60].mxu1 %vm1228_vm1, %v2478_v55  ;;  %v2536_v52 = vsel %vm1228_vm1, %v2531_v49, 0 }
 0x623   : > { %4850 = vmatprep.mubr.msk.bf16.mxu1 %vm5715_vm0, %v5714_v59 }
 0x625   : > { %4821 = vmatmul.mubr.msk.bf16.vlgmr.msra.gmra.mrb[52].mxu0 %vm1228_vm1, %v2325_v19  ;;  %v2529_v61 = vpop.permute.xlu1 %2528 }
 0x626   : > { %4831 = vmatpush3.bf16.xpose.msra.mxu0 %v2434_v16  ;;  %4832 = vmatprep.mubr.msk.bf16.mxu0 %vm5715_vm0, %v5714_v59 }
 0x627   : > { %4842 = vmatprep.subr.bf16.mxu0 %v5714_v59 }
 0x62d   : > { %4833 = vmatmul.mubr.msk.bf16.vlgmr.msra.gmra.mrb[56].mxu0 %vm1228_vm1, %v2427_v60 }
 0x62e   : > { %4843 = vmatpush3.bf16.xpose.msra.mxu0 %v2536_v52  ;;  %4844 = vmatprep.mubr.msk.bf16.mxu0 %vm5715_vm0, %v5714_v59 }
 0x62f   : > { %4854 = vmatprep.subr.bf16.mxu0 %v5714_v59 }
 0x635   : > { %4845 = vmatmul.mubr.msk.bf16.vlgmr.msra.gmra.mrb[60].mxu0 %vm1228_vm1, %v2529_v61 }
 0x636   : > { %4856 = vmatprep.mubr.msk.bf16.mxu0 %vm5715_vm0, %v5714_v59 }
 0x697   : > { %v6838_v7 = vpop.f32.mrb[28].mxu1 }
 0x698   : > { %v4756_v11 = vpop.f32.mrb[29].mxu1 }
 0x699   : > { %v6840_v4 = vpop.f32.mrb[30].mxu1 }
 0x69a   : > { %v4757_v44 = vpop.f32.mrb[31].mxu1 }
 0x69f   : > { %v6842_v8 = vpop.f32.mrb[32].mxu1 }
 0x6a0   : > { %v4762_v13 = vpop.f32.mrb[33].mxu1 }
 0x6a1   : > { %v6844_v14 = vpop.f32.mrb[34].mxu1 }
 0x6a2   : > { %v4763_v20 = vpop.f32.mrb[35].mxu1 }
 0x6a6   : > { %v6846_v22 = vpop.f32.mrb[36].mxu0 }
 0x6a7   : > { %v4774_v30 = vpop.f32.mrb[37].mxu0  ;;  %v6848_v33 = vpop.f32.mrb[36].mxu1 }
 0x6a8   : > { %v6850_v45 = vpop.f32.mrb[38].mxu0  ;;  %v4768_v15 = vpop.f32.mrb[37].mxu1 }
 0x6a9   : > { %v4775_v36 = vpop.f32.mrb[39].mxu0  ;;  %v6852_v37 = vpop.f32.mrb[38].mxu1 }
 0x6aa   : > { %v4769_v54 = vpop.f32.mrb[39].mxu1 }
 0x6ae   : > { %v6854_v0 = vpop.f32.mrb[40].mxu0 }
 0x6af   : > { %v4786_v41 = vpop.f32.mrb[41].mxu0  ;;  %v6856_v18 = vpop.f32.mrb[40].mxu1 }
 0x6b0   : > { %v6858_v63 = vpop.f32.mrb[42].mxu0  ;;  %v4780_v5 = vpop.f32.mrb[41].mxu1 }
 0x6b1   : > { %v4787_v38 = vpop.f32.mrb[43].mxu0  ;;  %v6860_v29 = vpop.f32.mrb[42].mxu1 }
 0x6b2   : > { %v4781_v48 = vpop.f32.mrb[43].mxu1 }
 0x6b7   : > { %v6862_v21 = vpop.f32.mrb[44].mxu1 }
 0x6b8   : > { %v4792_v10 = vpop.f32.mrb[45].mxu1 }
 0x6b9   : > { %v6864_v42 = vpop.f32.mrb[46].mxu1 }
 0x6ba   : > { %v4793_v47 = vpop.f32.mrb[47].mxu1 }
 0x6dd   : > { %v2215_v35 = vpop.f32.mrb[48].mxu1 }
 0x6de   : > { %v6867_v26 = vadd.f32 %v2215_v35, %v6565_v17  ;;  %v4804_v23 = vpop.f32.mrb[49].mxu1 }
 0x6df   : > { %v2218_v58 = vpop.f32.mrb[50].mxu1 }
 0x6e0   : > { %v6870_v57 = vadd.f32 %v2218_v58, %v6571_v53  ;;  %v4805_v27 = vpop.f32.mrb[51].mxu1  ;;  %v2579_v32 = vsel %vm1626_vm4, %v6867_v26, -inf }
 0x6e1   : > { %2580 = vmax.xlane.f32.xlu0 %v2579_v32 }
 0x6e2   : > { %v2582_v1 = vsel %vm1626_vm4, %v6870_v57, -inf }
 0x6e3   : > { %2583 = vmax.xlane.f32.xlu1 %v2582_v1 }
 0x6e5   : > { %v2317_v24 = vpop.f32.mrb[52].mxu1 }
 0x6e6   : > { %v4816_v62 = vpop.f32.mrb[53].mxu1  ;;  %v6889_v20 = vadd.f32 %v2317_v24, %v6565_v17 }
 0x6e7   : > { %v2320_v51 = vpop.f32.mrb[54].mxu1 }
 0x6e8   : > { %v6877_v34 = vadd.f32 %v2320_v51, %v6571_v53  ;;  %v6879_v12 = vpop.f32.mrb[44].mxu0  ;;  %v4817_v19 = vpop.f32.mrb[55].mxu1  ;;  %v2591_v38 = vsel %vm1626_vm4, %v6889_v20, -inf }
 0x6e9   : > { %v4798_v39 = vpop.f32.mrb[45].mxu0 }
 0x6ea   : > { %v6881_v46 = vpop.f32.mrb[46].mxu0  ;;  %v2594_v43 = vsel %vm1626_vm4, %v6877_v34, -inf }
 0x6eb   : > { %v4799_v55 = vpop.f32.mrb[47].mxu0  ;;  %2595 = vmax.xlane.f32.xlu1 %v2594_v43 }
 0x6ed   : > { %v2419_v60 = vpop.f32.mrb[56].mxu1 }
 0x6ee   : > { %v4828_v16 = vpop.f32.mrb[57].mxu1 }
 0x6ef   : > { %v2422_v49 = vpop.f32.mrb[58].mxu1 }
 0x6f0   : > { %v2266_v52 = vpop.f32.mrb[48].mxu0  ;;  %v4829_v61 = vpop.f32.mrb[59].mxu1 }
 0x6f1   : > { %v6886_v11 = vadd.f32 %v2266_v52, %v6565_v17  ;;  %v4810_v44 = vpop.f32.mrb[49].mxu0 }
 0x6f2   : > { %v2269_v13 = vpop.f32.mrb[50].mxu0 }
 0x6f3   : > { %v4811_v30 = vpop.f32.mrb[51].mxu0  ;;  %v2585_v15 = vsel %vm1626_vm4, %v6886_v11, -inf  ;;  %v6894_v41 = vadd.f32 %v2269_v13, %v6571_v53 }
 0x6f4   : > { %2586 = vmax.xlane.f32.xlu0 %v2585_v15 }
 0x6f5   : > { %v2521_v36 = vpop.f32.mrb[60].mxu1  ;;  %v2588_v27 = vsel %vm1626_vm4, %v6894_v41, -inf }
 0x6f6   : > { %v4840_v54 = vpop.f32.mrb[61].mxu1 }
 0x6f7   : > { %v2524_v5 = vpop.f32.mrb[62].mxu1  ;;  %v6935_v54 = vadd.f32 %v2419_v60, %v6565_v17 }
 0x6f8   : > { %v2368_v48 = vpop.f32.mrb[52].mxu0  ;;  %2592 = vmax.xlane.f32.xlu0 %v2591_v38  ;;  %v4841_v10 = vpop.f32.mrb[63].mxu1  ;;  %v6923_v13 = vadd.f32 %v2524_v5, %v6571_v53 }
 0x6f9   : > { %v4822_v47 = vpop.f32.mrb[53].mxu0  ;;  %v6899_v23 = vadd.f32 %v2368_v48, %v6565_v17  ;;  %v2603_v38 = vsel %vm1626_vm4, %v6935_v54, -inf }
 0x6fa   : > { %v2371_v35 = vpop.f32.mrb[54].mxu0  ;;  %v2618_v30 = vsel %vm1626_vm4, %v6923_v13, -inf }
 0x6fb   : > { %v4823_v58 = vpop.f32.mrb[55].mxu0  ;;  %v2597_v32 = vsel %vm1626_vm4, %v6899_v23, -inf  ;;  %v6910_v16 = vadd.f32 %v2371_v35, %v6571_v53 }
 0x6fc   : > { %2589 = vmax.xlane.f32.xlu0 %v2588_v27  ;;  %2812 = vrot.lane.b32.xlu1 %v6466_v31, %s5716_s30  ;;  %v6913_v31 = vadd.f32 %v2422_v49, %v6571_v53 }
 0x6fd   : > { %v2600_v52 = vsel %vm1626_vm4, %v6910_v16, -inf }
 0x6fe   : > { %v2606_v44 = vsel %vm1626_vm4, %v6913_v31, -inf }
 0x700   : > { %v2470_v1 = vpop.f32.mrb[56].mxu0  ;;  %2598 = vmax.xlane.f32.xlu0 %v2597_v32 }
 0x701   : > { %v4834_v24 = vpop.f32.mrb[57].mxu0  ;;  %v6938_v5 = vadd.f32 %v2470_v1, %v6565_v17 }
 0x702   : > { %v2473_v62 = vpop.f32.mrb[58].mxu0 }
 0x703   : > { %v4835_v51 = vpop.f32.mrb[59].mxu0  ;;  %v6918_v61 = vadd.f32 %v2473_v62, %v6571_v53  ;;  %v2609_v48 = vsel %vm1626_vm4, %v6938_v5, -inf }
 0x708   : > { %v2572_v19 = vpop.f32.mrb[60].mxu0 }
 0x709   : > { %v4846_v39 = vpop.f32.mrb[61].mxu0  ;;  %v6948_v10 = vadd.f32 %v2572_v19, %v6565_v17 }
 0x70a   : > { %v2575_v43 = vpop.f32.mrb[62].mxu0 }
 0x70b   : > { %v4847_v55 = vpop.f32.mrb[63].mxu0  ;;  %v6928_v49 = vadd.f32 %v2575_v43, %v6571_v53  ;;  %v6943_v53 = vadd.f32 %v2521_v36, %v6565_v17  ;;  %v2621_v47 = vsel %vm1626_vm4, %v6948_v10, -inf }
 0x70d   : > { %v2624_v15 = vsel %vm1626_vm4, %v6928_v49, -inf  ;;  %v2615_v60 = vsel %vm1626_vm4, %v6943_v53, -inf }
 0x716   : > { %2764 = vrot.lane.b32.xlu0 %v6462_v9, %s5716_s30  ;;  %v2612_v9 = vsel %vm1626_vm4, %v6918_v61, -inf }
 0x720   : > { %2601 = vmax.xlane.f32.xlu1 %v2600_v52 }
 0x724   : > { %2607 = vmax.xlane.f32.xlu1 %v2606_v44 }
 0x728   : > { %2613 = vmax.xlane.f32.xlu1 %v2612_v9 }
 0x72c   : > { %2619 = vmax.xlane.f32.xlu1 %v2618_v30 }
 0x730   : > { %2625 = vmax.xlane.f32.xlu1 %v2624_v15 }
 0x735   : > { %2604 = vmax.xlane.f32.xlu0 %v2603_v38 }
 0x739   : > { %2610 = vmax.xlane.f32.xlu0 %v2609_v48 }
 0x73d   : > { %2616 = vmax.xlane.f32.xlu0 %v2615_v60 }
 0x741   : > { %2622 = vmax.xlane.f32.xlu0 %v2621_v47 }
 0x76e   : > { %v2581_v35 = vpop.xlane.xlu0 %2580 }
 0x76f   : > { %v2627_v58 = vsub.f32 %v6867_v26, %v2581_v35 }
 0x770   : > { %v2584_v36 = vpop.xlane.xlu1 %2583 }
 0x771   : > { %v2643_v27 = vmul.f32 1.442695, %v2627_v58  ;;  %v2628_v32 = vsub.f32 %v6870_v57, %v2584_v36 }
 0x773   : > { %5281 = vpow2.f32 %v2643_v27  ;;  %v2645_v1 = vmul.f32 1.442695, %v2628_v32 }
 0x775   : > { %5283 = vpow2.f32 %v2645_v1 }
 0x778   : > { %v2596_v17 = vpop.xlane.xlu1 %2595 }
 0x779   : > { %v2632_v38 = vsub.f32 %v6877_v34, %v2596_v17 }
 0x77b   : > { %v2653_v60 = vmul.f32 1.442695, %v2632_v38 }
 0x77c   : > { %v2813_v24 = vpop.permute.xlu1 %2812 }
 0x77d   : > { %v6956_v62 = vpop.eup %5281  ;;  %4855 = vmatpush3.bf16.msra.mxu0 %v2813_v24 }
 0x77e   : > { %v2675_v51 = vsel %vm1626_vm4, %v6956_v62, 0.0  ;;  %4866 = vmatprep.subr.bf16.mxu0 %v5714_v59 }
 0x77f   : > { %v6961_v19 = vpop.eup %5283  ;;  %2676 = vadd.xlane.f32.xlu0 %v2675_v51 }
 0x780   : > { %v2678_v26 = vsel %vm1626_vm4, %v6961_v19, 0.0 }
 0x781   : > { %2679 = vadd.xlane.f32.xlu1 %v2678_v26  ;;  %v2587_v57 = vpop.xlane.xlu0 %2586 }
 0x782   : > { %v2629_v39 = vsub.f32 %v6886_v11, %v2587_v57 }
 0x784   : > { %v2647_v43 = vmul.f32 1.442695, %v2629_v39 }
 0x785   : > { %v2593_v55 = vpop.xlane.xlu0 %2592 }
 0x786   : > { %5285 = vpow2.f32 %v2647_v43  ;;  %v2631_v35 = vsub.f32 %v6889_v20, %v2593_v55 }
 0x789   : > { %v2590_v52 = vpop.xlane.xlu0 %2589 }
 0x78a   : > { %v2630_v11 = vsub.f32 %v6894_v41, %v2590_v52 }
 0x78c   : > { %v2649_v48 = vmul.f32 1.442695, %v2630_v11 }
 0x78d   : > { %v2599_v44 = vpop.xlane.xlu0 %2598 }
 0x78e   : > { %5287 = vpow2.f32 %v2649_v48  ;;  %v2633_v36 = vsub.f32 %v6899_v23, %v2599_v44 }
 0x78f   : > { %5289 = vpow2.f32 %v2653_v60 }
 0x790   : > { %v6966_v9 = vpop.eup %5285  ;;  %v2655_v32 = vmul.f32 1.442695, %v2633_v36 }
 0x791   : > { %v2765_v30 = vpop.permute.xlu0 %2764  ;;  %v2681_v15 = vsel %vm1626_vm4, %v6966_v9, 0.0 }
 0x792   : > { %2908 = vrot.lane.b32.xlu1 %v6480_v50, %s5716_s30  ;;  %2682 = vadd.xlane.f32.xlu0 %v2681_v15  ;;  %v2651_v50 = vmul.f32 1.442695, %v2631_v35 }
 0x793   : > { %4849 = vmatpush3.bf16.msra.mxu1 %v2765_v30 }
 0x794   : > { %4860 = vmatprep.subr.bf16.mxu1 %v5714_v59  ;;  %5291 = vpow2.f32 %v2651_v50 }
 0x795   : > { %5293 = vpow2.f32 %v2655_v32 }
 0x798   : > { %v6978_v58 = vpop.eup %5287 }
 0x799   : > { %v2684_v41 = vsel %vm1626_vm4, %v6978_v58, 0.0  ;;  %v6983_v27 = vpop.eup %5289 }
 0x79a   : > { %v2690_v1 = vsel %vm1626_vm4, %v6983_v27, 0.0 }
 0x79e   : > { %v6989_v26 = vpop.eup %5291 }
 0x79f   : > { %v2687_v52 = vsel %vm1626_vm4, %v6989_v26, 0.0  ;;  %v6995_v44 = vpop.eup %5293 }
 0x7a8   : > { %2860 = vrot.lane.b32.xlu0 %v6472_v40, %s5716_s30 }
 0x7ad   : > { %v2602_v47 = vpop.xlane.xlu1 %2601 }
 0x7ae   : > { %v2634_v23 = vsub.f32 %v6910_v16, %v2602_v47 }
 0x7b0   : > { %v2657_v39 = vmul.f32 1.442695, %v2634_v23 }
 0x7b1   : > { %v2608_v34 = vpop.xlane.xlu1 %2607 }
 0x7b2   : > { %v2636_v40 = vsub.f32 %v6913_v31, %v2608_v34 }
 0x7b4   : > { %v2661_v17 = vmul.f32 1.442695, %v2636_v40 }
 0x7b5   : > { %v2614_v20 = vpop.xlane.xlu1 %2613 }
 0x7b6   : > { %2685 = vadd.xlane.f32.xlu1 %v2684_v41  ;;  %5295 = vpow2.f32 %v2661_v17  ;;  %v2638_v30 = vsub.f32 %v6918_v61, %v2614_v20 }
 0x7b8   : > { %v2665_v60 = vmul.f32 1.442695, %v2638_v30 }
 0x7b9   : > { %v2620_v24 = vpop.xlane.xlu1 %2619 }
 0x7ba   : > { %2691 = vadd.xlane.f32.xlu1 %v2690_v1  ;;  %v2640_v43 = vsub.f32 %v6923_v13, %v2620_v24  ;;  %v2693_v13 = vsel %vm1626_vm4, %v6995_v44, 0.0 }
 0x7bc   : > { %v2669_v15 = vmul.f32 1.442695, %v2640_v43 }
 0x7c0   : > { %v7001_v38 = vpop.eup %5295 }
 0x7c1   : > { %v2702_v35 = vsel %vm1626_vm4, %v7001_v38, 0.0 }
 0x7c2   : > { %v2605_v51 = vpop.xlane.xlu0 %2604 }
 0x7c3   : > { %v2635_v57 = vsub.f32 %v6935_v54, %v2605_v51 }
 0x7c5   : > { %v2659_v31 = vmul.f32 1.442695, %v2635_v57 }
 0x7c6   : > { %v2611_v55 = vpop.xlane.xlu0 %2610 }
 0x7c7   : > { %5297 = vpow2.f32 %v2659_v31  ;;  %v2637_v16 = vsub.f32 %v6938_v5, %v2611_v55  ;;  %2688 = vadd.xlane.f32.xlu0 %v2687_v52 }
 0x7c8   : > { %5299 = vpow2.f32 %v2657_v39  ;;  %v2626_v39 = vpop.xlane.xlu1 %2625 }
 0x7c9   : > { %v2663_v11 = vmul.f32 1.442695, %v2637_v16  ;;  %v2642_v43 = vsub.f32 %v6928_v49, %v2626_v39 }
 0x7ca   : > { %v2617_v54 = vpop.xlane.xlu0 %2616 }
 0x7cb   : > { %5301 = vpow2.f32 %v2663_v11  ;;  %v2639_v48 = vsub.f32 %v6943_v53, %v2617_v54  ;;  %2694 = vadd.xlane.f32.xlu0 %v2693_v13  ;;  %v2673_v31 = vmul.f32 1.442695, %v2642_v43 }
 0x7cc   : > { %5303 = vpow2.f32 %v2669_v15 }
 0x7cd   : > { %v2667_v47 = vmul.f32 1.442695, %v2639_v48 }
 0x7ce   : > { %v2623_v5 = vpop.xlane.xlu0 %2622 }
 0x7cf   : > { %5305 = vpow2.f32 %v2667_v47  ;;  %v2641_v61 = vsub.f32 %v6948_v10, %v2623_v5  ;;  %2703 = vadd.xlane.f32.xlu0 %v2702_v35 }
 0x7d0   : > { %5307 = vpow2.f32 %v2665_v60 }
 0x7d1   : > { %v7007_v50 = vpop.eup %5297  ;;  %v2671_v36 = vmul.f32 1.442695, %v2641_v61 }
 0x7d2   : > { %v2699_v41 = vsel %vm1626_vm4, %v7007_v50, 0.0  ;;  %v7011_v53 = vpop.eup %5299 }
 0x7d3   : > { %5309 = vpow2.f32 %v2671_v36  ;;  %2700 = vadd.xlane.f32.xlu1 %v2699_v41  ;;  %v2696_v32 = vsel %vm1626_vm4, %v7011_v53, 0.0 }
 0x7d4   : > { %5311 = vpow2.f32 %v2673_v31 }
 0x7d5   : > { %v7013_v34 = vpop.eup %5301 }
 0x7d6   : > { %v2705_v10 = vsel %vm1626_vm4, %v7013_v34, 0.0  ;;  %v7019_v40 = vpop.eup %5303 }
 0x7d7   : > { %2697 = vadd.xlane.f32.xlu1 %v2696_v32  ;;  %2706 = vadd.xlane.f32.xlu0 %v2705_v10  ;;  %v2714_v20 = vsel %vm1626_vm4, %v7019_v40, 0.0 }
 0x7d9   : > { %v7021_v1 = vpop.eup %5305 }
 0x7da   : > { %v2711_v17 = vsel %vm1626_vm4, %v7021_v1, 0.0  ;;  %v7027_v23 = vpop.eup %5307 }
 0x7db   : > { %2715 = vadd.xlane.f32.xlu0 %v2714_v20  ;;  %2712 = vadd.xlane.f32.xlu1 %v2711_v17  ;;  %v2708_v51 = vsel %vm1626_vm4, %v7027_v23, 0.0 }
 0x7dd   : > { %v7029_v24 = vpop.eup %5309 }
 0x7de   : > { %v2717_v57 = vsel %vm1626_vm4, %v7029_v24, 0.0  ;;  %v7042_v16 = vpop.eup %5311 }
 0x7df   : > { %2709 = vadd.xlane.f32.xlu1 %v2708_v51  ;;  %2718 = vadd.xlane.f32.xlu0 %v2717_v57 }
 0x7f0   : > { %3004 = vrot.lane.b32.xlu1 %v6492_v25, %s5716_s30  ;;  %v2720_v25 = vsel %vm1626_vm4, %v7042_v16, 0.0 }
 0x7f4   : > { %3052 = vrot.lane.b32.xlu1 %v6498_v3, %s5716_s30 }
 0x7f5   : > { %2956 = vrot.lane.b32.xlu0 %v6486_v56, %s5716_s30 }
 0x80c   : > { %v2677_v55 = vpop.xlane.xlu0 %2676 }
 0x80d   : > { %5313 = vrcp.f32 %v2677_v55 }
 0x80e   : > { %v2680_v52 = vpop.xlane.xlu1 %2679 }
 0x80f   : > { %5315 = vrcp.f32 %v2680_v52 }
 0x812   : > { %v2909_v13 = vpop.permute.xlu1 %2908 }
 0x817   : > { %v5314_v30 = vpop.eup %5313 }
 0x818   : > { %2721 = vadd.xlane.f32.xlu1 %v2720_v25  ;;  %v2739_v15 = vmul.f32 %v5314_v30, %v6956_v62 }
 0x819   : > { %v5316_v3 = vpop.eup %5315 }
 0x81a   : > { %v2740_v56 = vmul.f32 %v5316_v3, %v6961_v19 }
 0x81c   : > { %v2755_v11 = vpack.c.bf16 %v2740_v56, %v2739_v15 }
 0x81e   : > { %4851 = vmatmul.mubr.msk.bf16.vlgmr.msra.gmra.mrb[64].mxu1 %vm1626_vm4, %v2755_v11 }
 0x81f   : > { %v2683_v49 = vpop.xlane.xlu0 %2682  ;;  %4862 = vmatprep.mubr.msk.bf16.mxu1 %vm5715_vm0, %v5714_v59 }
 0x820   : > { %5317 = vrcp.f32 %v2683_v49 }
 0x823   : > { %v2861_v54 = vpop.permute.xlu0 %2860 }
 0x824   : > { %4861 = vmatpush3.bf16.msra.mxu1 %v2861_v54 }
 0x825   : > { %4872 = vmatprep.subr.bf16.mxu1 %v5714_v59 }
 0x829   : > { %3100 = vrot.lane.b32.xlu1 %v6504_v2, %s5716_s30 }
 0x82a   : > { %v5318_v62 = vpop.eup %5317 }
 0x82b   : > { %v2741_v60 = vmul.f32 %v5318_v62, %v6966_v9 }
 0x843   : > { %v2686_v48 = vpop.xlane.xlu1 %2685 }
 0x844   : > { %5319 = vrcp.f32 %v2686_v48 }
 0x847   : > { %v2692_v5 = vpop.xlane.xlu1 %2691 }
 0x848   : > { %5321 = vrcp.f32 %v2692_v5 }
 0x84e   : > { %v5320_v19 = vpop.eup %5319 }
 0x84f   : > { %v2742_v47 = vmul.f32 %v5320_v19, %v6978_v58 }
 0x851   : > { %v2756_v35 = vpack.c.bf16 %v2742_v47, %v2741_v60 }
 0x852   : > { %v5322_v36 = vpop.eup %5321 }
 0x853   : > { %4857 = vmatmul.mubr.msk.bf16.vlgmr.msra.gmra.mrb[64].mxu0 %vm1626_vm4, %v2756_v35  ;;  %v2744_v9 = vmul.f32 %v5322_v36, %v6983_v27  ;;  %v5137_v36 = vld [vmem:[%s6215_s17] sm:$0xff]  }
 0x854   : > { %4867 = vmatpush3.bf16.msra.mxu0 %v2909_v13  ;;  %v2689_v61 = vpop.xlane.xlu0 %2688  ;;  %4868 = vmatprep.mubr.msk.bf16.mxu0 %vm5715_vm0, %v5714_v59 }
 0x855   : > { %5323 = vrcp.f32 %v2689_v61  ;;  %4878 = vmatprep.subr.bf16.mxu0 %v5714_v59 }
 0x858   : > { %v2695_v2 = vpop.xlane.xlu0 %2694 }
 0x85c   : > { %v2704_v32 = vpop.xlane.xlu0 %2703 }
 0x85f   : > { %v5324_v41 = vpop.eup %5323 }
 0x860   : > { %v2743_v58 = vmul.f32 %v5324_v41, %v6989_v26  ;;  %v2701_v10 = vpop.xlane.xlu1 %2700 }
 0x861   : > { %5325 = vrcp.f32 %v2701_v10  ;;  %v5140_v10 = vld [vmem:[%s6215_s17 + $0x18] sm:$0xff]  }
 0x862   : > { %5327 = vrcp.f32 %v2695_v2  ;;  %v2757_v20 = vpack.c.bf16 %v2744_v9, %v2743_v58 }
 0x863   : > { %5329 = vrcp.f32 %v2704_v32  ;;  %v5139_v32 = vld [vmem:[%s6215_s17 + $0x10] sm:$0xff]  }
 0x864   : > { %v2698_v17 = vpop.xlane.xlu1 %2697  ;;  %4863 = vmatmul.mubr.msk.bf16.vlgmr.msra.gmra.mrb[68].mxu1 %vm1626_vm4, %v2757_v20  ;;  %v2707_v51 = vpop.xlane.xlu0 %2706  ;;  %v5141_v20 = vld [vmem:[%s6215_s17 + $0x20] sm:$0xff]  }
 0x865   : > { %5331 = vrcp.f32 %v2698_v17  ;;  %4874 = vmatprep.mubr.msk.bf16.mxu1 %vm5715_vm0, %v5714_v59  ;;  %v5142_v17 = vld [vmem:[%s6215_s17 + $0x28] sm:$0xff]  }
 0x868   : > { %v2713_v57 = vpop.xlane.xlu1 %2712  ;;  %v2716_v39 = vpop.xlane.xlu0 %2715 }
 0x869   : > { %5333 = vrcp.f32 %v2713_v57  ;;  %v5144_v57 = vld [vmem:[%s6215_s17 + $0x38] sm:$0xff]  }
 0x86a   : > { %5335 = vrcp.f32 %v2716_v39 }
 0x86b   : > { %v5326_v27 = vpop.eup %5325  ;;  %5337 = vrcp.f32 %v2707_v51  ;;  %v5143_v51 = vld [vmem:[%s6215_s17 + $0x30] sm:$0xff]  }
 0x86c   : > { %v5328_v26 = vpop.eup %5327  ;;  %v2710_v43 = vpop.xlane.xlu1 %2709  ;;  %v2747_v52 = vmul.f32 %v5326_v27, %v7007_v50 }
 0x86d   : > { %v2719_v31 = vpop.xlane.xlu0 %2718  ;;  %v5330_v55 = vpop.eup %5329  ;;  %5339 = vrcp.f32 %v2710_v43  ;;  %v2745_v25 = vmul.f32 %v5328_v26, %v6995_v44 }
 0x86e   : > { %v2748_v3 = vmul.f32 %v5330_v55, %v7001_v38  ;;  %5341 = vrcp.f32 %v2719_v31 }
 0x86f   : > { %v5332_v30 = vpop.eup %5331 }
 0x870   : > { %v2746_v15 = vmul.f32 %v5332_v30, %v7011_v53  ;;  %v3005_v56 = vpop.permute.xlu1 %3004  ;;  %v2759_v54 = vpack.c.bf16 %v2748_v3, %v2747_v52 }
 0x871   : > { %v2957_v11 = vpop.permute.xlu0 %2956 }
 0x872   : > { %4873 = vmatpush3.bf16.msra.mxu1 %v2957_v11  ;;  %v2758_v49 = vpack.c.bf16 %v2746_v15, %v2745_v25 }
 0x873   : > { %4884 = vmatprep.subr.bf16.mxu1 %v5714_v59  ;;  %v5334_v13 = vpop.eup %5333 }
 0x874   : > { %v5336_v48 = vpop.eup %5335  ;;  %v3053_v62 = vpop.permute.xlu1 %3052  ;;  %4869 = vmatmul.mubr.msk.bf16.vlgmr.msra.gmra.mrb[68].mxu0 %vm1626_vm4, %v2758_v49  ;;  %v2751_v44 = vmul.f32 %v5334_v13, %v7021_v1 }
 0x875   : > { %4875 = vmatmul.mubr.msk.bf16.vlgmr.msra.gmra.mrb[72].mxu1 %vm1626_vm4, %v2759_v54  ;;  %v5338_v50 = vpop.eup %5337  ;;  %4879 = vmatpush3.bf16.msra.mxu0 %v3005_v56  ;;  %v2752_v38 = vmul.f32 %v5336_v48, %v7019_v40 }
 0x876   : > { %4885 = vmatpush3.bf16.msra.mxu1 %v3053_v62  ;;  %4880 = vmatprep.mubr.msk.bf16.mxu0 %vm5715_vm0, %v5714_v59  ;;  %v2749_v19 = vmul.f32 %v5338_v50, %v7013_v34 }
 0x877   : > { %4886 = vmatprep.mubr.msk.bf16.mxu1 %vm5715_vm0, %v5714_v59  ;;  %v5340_v53 = vpop.eup %5339  ;;  %4890 = vmatprep.subr.bf16.mxu0 %v5714_v59  ;;  %v2761_v5 = vpack.c.bf16 %v2752_v38, %v2751_v44 }
 0x878   : > { %v2750_v60 = vmul.f32 %v5340_v53, %v7027_v23  ;;  %v5342_v35 = vpop.eup %5341  ;;  %4896 = vmatprep.subr.bf16.mxu1 %v5137_v36 }
 0x879   : > { %v2753_v23 = vmul.f32 %v5342_v35, %v7029_v24 }
 0x87a   : > { %v2760_v47 = vpack.c.bf16 %v2750_v60, %v2749_v19 }
 0x87c   : > { %4881 = vmatmul.mubr.msk.bf16.vlgmr.msra.gmra.mrb[72].mxu0 %vm1626_vm4, %v2760_v47 }
 0x87d   : > { %4887 = vmatmul.mubr.msk.bf16.vlgmr.msra.gmra.mrb[76].mxu1 %vm1626_vm4, %v2761_v5  ;;  %4892 = vmatprep.mubr.msk.bf16.mxu0 %vm5715_vm0, %v5714_v59  ;;  %v5138_v59 = vld [vmem:[%s6215_s17 + $0x8] sm:$0xff]  }
 0x87e   : > { %4897 = vmatpush3.bf16.msra.mxu1 %v5137_v36 }
 0x87f   : > { %4898 = vmatprep.subr.bf16.mxu1 %v5138_v59 }
 0x882   : > { %4899 = vmatpush3.bf16.msra.mxu1 %v5138_v59 }
 0x883   : > { %4900 = vmatprep.subr.bf16.mxu1 %v5139_v32 }
 0x886   : > { %4901 = vmatpush3.bf16.msra.mxu1 %v5139_v32 }
 0x887   : > { %4902 = vmatprep.subr.bf16.mxu1 %v5140_v10 }
 0x88a   : > { %4903 = vmatpush3.bf16.msra.mxu1 %v5140_v10 }
 0x88b   : > { %4904 = vmatprep.subr.bf16.mxu1 %v5141_v20 }
 0x88e   : > { %4905 = vmatpush3.bf16.msra.mxu1 %v5141_v20 }
 0x88f   : > { %4906 = vmatprep.subr.bf16.mxu1 %v5142_v17 }
 0x892   : > { %4907 = vmatpush3.bf16.msra.mxu1 %v5142_v17 }
 0x893   : > { %4908 = vmatprep.subr.bf16.mxu1 %v5143_v51 }
 0x896   : > { %4909 = vmatpush3.bf16.msra.mxu1 %v5143_v51 }
 0x897   : > { %4910 = vmatprep.subr.bf16.mxu1 %v5144_v57 }
 0x89a   : > { %4911 = vmatpush3.bf16.msra.mxu1 %v5144_v57 }
 0x8a5   : > { %v2722_v40 = vpop.xlane.xlu1 %2721 }
 0x8a6   : > { %5343 = vrcp.f32 %v2722_v40 }
 0x8a9   : > { %v3101_v1 = vpop.permute.xlu1 %3100 }
 0x8aa   : > { %4891 = vmatpush3.bf16.msra.mxu0 %v3101_v1 }
 0x8b0   : > { %v5344_v34 = vpop.eup %5343 }
 0x8b1   : > { %v2754_v61 = vmul.f32 %v5344_v34, %v7042_v16 }
 0x8b3   : > { %v2762_v2 = vpack.c.bf16 %v2754_v61, %v2753_v23 }
 0x8b5   : > { %4893 = vmatmul.mubr.msk.bf16.vlgmr.msra.gmra.mrb[76].mxu0 %vm1626_vm4, %v2762_v2 }
 0x8b6   : > { %3783 = vmatprep.mubr.bf16.mxu0 %v5713_v6 }
 0x8f1   : > { %v2804_v41 = vpop.f32.mrb[64].mxu1 }
 0x8f2   : > { %v4852_v9 = vpop.f32.mrb[65].mxu1 }
 0x8f3   : > { %v2807_v58 = vpop.f32.mrb[66].mxu1 }
 0x8f4   : > { %v5073_v24 = vpack.i.bf16 %v2807_v58, %v2804_v41  ;;  %v4853_v16 = vpop.f32.mrb[67].mxu1 }
 0x8f6   : > { %5074 = vrot.lane.b32.xlu0 %v5073_v24, %s5716_s30 }
 0x926   : > { %v2852_v39 = vpop.f32.mrb[64].mxu0 }
 0x927   : > { %v4858_v27 = vpop.f32.mrb[65].mxu0 }
 0x928   : > { %v2855_v26 = vpop.f32.mrb[66].mxu0 }
 0x929   : > { %v5078_v43 = vpack.i.bf16 %v2855_v26, %v2852_v39  ;;  %v4859_v31 = vpop.f32.mrb[67].mxu0 }
 0x92b   : > { %5079 = vrot.lane.b32.xlu1 %v5078_v43, %s5716_s30 }
 0x937   : > { %v2900_v55 = vpop.f32.mrb[68].mxu1 }
 0x938   : > { %v4864_v52 = vpop.f32.mrb[69].mxu1 }
 0x939   : > { %v2903_v30 = vpop.f32.mrb[70].mxu1 }
 0x93a   : > { %v5083_v25 = vpack.i.bf16 %v2903_v30, %v2900_v55  ;;  %v4865_v3 = vpop.f32.mrb[71].mxu1 }
 0x93c   : > { %5084 = vrot.lane.b32.xlu0 %v5083_v25, %s5716_s30 }
 0x947   : > { %v2948_v15 = vpop.f32.mrb[68].mxu0 }
 0x948   : > { %v2996_v56 = vpop.f32.mrb[72].mxu1  ;;  %v4870_v11 = vpop.f32.mrb[69].mxu0 }
 0x949   : > { %v4876_v49 = vpop.f32.mrb[73].mxu1  ;;  %v2951_v54 = vpop.f32.mrb[70].mxu0 }
 0x94a   : > { %v2999_v13 = vpop.f32.mrb[74].mxu1  ;;  %v5088_v48 = vpack.i.bf16 %v2951_v54, %v2948_v15  ;;  %v4871_v50 = vpop.f32.mrb[71].mxu0 }
 0x94b   : > { %v5093_v62 = vpack.i.bf16 %v2999_v13, %v2996_v56  ;;  %v4877_v44 = vpop.f32.mrb[75].mxu1 }
 0x94c   : > { %5089 = vrot.lane.b32.xlu1 %v5088_v48, %s5716_s30 }
 0x94d   : > { %5094 = vrot.lane.b32.xlu0 %v5093_v62, %s5716_s30 }
 0x94f   : > { %v3044_v38 = vpop.f32.mrb[72].mxu0 }
 0x950   : > { %v3092_v53 = vpop.f32.mrb[76].mxu1  ;;  %v4882_v19 = vpop.f32.mrb[73].mxu0 }
 0x951   : > { %v4888_v60 = vpop.f32.mrb[77].mxu1  ;;  %v3047_v47 = vpop.f32.mrb[74].mxu0 }
 0x952   : > { %v3095_v5 = vpop.f32.mrb[78].mxu1  ;;  %v5098_v40 = vpack.i.bf16 %v3047_v47, %v3044_v38  ;;  %v4883_v35 = vpop.f32.mrb[75].mxu0 }
 0x953   : > { %v5103_v1 = vpack.i.bf16 %v3095_v5, %v3092_v53  ;;  %v4889_v34 = vpop.f32.mrb[79].mxu1  ;;  %v5377_v5 = vld [vmem:[%s6221_s12] sm:$0xff] }
 0x954   : > { %5099 = vrot.lane.b32.xlu1 %v5098_v40, %s5716_s30  ;;  %v5378_v34 = vld [vmem:[%s6221_s12 + $0x8] sm:$0xff] }
 0x955   : > { %5104 = vrot.lane.b32.xlu0 %v5103_v1, %s5716_s30 }
 0x968   : > { %v5075_v23 = vpop.permute.xlu0 %5074 }
 0x969   : > { %v5077_v61 = vunpack.i.h.bf16 %v5075_v23  ;;  %v5076_v2 = vunpack.i.l.bf16 %v5075_v23 }
 0x96b   : > { %v3212_v36 = vsel %vm3211_vm5, %v6838_v7, %v5076_v2  ;;  %v3213_v59 = vsel %vm3211_vm5, %v6840_v4, %v5077_v61  ;;  %v5380_v61 = vld [vmem:[%s6221_s12 + $0x18] sm:$0xff] }
 0x96c   : > { %v3228_v41 = vpack.c.bf16 %v3213_v59, %v3212_v36 }
 0x96e   : > { %4912 = vmatprep.mubr.bf16.mxu1 %v3228_v41  ;;  %v5381_v41 = vld [vmem:[%s6221_s12 + $0x20] sm:$0xff] }
 0x988   : > { %v3140_v9 = vpop.f32.mrb[76].mxu0 }
 0x989   : > { %v4894_v58 = vpop.f32.mrb[77].mxu0 }
 0x98a   : > { %v3143_v24 = vpop.f32.mrb[78].mxu0 }
 0x98b   : > { %v5108_v16 = vpack.i.bf16 %v3143_v24, %v3140_v9  ;;  %v4895_v32 = vpop.f32.mrb[79].mxu0 }
 0x98d   : > { %5109 = vrot.lane.b32.xlu1 %v5108_v16, %s5716_s30  ;;  %v5382_v16 = vld [vmem:[%s6221_s12 + $0x28] sm:$0xff] }
 0x99d   : > { %v5080_v10 = vpop.permute.xlu1 %5079 }
 0x99e   : > { %v5082_v20 = vunpack.i.h.bf16 %v5080_v10  ;;  %v5081_v17 = vunpack.i.l.bf16 %v5080_v10  ;;  %v5383_v10 = vld [vmem:[%s6221_s12 + $0x30] sm:$0xff] }
 0x9a0   : > { %v3215_v51 = vsel %vm3211_vm5, %v6844_v14, %v5082_v20  ;;  %v3214_v7 = vsel %vm3211_vm5, %v6842_v8, %v5081_v17  ;;  %v5384_v17 = vld [vmem:[%s6221_s12 + $0x38] sm:$0xff] }
 0x9a1   : > { %v3229_v57 = vpack.c.bf16 %v3215_v51, %v3214_v7 }
 0x9a3   : > { %4913 = vmatmul.mubr.bf16.vlgmr.msra.gmra.mrb[80].mxu1 %v3229_v57 }
 0x9ae   : > { %v5085_v4 = vpop.permute.xlu0 %5084 }
 0x9af   : > { %v5087_v39 = vunpack.i.h.bf16 %v5085_v4  ;;  %v5086_v27 = vunpack.i.l.bf16 %v5085_v4  ;;  %v5385_v4 = vld [vmem:[%s6221_s12 + $0x40] sm:$0xff] }
 0x9b1   : > { %v3216_v26 = vsel %vm3211_vm5, %v6848_v33, %v5086_v27  ;;  %v3217_v43 = vsel %vm3211_vm5, %v6852_v37, %v5087_v39 }
 0x9b2   : > { %v3230_v31 = vpack.c.bf16 %v3217_v43, %v3216_v26  ;;  %v5386_v43 = vld [vmem:[%s6221_s12 + $0x48] sm:$0xff] }
 0x9b4   : > { %4916 = vmatprep.mubr.bf16.mxu1 %v3230_v31 }
 0x9be   : > { %v5090_v55 = vpop.permute.xlu1 %5089 }
 0x9bf   : > { %v5095_v52 = vpop.permute.xlu0 %5094  ;;  %v5092_v30 = vunpack.i.h.bf16 %v5090_v55  ;;  %v5091_v14 = vunpack.i.l.bf16 %v5090_v55  ;;  %v5387_v55 = vld [vmem:[%s6221_s12 + $0x50] sm:$0xff] }
 0x9c0   : > { %v5097_v25 = vunpack.i.h.bf16 %v5095_v52  ;;  %v5096_v3 = vunpack.i.l.bf16 %v5095_v52 }
 0x9c1   : > { %v3218_v8 = vsel %vm3211_vm5, %v6846_v22, %v5091_v14  ;;  %v3219_v15 = vsel %vm3211_vm5, %v6850_v45, %v5092_v30  ;;  %v5388_v30 = vld [vmem:[%s6221_s12 + $0x58] sm:$0xff] }
 0x9c2   : > { %v3220_v33 = vsel %vm3211_vm5, %v6856_v18, %v5096_v3  ;;  %v3221_v37 = vsel %vm3211_vm5, %v6860_v29, %v5097_v25  ;;  %v3231_v56 = vpack.c.bf16 %v3219_v15, %v3218_v8  ;;  %v5389_v8 = vld [vmem:[%s6221_s12 + $0x60] sm:$0xff] }
 0x9c3   : > { %v3232_v11 = vpack.c.bf16 %v3221_v37, %v3220_v33 }
 0x9c4   : > { %4917 = vmatmul.mubr.bf16.gmra.mrb[84].mxu1 %v3231_v56  ;;  %v5390_v56 = vld [vmem:[%s6221_s12 + $0x68] sm:$0xff] }
 0x9c5   : > { %4920 = vmatprep.mubr.bf16.mxu1 %v3232_v11 }
 0x9c6   : > { %v5100_v49 = vpop.permute.xlu1 %5099 }
 0x9c7   : > { %v5105_v54 = vpop.permute.xlu0 %5104  ;;  %v5102_v13 = vunpack.i.h.bf16 %v5100_v49  ;;  %v5101_v48 = vunpack.i.l.bf16 %v5100_v49  ;;  %v5391_v49 = vld [vmem:[%s6221_s12 + $0x70] sm:$0xff] }
 0x9c8   : > { %v5107_v62 = vunpack.i.h.bf16 %v5105_v54  ;;  %v5106_v50 = vunpack.i.l.bf16 %v5105_v54 }
 0x9c9   : > { %v3222_v22 = vsel %vm3211_vm5, %v6854_v0, %v5101_v48  ;;  %v3223_v45 = vsel %vm3211_vm5, %v6858_v63, %v5102_v13  ;;  %v5392_v13 = vld [vmem:[%s6221_s12 + $0x78] sm:$0xff] }
 0x9ca   : > { %v3224_v18 = vsel %vm3211_vm5, %v6862_v21, %v5106_v50  ;;  %v3225_v29 = vsel %vm3211_vm5, %v6864_v42, %v5107_v62  ;;  %v3233_v44 = vpack.c.bf16 %v3223_v45, %v3222_v22  ;;  %v5145_v62 = vld [vmem:[%s6217_s6] ss:$8 sps:$4 sm:$0xff]   ;;  %v5147_v50 = vld [vmem:[%s6217_s6 + $0x4] ss:$8 sps:$4 sm:$0xff]   ;;  %v5150_v22 = vld [vmem:[%s6217_s6 + $0x14] ss:$8 sps:$4 sm:$0xff]  }
 0x9cb   : > { %v3234_v38 = vpack.c.bf16 %v3225_v29, %v3224_v18  ;;  %3751 = vmatprep.subr.bf16.mxu0 %v5147_v50  ;;  %v5148_v45 = vld [vmem:[%s6217_s6 + $0x10] ss:$8 sps:$4 sm:$0xff]  }
 0x9cc   : > { %4921 = vmatmul.mubr.bf16.gmra.mrb[88].mxu1 %v3233_v44  ;;  %3752 = vmatpush1.bf16.msra.mxu0 %v5145_v62 }
 0x9cd   : > { %4924 = vmatprep.mubr.bf16.mxu1 %v3234_v38  ;;  %3753 = vmatprep.subr.bf16.mxu0 %v5150_v22 }
 0x9d0   : > { %3754 = vmatpush1.bf16.msra.mxu0 %v5148_v45 }
 0x9ff   : > { %v5110_v53 = vpop.permute.xlu1 %5109 }
 0xa00   : > { %v5112_v19 = vunpack.i.h.bf16 %v5110_v53  ;;  %v5111_v60 = vunpack.i.l.bf16 %v5110_v53 }
 0xa02   : > { %v3226_v0 = vsel %vm3211_vm5, %v6879_v12, %v5111_v60  ;;  %v3227_v63 = vsel %vm3211_vm5, %v6881_v46, %v5112_v19  ;;  %v5379_v12 = vld [vmem:[%s6221_s12 + $0x10] sm:$0xff] }
 0xa03   : > { %v3235_v21 = vpack.c.bf16 %v3227_v63, %v3226_v0 }
 0xa05   : > { %4925 = vmatmul.mubr.bf16.gmra.mrb[92].mxu1 %v3235_v21 }
 0xa76   : > { %v4914_v47 = vpop.f32.mrb[80].mxu1 }
 0xa77   : > { %v3334_v42 = vpop.f32.mrb[81].mxu1  ;;  %v7145_v46 = vadd.f32 %v5379_v12, %v4914_v47  ;;  %v5153_v12 = vld [vmem:[%s6217_s6 + $0x24] ss:$8 sps:$4 sm:$0xff]  }
 0xa78   : > { %v7138_v40 = vadd.f32 %v5377_v5, %v3334_v42  ;;  %v4915_v1 = vpop.f32.mrb[82].mxu1  ;;  %3755 = vmatprep.subr.bf16.mxu0 %v5153_v12 }
 0xa79   : > { %v3337_v35 = vpop.f32.mrb[83].mxu1  ;;  %v7150_v2 = vadd.f32 %v5380_v61, %v4915_v1  ;;  %v5151_v61 = vld [vmem:[%s6217_s6 + $0x20] ss:$8 sps:$4 sm:$0xff]  }
 0xa7a   : > { %v7141_v23 = vadd.f32 %v5378_v34, %v3337_v35  ;;  %3415 = vadd.xlane.f32.xlu0 %v7138_v40  ;;  %3756 = vmatpush1.bf16.msra.mxu0 %v5151_v61 }
 0xa7c   : > { %3417 = vadd.xlane.f32.xlu1 %v7141_v23 }
 0xa7e   : > { %3419 = vadd.xlane.f32.xlu0 %v7145_v46 }
 0xa82   : > { %3421 = vadd.xlane.f32.xlu0 %v7150_v2 }
 0xa97   : > { %v4918_v36 = vpop.f32.mrb[84].mxu1 }
 0xa98   : > { %v3350_v59 = vpop.f32.mrb[85].mxu1  ;;  %v7161_v20 = vadd.f32 %v5383_v10, %v4918_v36  ;;  %v5156_v36 = vld [vmem:[%s6217_s6 + $0x34] ss:$8 sps:$4 sm:$0xff]  }
 0xa99   : > { %v7154_v9 = vadd.f32 %v5381_v41, %v3350_v59  ;;  %v4919_v58 = vpop.f32.mrb[86].mxu1  ;;  %v5154_v59 = vld [vmem:[%s6217_s6 + $0x30] ss:$8 sps:$4 sm:$0xff]   ;;  %3757 = vmatprep.subr.bf16.mxu0 %v5156_v36  ;;  %v5159_v41 = vld [vmem:[%s6217_s6 + $0x44] ss:$8 sps:$4 sm:$0xff]  }
 0xa9a   : > { %v3353_v24 = vpop.f32.mrb[87].mxu1  ;;  %v7165_v51 = vadd.f32 %v5384_v17, %v4919_v58  ;;  %3758 = vmatpush1.bf16.msra.mxu0 %v5154_v59  ;;  %v5157_v58 = vld [vmem:[%s6217_s6 + $0x40] ss:$8 sps:$4 sm:$0xff]   ;;  %v5162_v10 = vld [vmem:[%s6217_s6 + $0x54] ss:$8 sps:$4 sm:$0xff]  }
 0xa9b   : > { %v7157_v32 = vadd.f32 %v5382_v16, %v3353_v24  ;;  %3423 = vadd.xlane.f32.xlu0 %v7154_v9  ;;  %3759 = vmatprep.subr.bf16.mxu0 %v5159_v41 }
 0xa9d   : > { %3425 = vadd.xlane.f32.xlu1 %v7157_v32 }
 0xa9e   : > { %3760 = vmatpush1.bf16.msra.mxu0 %v5157_v58 }
 0xa9f   : > { %3427 = vadd.xlane.f32.xlu0 %v7161_v20  ;;  %v4922_v7 = vpop.f32.mrb[88].mxu1  ;;  %3761 = vmatprep.subr.bf16.mxu0 %v5162_v10 }
 0xaa0   : > { %v3366_v57 = vpop.f32.mrb[89].mxu1  ;;  %v7177_v52 = vadd.f32 %v5387_v55, %v4922_v7  ;;  %v5160_v7 = vld [vmem:[%s6217_s6 + $0x50] ss:$8 sps:$4 sm:$0xff]  }
 0xaa1   : > { %v7169_v39 = vadd.f32 %v5385_v4, %v3366_v57  ;;  %3429 = vadd.xlane.f32.xlu1 %v7165_v51  ;;  %v4923_v27 = vpop.f32.mrb[90].mxu1 }
 0xaa2   : > { %v3369_v26 = vpop.f32.mrb[91].mxu1  ;;  %v7181_v14 = vadd.f32 %v5388_v30, %v4923_v27  ;;  %3762 = vmatpush1.bf16.msra.mxu0 %v5160_v7  ;;  %v5163_v30 = vld [vmem:[%s6217_s6 + $0x60] ss:$8 sps:$4 sm:$0xff]  }
 0xaa3   : > { %v7173_v31 = vadd.f32 %v5386_v43, %v3369_v26  ;;  %3431 = vadd.xlane.f32.xlu0 %v7169_v39 }
 0xaa5   : > { %3433 = vadd.xlane.f32.xlu1 %v7173_v31 }
 0xaa7   : > { %3435 = vadd.xlane.f32.xlu0 %v7177_v52 }
 0xaa9   : > { %3437 = vadd.xlane.f32.xlu1 %v7181_v14 }
 0xad8   : > { %v4926_v25 = vpop.f32.mrb[92].mxu1 }
 0xad9   : > { %v3382_v3 = vpop.f32.mrb[93].mxu1  ;;  %v7193_v54 = vadd.f32 %v5391_v49, %v4926_v25  ;;  %v5165_v25 = vld [vmem:[%s6217_s6 + $0x64] ss:$8 sps:$4 sm:$0xff]  }
 0xada   : > { %v7186_v15 = vadd.f32 %v5389_v8, %v3382_v3  ;;  %v4927_v33 = vpop.f32.mrb[94].mxu1  ;;  %v5168_v8 = vld [vmem:[%s6217_s6 + $0x74] ss:$8 sps:$4 sm:$0xff]   ;;  %3763 = vmatprep.subr.bf16.mxu0 %v5165_v25 }
 0xadb   : > { %v3385_v37 = vpop.f32.mrb[95].mxu1  ;;  %v7197_v48 = vadd.f32 %v5392_v13, %v4927_v33  ;;  %3764 = vmatpush1.bf16.msra.mxu0 %v5163_v30  ;;  %v5166_v13 = vld [vmem:[%s6217_s6 + $0x70] ss:$8 sps:$4 sm:$0xff]   ;;  %s7656_s6 = sand.u32 1, %s5677_s25  }
 0xadc   : > { %v7189_v11 = vadd.f32 %v5390_v56, %v3385_v37  ;;  %3439 = vadd.xlane.f32.xlu0 %v7186_v15  ;;  %3765 = vmatprep.subr.bf16.mxu0 %v5168_v8 }
 0xade   : > { %3441 = vadd.xlane.f32.xlu1 %v7189_v11 }
 0xadf   : > { %3766 = vmatpush1.bf16.msra.mxu0 %v5166_v13 }
 0xae0   : > { %3443 = vadd.xlane.f32.xlu0 %v7193_v54 }
 0xae2   : > { %3445 = vadd.xlane.f32.xlu1 %v7197_v48 }
 0xb07   : > { %v3416_v18 = vpop.xlane.xlu0 %3415 }
 0xb08   : > { %v3447_v29 = vmul.f32 0.0078125, %v3416_v18 }
 0xb09   : > { %v3418_v44 = vpop.xlane.xlu1 %3417 }
 0xb0a   : > { %v7206_v38 = vsub.f32 %v7138_v40, %v3447_v29  ;;  %v3448_v53 = vmul.f32 0.0078125, %v3418_v44 }
 0xb0b   : > { %v3420_v19 = vpop.xlane.xlu0 %3419 }
 0xb0c   : > { %v7209_v60 = vsub.f32 %v7141_v23, %v3448_v53  ;;  %v3449_v0 = vmul.f32 0.0078125, %v3420_v19  ;;  %v3479_v63 = vmul.f32 %v7206_v38, %v7206_v38 }
 0xb0e   : > { %v7214_v21 = vsub.f32 %v7145_v46, %v3449_v0  ;;  %3495 = vadd.xlane.f32.xlu0 %v3479_v63  ;;  %v3480_v47 = vmul.f32 %v7209_v60, %v7209_v60 }
 0xb0f   : > { %v3422_v42 = vpop.xlane.xlu0 %3421 }
 0xb10   : > { %v3450_v5 = vmul.f32 0.0078125, %v3422_v42  ;;  %3497 = vadd.xlane.f32.xlu1 %v3480_v47  ;;  %v3481_v1 = vmul.f32 %v7214_v21, %v7214_v21 }
 0xb12   : > { %v7221_v35 = vsub.f32 %v7150_v2, %v3450_v5  ;;  %3499 = vadd.xlane.f32.xlu0 %v3481_v1 }
 0xb14   : > { %v3482_v34 = vmul.f32 %v7221_v35, %v7221_v35 }
 0xb16   : > { %3501 = vadd.xlane.f32.xlu1 %v3482_v34 }
 0xb28   : > { %v3424_v24 = vpop.xlane.xlu0 %3423 }
 0xb29   : > { %v3451_v16 = vmul.f32 0.0078125, %v3424_v24 }
 0xb2a   : > { %v3426_v17 = vpop.xlane.xlu1 %3425 }
 0xb2b   : > { %v7234_v57 = vsub.f32 %v7154_v9, %v3451_v16  ;;  %v3452_v4 = vmul.f32 0.0078125, %v3426_v17 }
 0xb2c   : > { %v3428_v27 = vpop.xlane.xlu0 %3427 }
 0xb2d   : > { %v7237_v26 = vsub.f32 %v7157_v32, %v3452_v4  ;;  %v3453_v43 = vmul.f32 0.0078125, %v3428_v27  ;;  %v3483_v55 = vmul.f32 %v7234_v57, %v7234_v57 }
 0xb2e   : > { %v3430_v3 = vpop.xlane.xlu1 %3429 }
 0xb2f   : > { %v7245_v33 = vsub.f32 %v7161_v20, %v3453_v43  ;;  %v3454_v37 = vmul.f32 0.0078125, %v3430_v3  ;;  %3503 = vadd.xlane.f32.xlu0 %v3483_v55  ;;  %v3484_v56 = vmul.f32 %v7237_v26, %v7237_v26 }
 0xb30   : > { %v3432_v49 = vpop.xlane.xlu0 %3431 }
 0xb31   : > { %v7251_v62 = vsub.f32 %v7165_v51, %v3454_v37  ;;  %v3455_v50 = vmul.f32 0.0078125, %v3432_v49  ;;  %3505 = vadd.xlane.f32.xlu1 %v3484_v56  ;;  %v3485_v22 = vmul.f32 %v7245_v33, %v7245_v33 }
 0xb32   : > { %v3434_v45 = vpop.xlane.xlu1 %3433 }
 0xb33   : > { %v7256_v18 = vsub.f32 %v7169_v39, %v3455_v50  ;;  %v3456_v29 = vmul.f32 0.0078125, %v3434_v45  ;;  %3507 = vadd.xlane.f32.xlu0 %v3485_v22  ;;  %v3486_v44 = vmul.f32 %v7251_v62, %v7251_v62  ;;  %v5169_v22 = vld [vmem:[%s6219_s7 + $0x40] sm:$0xff]  }
 0xb34   : > { %v3436_v53 = vpop.xlane.xlu0 %3435  ;;  %v5170_v45 = vld [vmem:[%s6219_s7] sm:$0xff]   ;;  %4640 = vmatprep.subr.bf16.mxu1 %v5169_v22 }
 0xb35   : > { %v7261_v19 = vsub.f32 %v7173_v31, %v3456_v29  ;;  %v3457_v0 = vmul.f32 0.0078125, %v3436_v53  ;;  %3509 = vadd.xlane.f32.xlu1 %v3486_v44  ;;  %v3487_v63 = vmul.f32 %v7256_v18, %v7256_v18  ;;  %v5171_v29 = vld [vmem:[%s6219_s7 + $0x48] sm:$0xff]   ;;  %4641 = vmatpush3.bf16.msra.mxu1 %v5170_v45 }
 0xb36   : > { %v3438_v47 = vpop.xlane.xlu1 %3437  ;;  %4642 = vmatprep.subr.bf16.mxu1 %v5171_v29 }
 0xb37   : > { %v7266_v42 = vsub.f32 %v7177_v52, %v3457_v0  ;;  %v3458_v5 = vmul.f32 0.0078125, %v3438_v47  ;;  %3511 = vadd.xlane.f32.xlu0 %v3487_v63  ;;  %v3488_v1 = vmul.f32 %v7261_v19, %v7261_v19  ;;  %v5172_v63 = vld [vmem:[%s6219_s7 + $0x8] sm:$0xff]  }
 0xb39   : > { %v7271_v34 = vsub.f32 %v7181_v14, %v3458_v5  ;;  %3513 = vadd.xlane.f32.xlu1 %v3488_v1  ;;  %v3489_v12 = vmul.f32 %v7266_v42, %v7266_v42  ;;  %v5173_v5 = vld [vmem:[%s6219_s7 + $0x50] sm:$0xff]   ;;  %4643 = vmatpush3.bf16.msra.mxu1 %v5172_v63 }
 0xb3a   : > { %4644 = vmatprep.subr.bf16.mxu1 %v5173_v5 }
 0xb3b   : > { %3515 = vadd.xlane.f32.xlu0 %v3489_v12  ;;  %v3490_v61 = vmul.f32 %v7271_v34, %v7271_v34 }
 0xb3d   : > { %3517 = vadd.xlane.f32.xlu1 %v3490_v61  ;;  %v5174_v61 = vld [vmem:[%s6219_s7 + $0x10] sm:$0xff]  }
 0xb3e   : > { %4645 = vmatpush3.bf16.msra.mxu1 %v5174_v61 }
 0xb69   : > { %v3440_v36 = vpop.xlane.xlu0 %3439 }
 0xb6a   : > { %v3459_v59 = vmul.f32 0.0078125, %v3440_v36  ;;  %v5175_v36 = vld [vmem:[%s6219_s7 + $0x58] sm:$0xff]  }
 0xb6b   : > { %v3442_v41 = vpop.xlane.xlu1 %3441  ;;  %4646 = vmatprep.subr.bf16.mxu1 %v5175_v36 }
 0xb6c   : > { %v7278_v58 = vsub.f32 %v7186_v15, %v3459_v59  ;;  %v3460_v24 = vmul.f32 0.0078125, %v3442_v41  ;;  %v7309_v41 = vld [vmem:[%s685_s29] ss:$0 sm:$0xff] }
 0xb6d   : > { %v3444_v16 = vpop.xlane.xlu0 %3443 }
 0xb6e   : > { %v7281_v10 = vsub.f32 %v7189_v11, %v3460_v24  ;;  %v3461_v17 = vmul.f32 0.0078125, %v3444_v16  ;;  %v3491_v7 = vmul.f32 %v7278_v58, %v7278_v58  ;;  %v5176_v24 = vld [vmem:[%s6219_s7 + $0x18] sm:$0xff]  }
 0xb6f   : > { %v3446_v4 = vpop.xlane.xlu1 %3445  ;;  %4647 = vmatpush3.bf16.msra.mxu1 %v5176_v24 }
 0xb70   : > { %v7286_v27 = vsub.f32 %v7193_v54, %v3461_v17  ;;  %v3462_v43 = vmul.f32 0.0078125, %v3446_v4  ;;  %3519 = vadd.xlane.f32.xlu0 %v3491_v7  ;;  %v3492_v55 = vmul.f32 %v7281_v10, %v7281_v10  ;;  %v5177_v17 = vld [vmem:[%s6219_s7 + $0x60] sm:$0xff]  }
 0xb71   : > { %4648 = vmatprep.subr.bf16.mxu1 %v5177_v17 }
 0xb72   : > { %v7291_v30 = vsub.f32 %v7197_v48, %v3462_v43  ;;  %3521 = vadd.xlane.f32.xlu1 %v3492_v55  ;;  %v3493_v25 = vmul.f32 %v7286_v27, %v7286_v27 }
 0xb74   : > { %3523 = vadd.xlane.f32.xlu0 %v3493_v25  ;;  %v3494_v3 = vmul.f32 %v7291_v30, %v7291_v30  ;;  %v7321_v25 = vld [vmem:[%s688_s26] ss:$0 sm:$0xff] }
 0xb76   : > { %3525 = vadd.xlane.f32.xlu1 %v3494_v3  ;;  %v5178_v3 = vld [vmem:[%s6219_s7 + $0x20] sm:$0xff]  }
 0xb77   : > { %4649 = vmatpush3.bf16.msra.mxu1 %v5178_v3 }
 0xb9b   : > { %v3496_v8 = vpop.xlane.xlu0 %3495 }
 0xb9c   : > { %v3527_v37 = vmul.f32 0.0078125, %v3496_v8 }
 0xb9d   : > { %v3498_v56 = vpop.xlane.xlu1 %3497 }
 0xb9e   : > { %v3543_v49 = vadd.f32 1e-05, %v3527_v37  ;;  %v3528_v13 = vmul.f32 0.0078125, %v3498_v56 }
 0xb9f   : > { %v3500_v50 = vpop.xlane.xlu0 %3499 }
 0xba0   : > { %5345 = vrsqrt.f32 %v3543_v49  ;;  %v3544_v44 = vadd.f32 1e-05, %v3528_v13  ;;  %v3529_v53 = vmul.f32 0.0078125, %v3500_v50 }
 0xba2   : > { %5347 = vrsqrt.f32 %v3544_v44  ;;  %v3545_v0 = vadd.f32 1e-05, %v3529_v53 }
 0xba3   : > { %v3502_v47 = vpop.xlane.xlu1 %3501 }
 0xba4   : > { %5349 = vrsqrt.f32 %v3545_v0  ;;  %v3530_v1 = vmul.f32 0.0078125, %v3502_v47 }
 0xba6   : > { %v3546_v12 = vadd.f32 1e-05, %v3530_v1 }
 0xba8   : > { %5351 = vrsqrt.f32 %v3546_v12 }
 0xbaa   : > { %v5346_v59 = vpop.eup %5345 }
 0xbab   : > { %v3575_v16 = vmul.f32 %v5346_v59, %v7206_v38  ;;  %v5179_v38 = vld [vmem:[%s6219_s7 + $0x68] sm:$0xff]  }
 0xbac   : > { %v5348_v7 = vpop.eup %5347  ;;  %4650 = vmatprep.subr.bf16.mxu1 %v5179_v38 }
 0xbad   : > { %v3576_v4 = vmul.f32 %v5348_v7, %v7209_v60  ;;  %v3597_v43 = vmul.f32 %v7309_v41, %v3575_v16 }
 0xbae   : > { %v5350_v55 = vpop.eup %5349 }
 0xbaf   : > { %v3598_v8 = vmul.f32 %v7309_v41, %v3576_v4  ;;  %v3619_v37 = vadd.f32 %v7321_v25, %v3597_v43  ;;  %v3577_v60 = vmul.f32 %v5350_v55, %v7214_v21 }
 0xbb1   : > { %v3620_v56 = vadd.f32 %v7321_v25, %v3598_v8  ;;  %v3599_v22 = vmul.f32 %v7309_v41, %v3577_v60 }
 0xbb2   : > { %v5352_v49 = vpop.eup %5351 }
 0xbb3   : > { %v3635_v13 = vpack.c.bf16 %v3620_v56, %v3619_v37  ;;  %v3578_v50 = vmul.f32 %v5352_v49, %v7221_v35  ;;  %v3621_v44 = vadd.f32 %v7321_v25, %v3599_v22 }
 0xbb5   : > { %3784 = vmatmul.mubr.bf16.vlgmr.msra.gmra.mrb[80].mxu0 %v3635_v13  ;;  %v3600_v45 = vmul.f32 %v7309_v41, %v3578_v50 }
 0xbb6   : > { %3793 = vmatprep.mubr.bf16.mxu0 %v5713_v6 }
 0xbb7   : > { %v3622_v29 = vadd.f32 %v7321_v25, %v3600_v45 }
 0xbb9   : > { %v3636_v53 = vpack.c.bf16 %v3622_v29, %v3621_v44 }
 0xbbc   : > { %v3504_v0 = vpop.xlane.xlu0 %3503 }
 0xbbd   : > { %v3531_v21 = vmul.f32 0.0078125, %v3504_v0  ;;  %3794 = vmatmul.mubr.bf16.gmra.mrb[84].mxu0 %v3636_v53 }
 0xbbe   : > { %v3506_v63 = vpop.xlane.xlu1 %3505  ;;  %3803 = vmatprep.mubr.bf16.mxu0 %v5713_v6 }
 0xbbf   : > { %v3547_v35 = vadd.f32 1e-05, %v3531_v21  ;;  %v3532_v47 = vmul.f32 0.0078125, %v3506_v63 }
 0xbc0   : > { %v3508_v5 = vpop.xlane.xlu0 %3507 }
 0xbc1   : > { %5353 = vrsqrt.f32 %v3547_v35  ;;  %v3548_v1 = vadd.f32 1e-05, %v3532_v47  ;;  %v3533_v12 = vmul.f32 0.0078125, %v3508_v5 }
 0xbc2   : > { %v3510_v61 = vpop.xlane.xlu1 %3509 }
 0xbc3   : > { %5355 = vrsqrt.f32 %v3548_v1  ;;  %v3549_v36 = vadd.f32 1e-05, %v3533_v12  ;;  %v3534_v59 = vmul.f32 0.0078125, %v3510_v61 }
 0xbc4   : > { %v3512_v24 = vpop.xlane.xlu0 %3511 }
 0xbc5   : > { %5357 = vrsqrt.f32 %v3549_v36  ;;  %v3550_v16 = vadd.f32 1e-05, %v3534_v59  ;;  %v3535_v17 = vmul.f32 0.0078125, %v3512_v24 }
 0xbc6   : > { %v3514_v7 = vpop.xlane.xlu1 %3513 }
 0xbc7   : > { %5359 = vrsqrt.f32 %v3550_v16  ;;  %v3536_v4 = vmul.f32 0.0078125, %v3514_v7  ;;  %v3551_v43 = vadd.f32 1e-05, %v3535_v17 }
 0xbc8   : > { %v3516_v3 = vpop.xlane.xlu0 %3515 }
 0xbc9   : > { %v3552_v55 = vadd.f32 1e-05, %v3536_v4  ;;  %v3537_v49 = vmul.f32 0.0078125, %v3516_v3 }
 0xbca   : > { %v3518_v8 = vpop.xlane.xlu1 %3517 }
 0xbcb   : > { %v5354_v38 = vpop.eup %5353  ;;  %5361 = vrsqrt.f32 %v3552_v55  ;;  %v3538_v37 = vmul.f32 0.0078125, %v3518_v8  ;;  %v3553_v53 = vadd.f32 1e-05, %v3537_v49 }
 0xbcc   : > { %v3579_v56 = vmul.f32 %v5354_v38, %v7234_v57  ;;  %5363 = vrsqrt.f32 %v3551_v43 }
 0xbcd   : > { %v5356_v60 = vpop.eup %5355  ;;  %v3554_v45 = vadd.f32 1e-05, %v3538_v37 }
 0xbce   : > { %v3580_v13 = vmul.f32 %v5356_v60, %v7237_v26  ;;  %v3601_v50 = vmul.f32 %v7309_v41, %v3579_v56 }
 0xbcf   : > { %v5358_v22 = vpop.eup %5357  ;;  %5365 = vrsqrt.f32 %v3554_v45 }
 0xbd0   : > { %v3602_v29 = vmul.f32 %v7309_v41, %v3580_v13  ;;  %v3623_v0 = vadd.f32 %v7321_v25, %v3601_v50  ;;  %v3581_v63 = vmul.f32 %v5358_v22, %v7245_v33  ;;  %5367 = vrsqrt.f32 %v3553_v53 }
 0xbd1   : > { %v5360_v44 = vpop.eup %5359 }
 0xbd2   : > { %v3624_v21 = vadd.f32 %v7321_v25, %v3602_v29  ;;  %v3582_v57 = vmul.f32 %v5360_v44, %v7251_v62  ;;  %v3603_v5 = vmul.f32 %v7309_v41, %v3581_v63 }
 0xbd4   : > { %v3637_v35 = vpack.c.bf16 %v3624_v21, %v3623_v0  ;;  %v3604_v26 = vmul.f32 %v7309_v41, %v3582_v57  ;;  %v3625_v33 = vadd.f32 %v7321_v25, %v3603_v5  ;;  %v5180_v0 = vld [vmem:[%s6219_s7 + $0x28] sm:$0xff]   ;;  %v5181_v21 = vld [vmem:[%s6219_s7 + $0x70] sm:$0xff]  }
 0xbd5   : > { %v5362_v47 = vpop.eup %5361  ;;  %4651 = vmatpush3.bf16.msra.mxu1 %v5180_v0  ;;  %v5182_v57 = vld [vmem:[%s6219_s7 + $0x30] sm:$0xff]  }
 0xbd6   : > { %3804 = vmatmul.mubr.bf16.gmra.mrb[88].mxu0 %v3637_v35  ;;  %v5364_v1 = vpop.eup %5363  ;;  %v3626_v12 = vadd.f32 %v7321_v25, %v3604_v26  ;;  %v3584_v61 = vmul.f32 %v5362_v47, %v7261_v19  ;;  %4652 = vmatprep.subr.bf16.mxu1 %v5181_v21 }
 0xbd7   : > { %3813 = vmatprep.mubr.bf16.mxu0 %v5713_v6  ;;  %v3583_v62 = vmul.f32 %v5364_v1, %v7256_v18  ;;  %v5183_v1 = vld [vmem:[%s6219_s7 + $0x78] sm:$0xff]  }
 0xbd8   : > { %v3638_v36 = vpack.c.bf16 %v3626_v12, %v3625_v33  ;;  %v3606_v59 = vmul.f32 %v7309_v41, %v3584_v61  ;;  %v5184_v61 = vld [vmem:[%s6219_s7 + $0x38] sm:$0xff]   ;;  %s7487_s7 = scalar_lea.sflag [#allocation4], %s7656_s6 }
 0xbd9   : > { %v5366_v24 = vpop.eup %5365  ;;  %v3605_v16 = vmul.f32 %v7309_v41, %v3583_v62  ;;  %4653 = vmatpush3.bf16.msra.mxu1 %v5182_v57 }
 0xbda   : > { %v5368_v17 = vpop.eup %5367  ;;  %v3628_v7 = vadd.f32 %v7321_v25, %v3606_v59  ;;  %v3586_v4 = vmul.f32 %v5366_v24, %v7271_v34  ;;  %4654 = vmatprep.subr.bf16.mxu1 %v5183_v1 }
 0xbdb   : > { %v3627_v19 = vadd.f32 %v7321_v25, %v3605_v16  ;;  %v3585_v43 = vmul.f32 %v5368_v17, %v7266_v42 }
 0xbdc   : > { %v3608_v18 = vmul.f32 %v7309_v41, %v3586_v4 }
 0xbdd   : > { %v3639_v55 = vpack.c.bf16 %v3628_v7, %v3627_v19  ;;  %v3607_v3 = vmul.f32 %v7309_v41, %v3585_v43  ;;  %4655 = vmatpush3.bf16.msra.mxu1 %v5184_v61  ;;  %v3663_v43 = vsub.s32 0, %v6560_v28 }
 0xbde   : > { %3814 = vmatmul.mubr.bf16.gmra.mrb[92].mxu0 %v3638_v36  ;;  %v3630_v8 = vadd.f32 %v7321_v25, %v3608_v18 }
 0xbdf   : > { %3823 = vmatprep.mubr.bf16.mxu0 %v5713_v6  ;;  %v3629_v38 = vadd.f32 %v7321_v25, %v3607_v3 }
 0xbe1   : > { %v3640_v37 = vpack.c.bf16 %v3630_v8, %v3629_v38 }
 0xbe6   : > { %3824 = vmatmul.mubr.bf16.gmra.mrb[96].mxu0 %v3639_v55  ;;  %v3659_v55 = vld [vmem:[%s6213_s13] sm:$0x3] }
 0xbe7   : > { %3833 = vmatprep.mubr.bf16.mxu0 %v5713_v6 }
 0xbee   : > { %3834 = vmatmul.mubr.bf16.gmra.mrb[100].mxu0 %v3640_v37 }
 0xbef   : > { %3843 = vmatprep.mubr.bf16.mxu0 %v5713_v6 }
 0xbfd   : > { %v3520_v34 = vpop.xlane.xlu0 %3519 }
 0xbfe   : > { %v3539_v56 = vmul.f32 0.0078125, %v3520_v34 }
 0xbff   : > { %v3522_v42 = vpop.xlane.xlu1 %3521 }
 0xc00   : > { %v3555_v60 = vadd.f32 1e-05, %v3539_v56  ;;  %v3540_v49 = vmul.f32 0.0078125, %v3522_v42 }
 0xc01   : > { %v3524_v13 = vpop.xlane.xlu0 %3523 }
 0xc02   : > { %5369 = vrsqrt.f32 %v3555_v60  ;;  %v3556_v50 = vadd.f32 1e-05, %v3540_v49  ;;  %v3541_v22 = vmul.f32 0.0078125, %v3524_v13 }
 0xc03   : > { %v3526_v45 = vpop.xlane.xlu1 %3525 }
 0xc04   : > { %5371 = vrsqrt.f32 %v3556_v50  ;;  %v3557_v29 = vadd.f32 1e-05, %v3541_v22  ;;  %v3542_v44 = vmul.f32 0.0078125, %v3526_v45 }
 0xc06   : > { %5373 = vrsqrt.f32 %v3557_v29  ;;  %v3558_v53 = vadd.f32 1e-05, %v3542_v44 }
 0xc08   : > { %5375 = vrsqrt.f32 %v3558_v53 }
 0xc0c   : > { %v5370_v63 = vpop.eup %5369 }
 0xc0d   : > { %v3587_v35 = vmul.f32 %v5370_v63, %v7278_v58 }
 0xc0e   : > { %v5372_v26 = vpop.eup %5371 }
 0xc0f   : > { %v3588_v47 = vmul.f32 %v5372_v26, %v7281_v10  ;;  %v3609_v5 = vmul.f32 %v7309_v41, %v3587_v35 }
 0xc10   : > { %v5374_v12 = vpop.eup %5373 }
 0xc11   : > { %v3610_v33 = vmul.f32 %v7309_v41, %v3588_v47  ;;  %v3631_v36 = vadd.f32 %v7321_v25, %v3609_v5  ;;  %v3589_v59 = vmul.f32 %v5374_v12, %v7286_v27  ;;  %v3667_v27 = vsub.s32 1, %v6560_v28 }
 0xc12   : > { %v5376_v62 = vpop.eup %5375 }
 0xc13   : > { %v3632_v58 = vadd.f32 %v7321_v25, %v3610_v33  ;;  %v3590_v24 = vmul.f32 %v5376_v62, %v7291_v30  ;;  %v3611_v17 = vmul.f32 %v7309_v41, %v3589_v59  ;;  %v7385_v30 = vrot.slane %v3659_v55, %v3663_v43 }
 0xc14   : > { %v7387_v18 = vrot.slane %v3659_v55, %v3667_v27 }
 0xc15   : > { %v3641_v10 = vpack.c.bf16 %v3632_v58, %v3631_v36  ;;  %v3612_v16 = vmul.f32 %v7309_v41, %v3590_v24  ;;  %v3633_v4 = vadd.f32 %v7321_v25, %v3611_v17 }
 0xc17   : > { %3844 = vmatmul.mubr.bf16.gmra.mrb[104].mxu0 %v3641_v10  ;;  %v3634_v7 = vadd.f32 %v7321_v25, %v3612_v16 }
 0xc18   : > { %3853 = vmatprep.mubr.bf16.mxu0 %v5713_v6 }
 0xc19   : > { %v3642_v19 = vpack.c.bf16 %v3634_v7, %v3633_v4 }
 0xc1f   : > { %3854 = vmatmul.mubr.bf16.gmra.mrb[108].mxu0 %v3642_v19 }
 0xc88   : > { %v3785_v3 = vpop.f32.mrb[80].mxu0 }
 0xc89   : > { %v3786_v41 = vadd.f32 %v3785_v3, %v7385_v30  ;;  %v3787_v8 = vpop.f32.mrb[81].mxu0 }
 0xc8a   : > { %v3788_v6 = vadd.f32 %v3787_v8, %v7387_v18  ;;  %v3789_v38 = vpop.f32.mrb[82].mxu0 }
 0xc8b   : > { %v3790_v25 = vadd.f32 %v3789_v38, %v7385_v30  ;;  %v3791_v37 = vpop.f32.mrb[83].mxu0  ;;  %v3864_v56 = vmax.f32 %v3786_v41, 0.0 }
 0xc8c   : > { %v3792_v34 = vadd.f32 %v3791_v37, %v7387_v18  ;;  %v3865_v60 = vmax.f32 %v3788_v6, 0.0 }
 0xc8d   : > { %v3866_v42 = vmax.f32 %v3790_v25, 0.0 }
 0xc8e   : > { %v3867_v28 = vmax.f32 %v3792_v34, 0.0 }
 0xc8f   : > { %v3896_v49 = vpack.c.bf16 %v3866_v42, %v3864_v56 }
 0xc90   : > { %v3897_v13 = vpack.c.bf16 %v3867_v28, %v3865_v60  ;;  %v3795_v50 = vpop.f32.mrb[84].mxu0 }
 0xc91   : > { %v3796_v22 = vadd.f32 %v3795_v50, %v7385_v30  ;;  %v3797_v45 = vpop.f32.mrb[85].mxu0 }
 0xc92   : > { %v3798_v29 = vadd.f32 %v3797_v45, %v7387_v18  ;;  %v3799_v44 = vpop.f32.mrb[86].mxu0  ;;  %4079 = vmatprep.mubr.bf16.mxu1 %v3897_v13 }
 0xc93   : > { %v3800_v53 = vadd.f32 %v3799_v44, %v7385_v30  ;;  %v3801_v0 = vpop.f32.mrb[87].mxu0  ;;  %4080 = vmatmul.mubr.bf16.vlgmr.msra.gmra.mrb[96].mxu1 %v3896_v49  ;;  %v3868_v63 = vmax.f32 %v3796_v22, 0.0 }
 0xc94   : > { %v3802_v21 = vadd.f32 %v3801_v0, %v7387_v18  ;;  %v3869_v35 = vmax.f32 %v3798_v29, 0.0 }
 0xc95   : > { %v3870_v57 = vmax.f32 %v3800_v53, 0.0 }
 0xc96   : > { %v3871_v26 = vmax.f32 %v3802_v21, 0.0 }
 0xc97   : > { %v3898_v47 = vpack.c.bf16 %v3870_v57, %v3868_v63 }
 0xc98   : > { %v3899_v5 = vpack.c.bf16 %v3871_v26, %v3869_v35 }
 0xc9a   : > { %4087 = vmatprep.mubr.bf16.mxu1 %v3899_v5 }
 0xc9b   : > { %4088 = vmatmul.mubr.bf16.gmra.mrb[100].mxu1 %v3898_v47 }
 0xca9   : > { %v3805_v1 = vpop.f32.mrb[88].mxu0 }
 0xcaa   : > { %v3806_v12 = vadd.f32 %v3805_v1, %v7385_v30  ;;  %v3807_v61 = vpop.f32.mrb[89].mxu0 }
 0xcab   : > { %v3808_v33 = vadd.f32 %v3807_v61, %v7387_v18  ;;  %v3809_v62 = vpop.f32.mrb[90].mxu0 }
 0xcac   : > { %v3810_v36 = vadd.f32 %v3809_v62, %v7385_v30  ;;  %v3811_v58 = vpop.f32.mrb[91].mxu0  ;;  %v3872_v24 = vmax.f32 %v3806_v12, 0.0 }
 0xcad   : > { %v3812_v59 = vadd.f32 %v3811_v58, %v7387_v18  ;;  %v3873_v16 = vmax.f32 %v3808_v33, 0.0 }
 0xcae   : > { %v3874_v10 = vmax.f32 %v3810_v36, 0.0 }
 0xcaf   : > { %v3875_v17 = vmax.f32 %v3812_v59, 0.0 }
 0xcb0   : > { %v3900_v7 = vpack.c.bf16 %v3874_v10, %v3872_v24 }
 0xcb1   : > { %v3901_v4 = vpack.c.bf16 %v3875_v17, %v3873_v16  ;;  %v3815_v19 = vpop.f32.mrb[92].mxu0 }
 0xcb2   : > { %v3816_v43 = vadd.f32 %v3815_v19, %v7385_v30  ;;  %v3817_v55 = vpop.f32.mrb[93].mxu0 }
 0xcb3   : > { %v3818_v27 = vadd.f32 %v3817_v55, %v7387_v18  ;;  %v3819_v3 = vpop.f32.mrb[94].mxu0  ;;  %4095 = vmatprep.mubr.bf16.mxu1 %v3901_v4 }
 0xcb4   : > { %v3820_v41 = vadd.f32 %v3819_v3, %v7385_v30  ;;  %v3821_v8 = vpop.f32.mrb[95].mxu0  ;;  %4096 = vmatmul.mubr.bf16.gmra.mrb[104].mxu1 %v3900_v7  ;;  %v3876_v38 = vmax.f32 %v3816_v43, 0.0 }
 0xcb5   : > { %v3822_v6 = vadd.f32 %v3821_v8, %v7387_v18  ;;  %v3877_v37 = vmax.f32 %v3818_v27, 0.0 }
 0xcb6   : > { %v3878_v25 = vmax.f32 %v3820_v41, 0.0 }
 0xcb7   : > { %v3879_v34 = vmax.f32 %v3822_v6, 0.0 }
 0xcb8   : > { %v3902_v56 = vpack.c.bf16 %v3878_v25, %v3876_v38 }
 0xcb9   : > { %v3903_v42 = vpack.c.bf16 %v3879_v34, %v3877_v37  ;;  %v3825_v60 = vpop.f32.mrb[96].mxu0 }
 0xcba   : > { %v3826_v28 = vadd.f32 %v3825_v60, %v7385_v30  ;;  %v3827_v49 = vpop.f32.mrb[97].mxu0 }
 0xcbb   : > { %v3828_v13 = vadd.f32 %v3827_v49, %v7387_v18  ;;  %v3829_v50 = vpop.f32.mrb[98].mxu0  ;;  %4103 = vmatprep.mubr.bf16.mxu1 %v3903_v42 }
 0xcbc   : > { %v3830_v22 = vadd.f32 %v3829_v50, %v7385_v30  ;;  %v3831_v45 = vpop.f32.mrb[99].mxu0  ;;  %4104 = vmatmul.mubr.bf16.gmra.mrb[108].mxu1 %v3902_v56  ;;  %v3880_v44 = vmax.f32 %v3826_v28, 0.0 }
 0xcbd   : > { %v3832_v29 = vadd.f32 %v3831_v45, %v7387_v18  ;;  %v3881_v0 = vmax.f32 %v3828_v13, 0.0 }
 0xcbe   : > { %v3882_v53 = vmax.f32 %v3830_v22, 0.0 }
 0xcbf   : > { %v3883_v21 = vmax.f32 %v3832_v29, 0.0 }
 0xcc0   : > { %v3904_v63 = vpack.c.bf16 %v3882_v53, %v3880_v44 }
 0xcc1   : > { %v3905_v57 = vpack.c.bf16 %v3883_v21, %v3881_v0  ;;  %v3835_v35 = vpop.f32.mrb[100].mxu0 }
 0xcc2   : > { %v3836_v26 = vadd.f32 %v3835_v35, %v7385_v30  ;;  %v3837_v47 = vpop.f32.mrb[101].mxu0 }
 0xcc3   : > { %v3838_v5 = vadd.f32 %v3837_v47, %v7387_v18  ;;  %v3839_v1 = vpop.f32.mrb[102].mxu0  ;;  %4111 = vmatprep.mubr.bf16.mxu1 %v3905_v57 }
 0xcc4   : > { %v3840_v12 = vadd.f32 %v3839_v1, %v7385_v30  ;;  %v3841_v61 = vpop.f32.mrb[103].mxu0  ;;  %4112 = vmatmul.mubr.bf16.gmra.mrb[112].mxu1 %v3904_v63  ;;  %v3884_v62 = vmax.f32 %v3836_v26, 0.0 }
 0xcc5   : > { %v3842_v33 = vadd.f32 %v3841_v61, %v7387_v18  ;;  %v3885_v58 = vmax.f32 %v3838_v5, 0.0 }
 0xcc6   : > { %v3886_v36 = vmax.f32 %v3840_v12, 0.0 }
 0xcc7   : > { %v3887_v59 = vmax.f32 %v3842_v33, 0.0 }
 0xcc8   : > { %v3906_v24 = vpack.c.bf16 %v3886_v36, %v3884_v62 }
 0xcc9   : > { %v3907_v10 = vpack.c.bf16 %v3887_v59, %v3885_v58 }
 0xccb   : > { %4119 = vmatprep.mubr.bf16.mxu1 %v3907_v10 }
 0xccc   : > { %4120 = vmatmul.mubr.bf16.gmra.mrb[116].mxu1 %v3906_v24 }
 0xcea   : > { %v3845_v16 = vpop.f32.mrb[104].mxu0 }
 0xceb   : > { %v3846_v17 = vadd.f32 %v3845_v16, %v7385_v30  ;;  %v3847_v7 = vpop.f32.mrb[105].mxu0 }
 0xcec   : > { %v3848_v4 = vadd.f32 %v3847_v7, %v7387_v18  ;;  %v3849_v19 = vpop.f32.mrb[106].mxu0 }
 0xced   : > { %v3850_v43 = vadd.f32 %v3849_v19, %v7385_v30  ;;  %v3851_v55 = vpop.f32.mrb[107].mxu0  ;;  %v3888_v3 = vmax.f32 %v3846_v17, 0.0 }
 0xcee   : > { %v3852_v27 = vadd.f32 %v3851_v55, %v7387_v18  ;;  %v3889_v8 = vmax.f32 %v3848_v4, 0.0 }
 0xcef   : > { %v3890_v41 = vmax.f32 %v3850_v43, 0.0 }
 0xcf0   : > { %v3891_v6 = vmax.f32 %v3852_v27, 0.0 }
 0xcf1   : > { %v3908_v38 = vpack.c.bf16 %v3890_v41, %v3888_v3 }
 0xcf2   : > { %v3909_v25 = vpack.c.bf16 %v3891_v6, %v3889_v8  ;;  %v3855_v37 = vpop.f32.mrb[108].mxu0 }
 0xcf3   : > { %v3856_v34 = vadd.f32 %v3855_v37, %v7385_v30  ;;  %v3857_v56 = vpop.f32.mrb[109].mxu0 }
 0xcf4   : > { %v3858_v42 = vadd.f32 %v3857_v56, %v7387_v18  ;;  %v3859_v60 = vpop.f32.mrb[110].mxu0  ;;  %4127 = vmatprep.mubr.bf16.mxu1 %v3909_v25 }
 0xcf5   : > { %v3860_v28 = vadd.f32 %v3859_v60, %v7385_v30  ;;  %v3861_v49 = vpop.f32.mrb[111].mxu0  ;;  %4128 = vmatmul.mubr.bf16.gmra.mrb[120].mxu1 %v3908_v38  ;;  %v3892_v50 = vmax.f32 %v3856_v34, 0.0  ;;  %v7426_v30 = vld [vmem:[%s695_s22] ss:$0 sm:$0xff]  ;;  %s7654_s22 = sld [smem:[#allocation20_spill]] }
 0xcf6   : > { %v3862_v13 = vadd.f32 %v3861_v49, %v7387_v18  ;;  %v3893_v45 = vmax.f32 %v3858_v42, 0.0 }
 0xcf7   : > { %v3894_v22 = vmax.f32 %v3860_v28, 0.0 }
 0xcf8   : > { %v3895_v29 = vmax.f32 %v3862_v13, 0.0 }
 0xcf9   : > { %v3910_v44 = vpack.c.bf16 %v3894_v22, %v3892_v50 }
 0xcfa   : > { %v3911_v53 = vpack.c.bf16 %v3895_v29, %v3893_v45 }
 0xcfb   : > { %s4559_s11 = sshll.u32 %s7654_s22, 11 }
 0xcfc   : > { %4135 = vmatprep.mubr.bf16.mxu1 %v3911_v53  ;;  %s7478_s17 = scalar_lea.hbm %s7655_s20, %s4559_s11 }
 0xcfd   : > { %4136 = vmatmul.mubr.bf16.gmra.mrb[124].mxu1 %v3910_v44 }
 0xd66   : > { %v4656_v0 = vpop.f32.mrb[96].mxu1 }
 0xd67   : > { %v4657_v21 = vpop.f32.mrb[97].mxu1 }
 0xd68   : > { %v4658_v63 = vadd.f32 %v4657_v21, %v4656_v0  ;;  %v4659_v18 = vpop.f32.mrb[98].mxu1 }
 0xd69   : > { %v4660_v57 = vpop.f32.mrb[99].mxu1 }
 0xd6a   : > { %v4082_v35 = vadd.f32 %v4658_v63, %v7426_v30  ;;  %v4661_v26 = vadd.f32 %v4660_v57, %v4659_v18 }
 0xd6c   : > { %v4144_v47 = vadd.f32 %v4082_v35, %v7138_v40  ;;  %v4085_v5 = vadd.f32 %v4661_v26, %v7426_v30 }
 0xd6e   : > { %4160 = vst [vmem:[%s6221_s12] sm:$0xff] %v4144_v47  ;;  %v4145_v1 = vadd.f32 %v4085_v5, %v7141_v23  ;;  %v4662_v12 = vpop.f32.mrb[100].mxu1 }
 0xd6f   : > { %v4663_v61 = vpop.f32.mrb[101].mxu1 }
 0xd70   : > { %4161 = vst [vmem:[%s6221_s12 + $0x8] sm:$0xff] %v4145_v1  ;;  %v4664_v33 = vadd.f32 %v4663_v61, %v4662_v12  ;;  %v4665_v62 = vpop.f32.mrb[102].mxu1 }
 0xd71   : > { %v4666_v36 = vpop.f32.mrb[103].mxu1 }
 0xd72   : > { %v4090_v58 = vadd.f32 %v4664_v33, %v7426_v30  ;;  %v4667_v59 = vadd.f32 %v4666_v36, %v4665_v62 }
 0xd74   : > { %v4146_v24 = vadd.f32 %v4090_v58, %v7145_v46  ;;  %v4093_v40 = vadd.f32 %v4667_v59, %v7426_v30 }
 0xd76   : > { %4162 = vst [vmem:[%s6221_s12 + $0x10] sm:$0xff] %v4146_v24  ;;  %v4147_v10 = vadd.f32 %v4093_v40, %v7150_v2 }
 0xd78   : > { %4163 = vst [vmem:[%s6221_s12 + $0x18] sm:$0xff] %v4147_v10 }
 0xd87   : > { %v4668_v23 = vpop.f32.mrb[104].mxu1 }
 0xd88   : > { %v4669_v16 = vpop.f32.mrb[105].mxu1 }
 0xd89   : > { %v4670_v17 = vadd.f32 %v4669_v16, %v4668_v23  ;;  %v4671_v7 = vpop.f32.mrb[106].mxu1 }
 0xd8a   : > { %v4672_v4 = vpop.f32.mrb[107].mxu1 }
 0xd8b   : > { %v4098_v19 = vadd.f32 %v4670_v17, %v7426_v30  ;;  %v4673_v43 = vadd.f32 %v4672_v4, %v4671_v7 }
 0xd8d   : > { %v4148_v55 = vadd.f32 %v4098_v19, %v7154_v9  ;;  %v4101_v46 = vadd.f32 %v4673_v43, %v7426_v30 }
 0xd8f   : > { %4164 = vst [vmem:[%s6221_s12 + $0x20] sm:$0xff] %v4148_v55  ;;  %v4149_v27 = vadd.f32 %v4101_v46, %v7157_v32  ;;  %v4674_v3 = vpop.f32.mrb[108].mxu1 }
 0xd90   : > { %v4675_v2 = vpop.f32.mrb[109].mxu1 }
 0xd91   : > { %4165 = vst [vmem:[%s6221_s12 + $0x28] sm:$0xff] %v4149_v27  ;;  %v4676_v41 = vadd.f32 %v4675_v2, %v4674_v3  ;;  %v4677_v8 = vpop.f32.mrb[110].mxu1 }
 0xd92   : > { %v4678_v6 = vpop.f32.mrb[111].mxu1 }
 0xd93   : > { %v4106_v38 = vadd.f32 %v4676_v41, %v7426_v30  ;;  %v4679_v25 = vadd.f32 %v4678_v6, %v4677_v8 }
 0xd95   : > { %v4150_v37 = vadd.f32 %v4106_v38, %v7161_v20  ;;  %v4109_v9 = vadd.f32 %v4679_v25, %v7426_v30 }
 0xd97   : > { %4166 = vst [vmem:[%s6221_s12 + $0x30] sm:$0xff] %v4150_v37  ;;  %v4151_v34 = vadd.f32 %v4109_v9, %v7165_v51  ;;  %v4680_v56 = vpop.f32.mrb[112].mxu1 }
 0xd98   : > { %v4681_v32 = vpop.f32.mrb[113].mxu1 }
 0xd99   : > { %4167 = vst [vmem:[%s6221_s12 + $0x38] sm:$0xff] %v4151_v34  ;;  %v4682_v42 = vadd.f32 %v4681_v32, %v4680_v56  ;;  %v4683_v60 = vpop.f32.mrb[114].mxu1 }
 0xd9a   : > { %v4684_v28 = vpop.f32.mrb[115].mxu1 }
 0xd9b   : > { %v4114_v49 = vadd.f32 %v4682_v42, %v7426_v30  ;;  %v4685_v13 = vadd.f32 %v4684_v28, %v4683_v60 }
 0xd9d   : > { %v4152_v50 = vadd.f32 %v4114_v49, %v7169_v39  ;;  %v4117_v20 = vadd.f32 %v4685_v13, %v7426_v30 }
 0xd9f   : > { %4168 = vst [vmem:[%s6221_s12 + $0x40] sm:$0xff] %v4152_v50  ;;  %v4153_v22 = vadd.f32 %v4117_v20, %v7173_v31  ;;  %v4686_v45 = vpop.f32.mrb[116].mxu1 }
 0xda0   : > { %v4687_v51 = vpop.f32.mrb[117].mxu1 }
 0xda1   : > { %4169 = vst [vmem:[%s6221_s12 + $0x48] sm:$0xff] %v4153_v22  ;;  %v4688_v29 = vadd.f32 %v4687_v51, %v4686_v45  ;;  %v4689_v44 = vpop.f32.mrb[118].mxu1 }
 0xda2   : > { %v4690_v53 = vpop.f32.mrb[119].mxu1 }
 0xda3   : > { %v4122_v0 = vadd.f32 %v4688_v29, %v7426_v30  ;;  %v4691_v21 = vadd.f32 %v4690_v53, %v4689_v44 }
 0xda5   : > { %v4154_v63 = vadd.f32 %v4122_v0, %v7177_v52  ;;  %v4125_v39 = vadd.f32 %v4691_v21, %v7426_v30 }
 0xda7   : > { %4170 = vst [vmem:[%s6221_s12 + $0x50] sm:$0xff] %v4154_v63  ;;  %v4155_v18 = vadd.f32 %v4125_v39, %v7181_v14 }
 0xda9   : > { %4171 = vst [vmem:[%s6221_s12 + $0x58] sm:$0xff] %v4155_v18 }
 0xdc8   : > { %v4692_v31 = vpop.f32.mrb[120].mxu1 }
 0xdc9   : > { %v4693_v57 = vpop.f32.mrb[121].mxu1 }
 0xdca   : > { %v4694_v35 = vadd.f32 %v4693_v57, %v4692_v31  ;;  %v4695_v26 = vpop.f32.mrb[122].mxu1 }
 0xdcb   : > { %v4696_v47 = vpop.f32.mrb[123].mxu1 }
 0xdcc   : > { %v4130_v5 = vadd.f32 %v4694_v35, %v7426_v30  ;;  %v4697_v1 = vadd.f32 %v4696_v47, %v4695_v26 }
 0xdce   : > { %v4156_v12 = vadd.f32 %v4130_v5, %v7186_v15  ;;  %v4133_v52 = vadd.f32 %v4697_v1, %v7426_v30 }
 0xdd0   : > { %4172 = vst [vmem:[%s6221_s12 + $0x60] sm:$0xff] %v4156_v12  ;;  %v4157_v61 = vadd.f32 %v4133_v52, %v7189_v11  ;;  %v4698_v14 = vpop.f32.mrb[124].mxu1 }
 0xdd1   : > { %v4699_v33 = vpop.f32.mrb[125].mxu1 }
 0xdd2   : > { %4173 = vst [vmem:[%s6221_s12 + $0x68] sm:$0xff] %v4157_v61  ;;  %v4700_v62 = vadd.f32 %v4699_v33, %v4698_v14  ;;  %v4701_v36 = vpop.f32.mrb[126].mxu1 }
 0xdd3   : > { %v4702_v58 = vpop.f32.mrb[127].mxu1 }
 0xdd4   : > { %v4138_v59 = vadd.f32 %v4700_v62, %v7426_v30  ;;  %v4703_v24 = vadd.f32 %v4702_v58, %v4701_v36 }
 0xdd6   : > { %v4158_v15 = vadd.f32 %v4138_v59, %v7193_v54  ;;  %v4141_v40 = vadd.f32 %v4703_v24, %v7426_v30 }
 0xdd8   : > { %4174 = vst [vmem:[%s6221_s12 + $0x70] sm:$0xff] %v4158_v15  ;;  %v4159_v11 = vadd.f32 %v4141_v40, %v7197_v48 }
 0xdda   : > { %4175 = vst [vmem:[%s6221_s12 + $0x78] sm:$0xff] %v4159_v11 }
 0xddb   : > { %5584 = shalt.err (!%p5581_p10)
}
 0xddc   : > { %s5585_s12 = scalar_lea.hbm %s7478_s17, 2048  ;;  %s5589_s30 = scalar_lea.hbm %s7655_s20, 4096 }
 0xddd   : > { %p5586_p12 = scmp.ne.s32.totalorder %s7478_s17, %s5585_s12  ;;  %p5590_p3 = scmp.lt.u32.totalorder %s7478_s17, %s7655_s20 }
 0xdde   : > { %p5591_p0 = scmp.lt.u32.totalorder %s5589_s30, %s5585_s12  ;;  %p5593_p1 = scmp.lt.u32.totalorder %s5585_s12, %s7478_s17 }
 0xddf   : > { %p5587_p6 = pnand %p5586_p12, %p7657_p9 }
 0xde0   : > { %p5592_p2 = por %p5591_p0, %p5590_p3 }
 0xde1   : > { %p5588_p13 = pneg %p5587_p6 }
 0xde2   : > { %p5594_p11 = por %p5593_p1, %p5592_p2 }
 0xde4   : > { %p5595_p7 = pnand %p5594_p11, %p5588_p13 }
 0xde6   : > { %5598 = shalt.err (!%p5595_p7)
}
 0xde7   : > { %s5720_s4 = smov 128   ;;  %s5721_s19 = smov 8  }
 0xde8   : > { %4942 = dma.vmem_to_hbm [thread:$0]  (%p7657_p9), %s7480_s8, 2048, %s7478_s17, %s7487_s7, %s5720_s4, %s5720_s4, %s5721_s19  }
 0xde9 PF: > { %s7658_s14 = sld [smem:[#allocation23_spill]]  ;;  %s7659_s5 = sld [smem:[#allocation18_spill]] }
 0xdea   : > { %s7660_s28 = sld [smem:[#allocation28_spill]] }
 0xdef   : > { %p4971_p8 = scmp.ge.s32.totalorder %s7658_s14, 2  ;;  %s4206_s23 = sand.u32 1, %s7659_s5  }
 0xdf0   : > { %p7661_p5 = scmp.ne.s32.totalorder %s7660_s28, 0  ;;  %s4207_s13 = scalar_lea.sflag [#allocation4], %s4206_s23 }
 0xdf2   : > { %p4965_p4 = pnand %p4971_p8, %p7661_p5 }
 0xdf4   : > { %5656 = dma.done.wait (!%p4965_p4), %s4207_s13, 2048  }
 0xdf5   : > { %5658 = vsyncadd (!%p4965_p4), %s4207_s13, 4294965248  ;;  %s29_s13 = sadd.s32 1, %s7658_s14   ;;  %s7662_s21 = sld [smem:[#allocation16_spill]] }
 0xdf6   : > { %p26_p10 = scmp.ge.s32.totalorder %s29_s13, 6   ;;  %s7663_s22 = sld [smem:[#allocation17_spill]] }
 0xdf7   : > { %s7664_s23 = sld [smem:[#allocation27_spill]]  ;;  %s7665_s15 = sld [smem:[#allocation19_spill]] }
 0xdf8   : > { %s7666_s26 = sld [smem:[#allocation26_spill]]  ;;  %s7667_s27 = sld [smem:[#allocation21_spill]] }
 0xdf9   : > { %s7668_s28 = sld [smem:[#allocation22_spill]]  ;;  %s7669_s29 = sld [smem:[#allocation24_spill]] }
 0xdfa   : > { %s7670_s30 = sld [smem:[#allocation25_spill]]  ;;  %s7671_s24 = smov %s5677_s25 }
 0xdfb   :  { %28 = sbr.rel (!%p26_p10) target bundleno = 23 (0x17), region = 183 }
 0xdfd   : > { %s7672_s25 = smov %s7665_s15 }
 0xe02   :  { %4212 = vsyncpa [#allocation3], 1 }
 0xe03   :  { %4214 = vsyncpa [#allocation3 + $0x1], 1 }
 0xe04   :  { %4215 = vsyncpa [#allocation6], 1 }
 0xe05   :  { %4216 = vsyncpa [#allocation4], 1 }
 0xe06   :  { %4218 = vsyncpa [#allocation4 + $0x1], 1 }

</bundles_post_ra>
